<compile_context>
chip_gen: v6e
topology: v6e:2x2x1
jax: 0.10.0
libtpu: 0.0.40
codegen_flags: <defaults>
</compile_context>

<pallas_src>
import jax
import jax.numpy as jnp
from jax import lax
from jax.experimental import pallas as pl
from jax.experimental.pallas import tpu as pltpu

LEAKY_SLOPE = 0.01     # nn.LeakyReLU default
GN_EPS = 1e-5          # nn.GroupNorm default
PC_EPS = 1e-8          # PartialConv2d mask-ratio epsilon
WINSIZE = 9.0          # slide_winsize = 1*1*3*3 (single-channel mask)
NUM_GROUPS = 8


def _make_stage_kernel(stride, ho, wo, cin, cout):
    """PartialConv2d(3x3,pad=1,stride) + GroupNorm(8) + LeakyReLU, one sample."""
    n = ho * wo
    nphase = 1 if stride == 1 else 4
    gsz = cout // NUM_GROUPS

    def kernel(*refs):
        x_refs = refs[:nphase]
        msum_ref, w_ref, prm_ref, y_ref = refs[nphase:]

        # Load the halo(s) once and upcast to f32 so the 9 slice+reshape ops
        # stay layout-trivial (sublane-tile aligned); operands are cast back to
        # bf16 right before each MXU matmul.
        halos = [r[0].astype(jnp.float32) for r in x_refs]

        # --- PartialConv2d: 3x3 conv as 9 shifted matmuls (bf16 MXU, f32 acc) ---
        acc = None
        for dy in range(3):
            for dx in range(3):
                if stride == 1:
                    xs = halos[0][dy:dy + ho, dx:dx + wo, :]
                else:
                    ph = halos[(dy % 2) * 2 + (dx % 2)]
                    xs = ph[dy // 2:dy // 2 + ho, dx // 2:dx // 2 + wo, :]
                xs = xs.reshape(n, cin).astype(jnp.bfloat16)
                part = jnp.dot(xs, w_ref[dy * 3 + dx],
                               preferred_element_type=jnp.float32)
                acc = part if acc is None else acc + part      # (n, cout) f32

        # --- mask renormalisation (PartialConv2d) ---
        msum = msum_ref[0]                                     # (n, 1) f32
        ratio = WINSIZE / (msum + PC_EPS)
        upd = jnp.clip(msum, 0.0, 1.0)
        scale = ratio * upd

        prm = prm_ref[...]                                     # (3, cout) f32
        bias, gamma, beta = prm[0:1, :], prm[1:2, :], prm[2:3, :]
        out = (acc * scale + bias) * upd                       # (n, cout) f32

        # --- GroupNorm(8, cout): per-sample stats over (spatial, chans-in-group)
        csum = jnp.sum(out, axis=0, keepdims=True)             # (1, cout)
        csq = jnp.sum(out * out, axis=0, keepdims=True)        # (1, cout)
        # block-diagonal "same group" indicator built in-kernel (no extra DMAs);
        # float floor trick avoids vector integer division.
        ir = lax.broadcasted_iota(jnp.int32, (cout, cout), 0).astype(jnp.float32)
        ic = lax.broadcasted_iota(jnp.int32, (cout, cout), 1).astype(jnp.float32)
        inv_gsz = 1.0 / gsz
        same = (jnp.floor((ir + 0.5) * inv_gsz)
                == jnp.floor((ic + 0.5) * inv_gsz)).astype(jnp.float32)
        cnt = jnp.float32(n * gsz)
        mean = jnp.dot(csum, same, preferred_element_type=jnp.float32) / cnt
        ex2 = jnp.dot(csq, same, preferred_element_type=jnp.float32) / cnt
        var = ex2 - mean * mean
        yv = (out - mean) * lax.rsqrt(var + GN_EPS) * gamma + beta

        # --- LeakyReLU ---
        yv = jnp.where(yv >= 0, yv, LEAKY_SLOPE * yv)
        # TODO(synk): with small out_ch (<128 lanes) this store is lane-masked;
        # pad cout or fold spatial into lanes if it shows up in profiles.
        y_ref[0] = yv

    return kernel


def partial_conv_gn_lrelu(x_nhwc, mask_nhw, w_oihw, bias, gamma, beta, stride):
    """One PartialConv2d(3x3, pad=1, stride) + GroupNorm(8) + LeakyReLU stage.

    x_nhwc:   (B, H, W, Cin) f32
    mask_nhw: (B, H, W)      f32 single-channel mask
    returns   y (B, Ho, Wo, Cout) f32, new_mask (B, Ho, Wo) f32
    """
    b, h, w, cin = x_nhwc.shape
    cout = w_oihw.shape[0]
    ho = (h + 2 - 3) // stride + 1
    wo = (w + 2 - 3) // stride + 1
    n = ho * wo

    # masked, zero-padded halo of the input; bf16 on the wire halves HBM/VMEM
    xm = x_nhwc * mask_nhw[..., None]
    xpad = jnp.pad(xm, ((0, 0), (1, 1), (1, 1), (0, 0))).astype(jnp.bfloat16)
    if stride == 1:
        phases = [xpad]
    else:  # even/odd phase split so the kernel only needs contiguous slices
        phases = [xpad[:, p::2, q::2, :] for p in range(2) for q in range(2)]

    # 3x3 box-sum of the 1-channel mask (trivial pooling -> wrapper glue)
    mpad = jnp.pad(mask_nhw, ((0, 0), (1, 1), (1, 1)))
    msum = None
    for dy in range(3):
        for dx in range(3):
            sl = mpad[:, dy:dy + stride * (ho - 1) + 1:stride,
                         dx:dx + stride * (wo - 1) + 1:stride]
            msum = sl if msum is None else msum + sl
    new_mask = jnp.clip(msum, 0.0, 1.0)                 # PartialConv2d updated mask
    msum_k = msum.reshape(b, n, 1).astype(jnp.float32)

    # weights: (Cout, Cin, 3, 3) -> (9, Cin, Cout), bf16 for the MXU
    w9 = jnp.transpose(w_oihw, (2, 3, 1, 0)).reshape(9, cin, cout)
    w9 = w9.astype(jnp.bfloat16)
    prm = jnp.stack([bias, gamma, beta], axis=0).astype(jnp.float32)   # (3, Cout)

    kernel = _make_stage_kernel(stride, ho, wo, cin, cout)
    in_specs = (
        [pl.BlockSpec((1,) + p.shape[1:], lambda i: (i, 0, 0, 0)) for p in phases]
        + [pl.BlockSpec((1, n, 1), lambda i: (i, 0, 0)),
           pl.BlockSpec((9, cin, cout), lambda i: (0, 0, 0)),
           pl.BlockSpec((3, cout), lambda i: (0, 0))])

    # TODO(synk): for very large H*W add a spatial grid axis with a two-pass
    # GroupNorm (accumulate per-group sum/sumsq across tiles, then normalise),
    # so a whole sample need not be VMEM-resident and the v7x megacore gets a
    # parallel axis even when B is small; optionally fuse both stages per
    # sample on v5e/v6e (128 MiB VMEM) to skip the intermediate HBM round trip.
    y = pl.pallas_call(
        kernel,
        out_shape=jax.ShapeDtypeStruct((b, n, cout), jnp.float32),
        grid=(b,),
        in_specs=in_specs,
        out_specs=pl.BlockSpec((1, n, cout), lambda i: (i, 0, 0)),
        compiler_params=pltpu.CompilerParams(
            dimension_semantics=("parallel",),
            vmem_limit_bytes=48 * 1024 * 1024),
    )(*phases, msum_k, w9, prm)
    return y.reshape(b, ho, wo, cout), new_mask


def init_down_block_params(key, in_ch, out_ch):
    ks = jax.random.split(key, 8)

    def conv_init(kw, kb, cin, cout):
        bound = 1.0 / (cin * 9) ** 0.5
        w = jax.random.uniform(kw, (cout, cin, 3, 3), jnp.float32, -bound, bound)
        bb = jax.random.uniform(kb, (cout,), jnp.float32, -bound, bound)
        return w, bb

    w1, b1 = conv_init(ks[0], ks[1], in_ch, out_ch)
    w2, b2 = conv_init(ks[2], ks[3], out_ch, out_ch)
    g1 = 1.0 + 0.1 * jax.random.normal(ks[4], (out_ch,), jnp.float32)
    be1 = 0.1 * jax.random.normal(ks[5], (out_ch,), jnp.float32)
    g2 = 1.0 + 0.1 * jax.random.normal(ks[6], (out_ch,), jnp.float32)
    be2 = 0.1 * jax.random.normal(ks[7], (out_ch,), jnp.float32)
    return dict(w1=w1, b1=b1, g1=g1, beta1=be1, w2=w2, b2=b2, g2=g2, beta2=be2)


def down_block_forward(params, x_nchw, mask_nchw=None, return_mask=True):
    x = jnp.transpose(x_nchw, (0, 2, 3, 1))                    # NCHW -> NHWC
    b, h, w, _ = x.shape
    if mask_nchw is None:
        mask = jnp.ones((b, h, w), jnp.float32)
    else:
        mask = mask_nchw[:, 0, :, :]
    y, mask = partial_conv_gn_lrelu(x, mask, params["w1"], params["b1"],
                                    params["g1"], params["beta1"], stride=1)
    y, mask = partial_conv_gn_lrelu(y, mask, params["w2"], params["b2"],
                                    params["g2"], params["beta2"], stride=2)
    y_nchw = jnp.transpose(y, (0, 3, 1, 2))
    m_nchw = mask[:, None, :, :]
    if return_mask:
        return y_nchw, m_nchw
    return y_nchw


# ---------- pure-JAX reference (for correctness check only) ----------
# The conv operands are cast to bf16 to match the kernel's bf16 MXU inputs
# (accumulation is f32 in both paths); everything else is f32.
def _ref_partial_conv(x, mask, w, b, stride):
    dn = ("NHWC", "OIHW", "NHWC")
    xm = (x * mask).astype(jnp.bfloat16)
    wb = w.astype(jnp.bfloat16)
    raw = lax.conv_general_dilated(xm, wb, (stride, stride), ((1, 1), (1, 1)),
                                   dimension_numbers=dn,
                                   preferred_element_type=jnp.float32) + b
    wm = jnp.ones((1, 1, 3, 3), jnp.float32)
    upd = lax.conv_general_dilated(mask, wm, (stride, stride), ((1, 1), (1, 1)),
                                   dimension_numbers=dn)
    ratio = WINSIZE / (upd + PC_EPS)
    updc = jnp.clip(upd, 0.0, 1.0)
    ratio = ratio * updc
    out = ((raw - b) * ratio + b) * updc
    return out, updc


def _ref_gn_lrelu(x, gamma, beta):
    b, h, w, c = x.shape
    xr = x.reshape(b, h, w, NUM_GROUPS, c // NUM_GROUPS)
    mean = xr.mean(axis=(1, 2, 4), keepdims=True)
    var = ((xr - mean) ** 2).mean(axis=(1, 2, 4), keepdims=True)
    xn = ((xr - mean) / jnp.sqrt(var + GN_EPS)).reshape(b, h, w, c)
    xn = xn * gamma + beta
    return jnp.where(xn >= 0, xn, LEAKY_SLOPE * xn)


def _ref_forward(params, x_nchw, mask_nchw):
    x = jnp.transpose(x_nchw, (0, 2, 3, 1))
    m = jnp.transpose(mask_nchw, (0, 2, 3, 1))
    y, m = _ref_partial_conv(x, m, params["w1"], params["b1"], 1)
    y = _ref_gn_lrelu(y, params["g1"], params["beta1"])
    y, m = _ref_partial_conv(y, m, params["w2"], params["b2"], 2)
    y = _ref_gn_lrelu(y, params["g2"], params["beta2"])
    return jnp.transpose(y, (0, 3, 1, 2)), jnp.transpose(m, (0, 3, 1, 2))


if __name__ == "__main__":
    key = jax.random.PRNGKey(0)
    k_x, k_m, k_p = jax.random.split(key, 3)

    B, IN_CH, OUT_CH, H, W = 2, 4, 16, 16, 16
    x = jax.random.normal(k_x, (B, IN_CH, H, W), jnp.float32)
    # binary single-channel mask with holes (PartialConv2d default: not multi_channel)
    mask = (jax.random.uniform(k_m, (B, 1, H, W)) > 0.3).astype(jnp.float32)

    params = init_down_block_params(k_p, IN_CH, OUT_CH)

    y, m_out = down_block_forward(params, x, mask, return_mask=True)
    y = jax.block_until_ready(y)
    m_out = jax.block_until_ready(m_out)

    y_ref, m_ref = _ref_forward(params, x, mask)
    assert y.shape == (B, OUT_CH, H // 2, W // 2), y.shape
    assert m_out.shape == (B, 1, H // 2, W // 2), m_out.shape
    assert jnp.allclose(y, y_ref, rtol=1e-3, atol=1e-3), \
        float(jnp.max(jnp.abs(y - y_ref)))
    assert jnp.allclose(m_out, m_ref, rtol=1e-5, atol=1e-5)

    print("KERNEL_OK")
</pallas_src>

<mosaic_0001>
module attributes {stable_mosaic.version = 11 : i64} {
  func.func @kernel(%arg0: i32, %arg1: memref<1x18x18x4xbf16, #tpu.memory_space<vmem>>, %arg2: memref<1x256x1xf32, #tpu.memory_space<vmem>>, %arg3: memref<9x4x16xbf16, #tpu.memory_space<vmem>>, %arg4: memref<3x16xf32, #tpu.memory_space<vmem>>, %arg5: memref<1x256x16xf32, #tpu.memory_space<vmem>>) attributes {dimension_semantics = [#tpu.dimension_semantics<parallel>], iteration_bounds = array<i64: 2>, scalar_prefetch = 0 : i64, scratch_operands = 0 : i64, tpu.core_type = #tpu.core_type<tc>, window_params = [{transform_indices = @transform_0, window_bounds = array<i64: 1, 18, 18, 4>}, {transform_indices = @transform_1, window_bounds = array<i64: 1, 256, 1>}, {pipeline_mode = #tpu.pipeline_mode<synchronous>, transform_indices = @transform_2, window_bounds = array<i64: 9, 4, 16>}, {pipeline_mode = #tpu.pipeline_mode<synchronous>, transform_indices = @transform_3, window_bounds = array<i64: 3, 16>}, {transform_indices = @transform_4, window_bounds = array<i64: 1, 256, 16>}]} {
    %c0 = arith.constant 0 : index
    %c0_0 = arith.constant 0 : index
    %c0_1 = arith.constant 0 : index
    %c0_2 = arith.constant 0 : index
    %0 = vector.load %arg1[%c0, %c0_0, %c0_1, %c0_2] : memref<1x18x18x4xbf16, #tpu.memory_space<vmem>>, vector<1x18x18x4xbf16>
    %1 = vector.shape_cast %0 : vector<1x18x18x4xbf16> to vector<18x18x4xbf16>
    %2 = arith.extf %1 : vector<18x18x4xbf16> to vector<18x18x4xf32>
    %3 = vector.extract_strided_slice %2 {offsets = [0, 0, 0], sizes = [16, 16, 4], strides = [1, 1, 1]} : vector<18x18x4xf32> to vector<16x16x4xf32>
    %4 = vector.shape_cast %3 : vector<16x16x4xf32> to vector<256x4xf32>
    %5 = arith.truncf %4 : vector<256x4xf32> to vector<256x4xbf16>
    %c0_3 = arith.constant 0 : index
    %c0_4 = arith.constant 0 : index
    %c0_5 = arith.constant 0 : index
    %6 = vector.load %arg3[%c0_3, %c0_4, %c0_5] : memref<9x4x16xbf16, #tpu.memory_space<vmem>>, vector<1x4x16xbf16>
    %7 = vector.shape_cast %6 : vector<1x4x16xbf16> to vector<4x16xbf16>
    %cst = arith.constant dense<0.000000e+00> : vector<256x16xf32>
    %8 = tpu.matmul %5, %7, %cst {dimension_numbers = #tpu.dot_dimension_numbers<[1], [0], [0], [1], [0, 0, 1, 1], [], []>} : vector<256x4xbf16>, vector<4x16xbf16>, vector<256x16xf32> -> vector<256x16xf32>
    %9 = vector.extract_strided_slice %2 {offsets = [0, 1, 0], sizes = [16, 16, 4], strides = [1, 1, 1]} : vector<18x18x4xf32> to vector<16x16x4xf32>
    %10 = vector.shape_cast %9 : vector<16x16x4xf32> to vector<256x4xf32>
    %11 = arith.truncf %10 : vector<256x4xf32> to vector<256x4xbf16>
    %c1 = arith.constant 1 : index
    %c0_6 = arith.constant 0 : index
    %c0_7 = arith.constant 0 : index
    %12 = vector.load %arg3[%c1, %c0_6, %c0_7] : memref<9x4x16xbf16, #tpu.memory_space<vmem>>, vector<1x4x16xbf16>
    %13 = vector.shape_cast %12 : vector<1x4x16xbf16> to vector<4x16xbf16>
    %cst_8 = arith.constant dense<0.000000e+00> : vector<256x16xf32>
    %14 = tpu.matmul %11, %13, %cst_8 {dimension_numbers = #tpu.dot_dimension_numbers<[1], [0], [0], [1], [0, 0, 1, 1], [], []>} : vector<256x4xbf16>, vector<4x16xbf16>, vector<256x16xf32> -> vector<256x16xf32>
    %15 = arith.addf %8, %14 : vector<256x16xf32>
    %16 = vector.extract_strided_slice %2 {offsets = [0, 2, 0], sizes = [16, 16, 4], strides = [1, 1, 1]} : vector<18x18x4xf32> to vector<16x16x4xf32>
    %17 = vector.shape_cast %16 : vector<16x16x4xf32> to vector<256x4xf32>
    %18 = arith.truncf %17 : vector<256x4xf32> to vector<256x4xbf16>
    %c2 = arith.constant 2 : index
    %c0_9 = arith.constant 0 : index
    %c0_10 = arith.constant 0 : index
    %19 = vector.load %arg3[%c2, %c0_9, %c0_10] : memref<9x4x16xbf16, #tpu.memory_space<vmem>>, vector<1x4x16xbf16>
    %20 = vector.shape_cast %19 : vector<1x4x16xbf16> to vector<4x16xbf16>
    %cst_11 = arith.constant dense<0.000000e+00> : vector<256x16xf32>
    %21 = tpu.matmul %18, %20, %cst_11 {dimension_numbers = #tpu.dot_dimension_numbers<[1], [0], [0], [1], [0, 0, 1, 1], [], []>} : vector<256x4xbf16>, vector<4x16xbf16>, vector<256x16xf32> -> vector<256x16xf32>
    %22 = arith.addf %15, %21 : vector<256x16xf32>
    %23 = vector.extract_strided_slice %2 {offsets = [1, 0, 0], sizes = [16, 16, 4], strides = [1, 1, 1]} : vector<18x18x4xf32> to vector<16x16x4xf32>
    %24 = vector.shape_cast %23 : vector<16x16x4xf32> to vector<256x4xf32>
    %25 = arith.truncf %24 : vector<256x4xf32> to vector<256x4xbf16>
    %c3 = arith.constant 3 : index
    %c0_12 = arith.constant 0 : index
    %c0_13 = arith.constant 0 : index
    %26 = vector.load %arg3[%c3, %c0_12, %c0_13] : memref<9x4x16xbf16, #tpu.memory_space<vmem>>, vector<1x4x16xbf16>
    %27 = vector.shape_cast %26 : vector<1x4x16xbf16> to vector<4x16xbf16>
    %cst_14 = arith.constant dense<0.000000e+00> : vector<256x16xf32>
    %28 = tpu.matmul %25, %27, %cst_14 {dimension_numbers = #tpu.dot_dimension_numbers<[1], [0], [0], [1], [0, 0, 1, 1], [], []>} : vector<256x4xbf16>, vector<4x16xbf16>, vector<256x16xf32> -> vector<256x16xf32>
    %29 = arith.addf %22, %28 : vector<256x16xf32>
    %30 = vector.extract_strided_slice %2 {offsets = [1, 1, 0], sizes = [16, 16, 4], strides = [1, 1, 1]} : vector<18x18x4xf32> to vector<16x16x4xf32>
    %31 = vector.shape_cast %30 : vector<16x16x4xf32> to vector<256x4xf32>
    %32 = arith.truncf %31 : vector<256x4xf32> to vector<256x4xbf16>
    %c4 = arith.constant 4 : index
    %c0_15 = arith.constant 0 : index
    %c0_16 = arith.constant 0 : index
    %33 = vector.load %arg3[%c4, %c0_15, %c0_16] : memref<9x4x16xbf16, #tpu.memory_space<vmem>>, vector<1x4x16xbf16>
    %34 = vector.shape_cast %33 : vector<1x4x16xbf16> to vector<4x16xbf16>
    %cst_17 = arith.constant dense<0.000000e+00> : vector<256x16xf32>
    %35 = tpu.matmul %32, %34, %cst_17 {dimension_numbers = #tpu.dot_dimension_numbers<[1], [0], [0], [1], [0, 0, 1, 1], [], []>} : vector<256x4xbf16>, vector<4x16xbf16>, vector<256x16xf32> -> vector<256x16xf32>
    %36 = arith.addf %29, %35 : vector<256x16xf32>
    %37 = vector.extract_strided_slice %2 {offsets = [1, 2, 0], sizes = [16, 16, 4], strides = [1, 1, 1]} : vector<18x18x4xf32> to vector<16x16x4xf32>
    %38 = vector.shape_cast %37 : vector<16x16x4xf32> to vector<256x4xf32>
    %39 = arith.truncf %38 : vector<256x4xf32> to vector<256x4xbf16>
    %c5 = arith.constant 5 : index
    %c0_18 = arith.constant 0 : index
    %c0_19 = arith.constant 0 : index
    %40 = vector.load %arg3[%c5, %c0_18, %c0_19] : memref<9x4x16xbf16, #tpu.memory_space<vmem>>, vector<1x4x16xbf16>
    %41 = vector.shape_cast %40 : vector<1x4x16xbf16> to vector<4x16xbf16>
    %cst_20 = arith.constant dense<0.000000e+00> : vector<256x16xf32>
    %42 = tpu.matmul %39, %41, %cst_20 {dimension_numbers = #tpu.dot_dimension_numbers<[1], [0], [0], [1], [0, 0, 1, 1], [], []>} : vector<256x4xbf16>, vector<4x16xbf16>, vector<256x16xf32> -> vector<256x16xf32>
    %43 = arith.addf %36, %42 : vector<256x16xf32>
    %44 = vector.extract_strided_slice %2 {offsets = [2, 0, 0], sizes = [16, 16, 4], strides = [1, 1, 1]} : vector<18x18x4xf32> to vector<16x16x4xf32>
    %45 = vector.shape_cast %44 : vector<16x16x4xf32> to vector<256x4xf32>
    %46 = arith.truncf %45 : vector<256x4xf32> to vector<256x4xbf16>
    %c6 = arith.constant 6 : index
    %c0_21 = arith.constant 0 : index
    %c0_22 = arith.constant 0 : index
    %47 = vector.load %arg3[%c6, %c0_21, %c0_22] : memref<9x4x16xbf16, #tpu.memory_space<vmem>>, vector<1x4x16xbf16>
    %48 = vector.shape_cast %47 : vector<1x4x16xbf16> to vector<4x16xbf16>
    %cst_23 = arith.constant dense<0.000000e+00> : vector<256x16xf32>
    %49 = tpu.matmul %46, %48, %cst_23 {dimension_numbers = #tpu.dot_dimension_numbers<[1], [0], [0], [1], [0, 0, 1, 1], [], []>} : vector<256x4xbf16>, vector<4x16xbf16>, vector<256x16xf32> -> vector<256x16xf32>
    %50 = arith.addf %43, %49 : vector<256x16xf32>
    %51 = vector.extract_strided_slice %2 {offsets = [2, 1, 0], sizes = [16, 16, 4], strides = [1, 1, 1]} : vector<18x18x4xf32> to vector<16x16x4xf32>
    %52 = vector.shape_cast %51 : vector<16x16x4xf32> to vector<256x4xf32>
    %53 = arith.truncf %52 : vector<256x4xf32> to vector<256x4xbf16>
    %c7 = arith.constant 7 : index
    %c0_24 = arith.constant 0 : index
    %c0_25 = arith.constant 0 : index
    %54 = vector.load %arg3[%c7, %c0_24, %c0_25] : memref<9x4x16xbf16, #tpu.memory_space<vmem>>, vector<1x4x16xbf16>
    %55 = vector.shape_cast %54 : vector<1x4x16xbf16> to vector<4x16xbf16>
    %cst_26 = arith.constant dense<0.000000e+00> : vector<256x16xf32>
    %56 = tpu.matmul %53, %55, %cst_26 {dimension_numbers = #tpu.dot_dimension_numbers<[1], [0], [0], [1], [0, 0, 1, 1], [], []>} : vector<256x4xbf16>, vector<4x16xbf16>, vector<256x16xf32> -> vector<256x16xf32>
    %57 = arith.addf %50, %56 : vector<256x16xf32>
    %58 = vector.extract_strided_slice %2 {offsets = [2, 2, 0], sizes = [16, 16, 4], strides = [1, 1, 1]} : vector<18x18x4xf32> to vector<16x16x4xf32>
    %59 = vector.shape_cast %58 : vector<16x16x4xf32> to vector<256x4xf32>
    %60 = arith.truncf %59 : vector<256x4xf32> to vector<256x4xbf16>
    %c8 = arith.constant 8 : index
    %c0_27 = arith.constant 0 : index
    %c0_28 = arith.constant 0 : index
    %61 = vector.load %arg3[%c8, %c0_27, %c0_28] : memref<9x4x16xbf16, #tpu.memory_space<vmem>>, vector<1x4x16xbf16>
    %62 = vector.shape_cast %61 : vector<1x4x16xbf16> to vector<4x16xbf16>
    %cst_29 = arith.constant dense<0.000000e+00> : vector<256x16xf32>
    %63 = tpu.matmul %60, %62, %cst_29 {dimension_numbers = #tpu.dot_dimension_numbers<[1], [0], [0], [1], [0, 0, 1, 1], [], []>} : vector<256x4xbf16>, vector<4x16xbf16>, vector<256x16xf32> -> vector<256x16xf32>
    %64 = arith.addf %57, %63 : vector<256x16xf32>
    %c0_30 = arith.constant 0 : index
    %c0_31 = arith.constant 0 : index
    %c0_32 = arith.constant 0 : index
    %65 = vector.load %arg2[%c0_30, %c0_31, %c0_32] : memref<1x256x1xf32, #tpu.memory_space<vmem>>, vector<1x256x1xf32>
    %66 = vector.shape_cast %65 : vector<1x256x1xf32> to vector<256x1xf32>
    %cst_33 = arith.constant 9.99999993E-9 : f32
    %67 = vector.broadcast %cst_33 : f32 to vector<256x1xf32>
    %68 = arith.addf %66, %67 : vector<256x1xf32>
    %cst_34 = arith.constant 9.000000e+00 : f32
    %69 = vector.broadcast %cst_34 : f32 to vector<256x1xf32>
    %70 = arith.divf %69, %68 : vector<256x1xf32>
    %cst_35 = arith.constant 0.000000e+00 : f32
    %cst_36 = arith.constant 1.000000e+00 : f32
    %71 = vector.broadcast %cst_35 : f32 to vector<256x1xf32>
    %72 = arith.maximumf %71, %66 : vector<256x1xf32>
    %73 = vector.broadcast %cst_36 : f32 to vector<256x1xf32>
    %74 = arith.minimumf %73, %72 : vector<256x1xf32>
    %75 = arith.mulf %70, %74 : vector<256x1xf32>
    %c0_37 = arith.constant 0 : index
    %c0_38 = arith.constant 0 : index
    %76 = vector.load %arg4[%c0_37, %c0_38] : memref<3x16xf32, #tpu.memory_space<vmem>>, vector<3x16xf32>
    %77 = vector.extract_strided_slice %76 {offsets = [0, 0], sizes = [1, 16], strides = [1, 1]} : vector<3x16xf32> to vector<1x16xf32>
    %78 = vector.extract_strided_slice %76 {offsets = [1, 0], sizes = [1, 16], strides = [1, 1]} : vector<3x16xf32> to vector<1x16xf32>
    %79 = vector.extract_strided_slice %76 {offsets = [2, 0], sizes = [1, 16], strides = [1, 1]} : vector<3x16xf32> to vector<1x16xf32>
    %80 = vector.broadcast %75 : vector<256x1xf32> to vector<256x16xf32>
    %81 = arith.mulf %64, %80 : vector<256x16xf32>
    %82 = vector.broadcast %77 : vector<1x16xf32> to vector<256x16xf32>
    %83 = arith.addf %81, %82 : vector<256x16xf32>
    %84 = vector.broadcast %74 : vector<256x1xf32> to vector<256x16xf32>
    %85 = arith.mulf %83, %84 : vector<256x16xf32>
    %cst_39 = arith.constant dense<0.000000e+00> : vector<16xf32>
    %86 = vector.multi_reduction <add>, %85, %cst_39 [0] : vector<256x16xf32> to vector<16xf32>
    %87 = vector.shape_cast %86 : vector<16xf32> to vector<1x16xf32>
    %88 = arith.mulf %85, %85 : vector<256x16xf32>
    %cst_40 = arith.constant dense<0.000000e+00> : vector<16xf32>
    %89 = vector.multi_reduction <add>, %88, %cst_40 [0] : vector<256x16xf32> to vector<16xf32>
    %90 = vector.shape_cast %89 : vector<16xf32> to vector<1x16xf32>
    %91 = tpu.iota {dimensions = array<i32: 0>} : vector<16x16xi32>
    %92 = arith.sitofp %91 : vector<16x16xi32> to vector<16x16xf32>
    %93 = tpu.iota {dimensions = array<i32: 1>} : vector<16x16xi32>
    %94 = arith.sitofp %93 : vector<16x16xi32> to vector<16x16xf32>
    %cst_41 = arith.constant 5.000000e-01 : f32
    %95 = vector.broadcast %cst_41 : f32 to vector<16x16xf32>
    %96 = arith.addf %92, %95 : vector<16x16xf32>
    %cst_42 = arith.constant 5.000000e-01 : f32
    %97 = vector.broadcast %cst_42 : f32 to vector<16x16xf32>
    %98 = arith.mulf %96, %97 : vector<16x16xf32>
    %99 = math.floor %98 : vector<16x16xf32>
    %cst_43 = arith.constant 5.000000e-01 : f32
    %100 = vector.broadcast %cst_43 : f32 to vector<16x16xf32>
    %101 = arith.addf %94, %100 : vector<16x16xf32>
    %cst_44 = arith.constant 5.000000e-01 : f32
    %102 = vector.broadcast %cst_44 : f32 to vector<16x16xf32>
    %103 = arith.mulf %101, %102 : vector<16x16xf32>
    %104 = math.floor %103 : vector<16x16xf32>
    %105 = arith.cmpf oeq, %99, %104 : vector<16x16xf32>
    %106 = arith.extui %105 : vector<16x16xi1> to vector<16x16xi32>
    %107 = arith.sitofp %106 : vector<16x16xi32> to vector<16x16xf32>
    %cst_45 = arith.constant dense<0.000000e+00> : vector<1x16xf32>
    %108 = tpu.matmul %87, %107, %cst_45 {dimension_numbers = #tpu.dot_dimension_numbers<[1], [0], [0], [1], [0, 0, 1, 1], [], []>} : vector<1x16xf32>, vector<16x16xf32>, vector<1x16xf32> -> vector<1x16xf32>
    %cst_46 = arith.constant 5.120000e+02 : f32
    %109 = vector.broadcast %cst_46 : f32 to vector<1x16xf32>
    %110 = arith.divf %108, %109 : vector<1x16xf32>
    %cst_47 = arith.constant dense<0.000000e+00> : vector<1x16xf32>
    %111 = tpu.matmul %90, %107, %cst_47 {dimension_numbers = #tpu.dot_dimension_numbers<[1], [0], [0], [1], [0, 0, 1, 1], [], []>} : vector<1x16xf32>, vector<16x16xf32>, vector<1x16xf32> -> vector<1x16xf32>
    %cst_48 = arith.constant 5.120000e+02 : f32
    %112 = vector.broadcast %cst_48 : f32 to vector<1x16xf32>
    %113 = arith.divf %111, %112 : vector<1x16xf32>
    %114 = arith.mulf %110, %110 : vector<1x16xf32>
    %115 = arith.subf %113, %114 : vector<1x16xf32>
    %116 = vector.broadcast %110 : vector<1x16xf32> to vector<256x16xf32>
    %117 = arith.subf %85, %116 : vector<256x16xf32>
    %cst_49 = arith.constant 9.99999974E-6 : f32
    %118 = vector.broadcast %cst_49 : f32 to vector<1x16xf32>
    %119 = arith.addf %115, %118 : vector<1x16xf32>
    %120 = math.rsqrt %119 : vector<1x16xf32>
    %121 = vector.broadcast %120 : vector<1x16xf32> to vector<256x16xf32>
    %122 = arith.mulf %117, %121 : vector<256x16xf32>
    %123 = vector.broadcast %78 : vector<1x16xf32> to vector<256x16xf32>
    %124 = arith.mulf %122, %123 : vector<256x16xf32>
    %125 = vector.broadcast %79 : vector<1x16xf32> to vector<256x16xf32>
    %126 = arith.addf %124, %125 : vector<256x16xf32>
    %cst_50 = arith.constant 0.000000e+00 : f32
    %127 = vector.broadcast %cst_50 : f32 to vector<256x16xf32>
    %128 = arith.cmpf oge, %126, %127 : vector<256x16xf32>
    %cst_51 = arith.constant 0.00999999977 : f32
    %129 = vector.broadcast %cst_51 : f32 to vector<256x16xf32>
    %130 = arith.mulf %129, %126 : vector<256x16xf32>
    %131 = arith.select %128, %126, %130 : vector<256x16xi1>, vector<256x16xf32>
    %c0_52 = arith.constant 0 : index
    %c0_53 = arith.constant 0 : index
    %c0_54 = arith.constant 0 : index
    %132 = vector.load %arg5[%c0_52, %c0_53, %c0_54] : memref<1x256x16xf32, #tpu.memory_space<vmem>>, vector<1x256x16xf32>
    %133 = vector.shape_cast %132 : vector<1x256x16xf32> to vector<256x16xf32>
    %134 = vector.shape_cast %131 : vector<256x16xf32> to vector<1x256x16xf32>
    tpu.vector_store %arg5[%c0_52, %c0_53, %c0_54], %134 {strides = array<i32>} : memref<1x256x16xf32, #tpu.memory_space<vmem>>, vector<1x256x16xf32>,
    return
  }
  func.func @transform_0(%arg0: i32) -> (i32, i32, i32, i32) {
    %c0_i32 = arith.constant 0 : i32
    %c0_i32_0 = arith.constant 0 : i32
    %c0_i32_1 = arith.constant 0 : i32
    %c0_i32_2 = arith.constant 0 : i32
    return %arg0, %c0_i32, %c0_i32_0, %c0_i32_1 : i32, i32, i32, i32
  }
  func.func @transform_1(%arg0: i32) -> (i32, i32, i32) {
    %c0_i32 = arith.constant 0 : i32
    %c0_i32_0 = arith.constant 0 : i32
    %c0_i32_1 = arith.constant 0 : i32
    return %arg0, %c0_i32, %c0_i32_0 : i32, i32, i32
  }
  func.func @transform_2(%arg0: i32) -> (i32, i32, i32) {
    %c0_i32 = arith.constant 0 : i32
    %c0_i32_0 = arith.constant 0 : i32
    %c0_i32_1 = arith.constant 0 : i32
    %c0_i32_2 = arith.constant 0 : i32
    return %c0_i32, %c0_i32_0, %c0_i32_1 : i32, i32, i32
  }
  func.func @transform_3(%arg0: i32) -> (i32, i32) {
    %c0_i32 = arith.constant 0 : i32
    %c0_i32_0 = arith.constant 0 : i32
    %c0_i32_1 = arith.constant 0 : i32
    return %c0_i32, %c0_i32_0 : i32, i32
  }
  func.func @transform_4(%arg0: i32) -> (i32, i32, i32) {
    %c0_i32 = arith.constant 0 : i32
    %c0_i32_0 = arith.constant 0 : i32
    %c0_i32_1 = arith.constant 0 : i32
    return %arg0, %c0_i32, %c0_i32_0 : i32, i32, i32
  }
}

</mosaic_0001>

<bundles_post_ra>
// kernel: tpu_custom_call.1
= control target key start
LH: loop header
LB: loop body
LE: loop exit
PB: predicated region body
PF: predicated region fallthrough
CT: control target
= control target key end

     0   :  { %s4738_s15 = smov 0   ;;  %s7151_s0 = inlined_call_operand.vmem [shape: bf16[2,18,18,4], index: 0, kind: input, shape index: {}]   ;;  %s7152_s1 = inlined_call_operand.vmem [shape: f32[2,256,1], index: 1, kind: input, shape index: {}]   ;;  %s7153_s2 = inlined_call_operand.vmem [shape: bf16[9,4,16], index: 2, kind: input, shape index: {}]   ;;  %s7154_s3 = inlined_call_operand.vmem [shape: f32[3,16], index: 3, kind: input, shape index: {}]   ;;  %s7155_s4 = inlined_call_operand.vmem [shape: f32[2,256,16], index: 4, kind: output, shape index: {}]  }
   0x1 LB: > { %s3901_s16 = sadd.s32 4294967295, %s4707_s15   ;;  %p3905_p0 = scmp.ge.s32.totalorder %s4707_s15, 1  ;;  %s4707_s15 = sphi %s4738_s15, %s14_s15  }
   0x2   : > { %p172_p1 = scmp.lt.s32.totalorder %s4707_s15, 3 }
   0x4   : > { %p173_p2 = pnand %p3905_p0, %p172_p1 }
   0x6   : > { %176 = sbr.rel (%p173_p2) target bundleno = 828 (0x33c), region = 36 }
   0xb   : > { %v3927_v0 = vld [vmem:[%s7153_s2 + $0x2] sm:$0x3]  ;;  %vm572_vm0 = vcmask 1041408   ;;  %p203_p3 = scmp.lt.s32.totalorder %s3901_s16, 1  ;;  %v3960_v2 = vld [vmem:[%s7153_s2 + $0x4] sm:$0x3] }
   0xc   : > { %4574 = vmatprep.subr.msk.bf16.mxu0 %vm572_vm0, %v3927_v0  ;;  %4575 = vmatprep.subr.msk.bf16.mxu1 %vm572_vm0, %v3927_v0  ;;  %v574_v1 = vsel %vm572_vm0, %v3927_v0, 0  ;;  %v343_v3 = vld [vmem:[%s7153_s2] sm:$0x3]  ;;  %vm392_vm1 = vcmask 1046528   ;;  %vm523_vm2 = vcmask 31744   ;;  %v1129_v32 = vsel %vm572_vm0, %v3960_v2, 0 }
   0xd   : > { %4253 = vmatpush3.bf16.msra.mxu0 %v574_v1  ;;  %4573 = vmatpush3.bf16.msra.mxu1 %v574_v1  ;;  %s7480_s16 = smov (!%p203_p3, %s3901_s16), 1  ;;  %v786_v37 = vsel %vm572_vm0, %v343_v3, 0  ;;  %v4862_v57 = vld [vmem:[%s7153_s2 + $0x8] sm:$0x3]  ;;  %vm949_vm3 = vcmask 1045504   ;;  %vm4712_vm6 = vmmov 0  }
   0xe   : > { %4577 = vmatprep.subr.msk.bf16.mxu0 %vm572_vm0, %v3960_v2  ;;  %4576 = vmatprep.subr.msk.bf16.mxu1 %vm572_vm0, %v343_v3  ;;  %s4584_s23 = smul.u32 216, %s7480_s16  ;;  %s4091_s7 = sshll.u32 %s7480_s16, 8  ;;  %vm3215_vm7 = vcmask 130048  }
   0xf   : > { %s5147_s10 = scalar_lea.vmem %s7152_s1, %s4091_s7 }
  0x10   : > { %s4766_s26 = scalar_lea.vmem %s7151_s0, %s4584_s23  ;;  %s6926_s23 = scalar_lea.vmem %s7155_s4, %s4091_s7 }
  0x11   : > { %v4769_v4 = vld [vmem:[%s4766_s26] sm:$0xff]   ;;  %v4772_v5 = vld [vmem:[%s4766_s26 + $0x8] sm:$0x1]  ;;  %v4775_v6 = vld [vmem:[%s4766_s26 + $0x78] sm:$0xff]  }
  0x12   : > { %v273_v7 = vunpack.c.l.bf16 %v4769_v4  ;;  %v274_v8 = vunpack.c.h.bf16 %v4769_v4  ;;  %v275_v9 = vunpack.c.l.bf16 %v4772_v5  ;;  %v4781_v10 = vld [vmem:[%s4766_s26 + $0x80] sm:$0x1]  ;;  %v7170_v11 = vunpack.c.l.bf16 %v4775_v6  ;;  %v4785_v12 = vld [vmem:[%s4766_s26 + $0xc] sm:$0xff]   ;;  %v4790_v15 = vld [vmem:[%s4766_s26 + $0x14] sm:$0x1] }
  0x13   : > { %v7166_v13 = vunpack.c.h.bf16 %v4775_v6  ;;  %v7165_v14 = vunpack.c.l.bf16 %v4781_v10  ;;  %v276_v16 = vunpack.c.l.bf16 %v4785_v12  ;;  %v7196_v20 = vunpack.c.h.bf16 %v4785_v12  ;;  %v4806_v27 = vld [vmem:[%s4766_s26 + $0x84] sm:$0xff]   ;;  %v4812_v31 = vld [vmem:[%s4766_s26 + $0x8c] sm:$0x1]  ;;  %v4821_v36 = vld [vmem:[%s4766_s26 + $0x18] sm:$0xff]  }
  0x14   : > { %v393_v17 = vrot.slane %v273_v7, 1  ;;  %v394_v18 = vrot.slane %v274_v8, 1  ;;  %v396_v19 = vrot.slane %v275_v9, 1  ;;  %v443_v21 = vrot.slane %v7170_v11, 1  ;;  %v4833_v42 = vld [vmem:[%s4766_s26 + $0x20] sm:$0x1] }
  0x15   : > { %v444_v22 = vrot.slane %v7166_v13, 1  ;;  %v446_v25 = vrot.slane %v7165_v14, 1  ;;  %v7189_v26 = vunpack.c.l.bf16 %v4790_v15  ;;  %v398_v30 = vrot.slane %v276_v16, 1  ;;  %v4836_v43 = vld [vmem:[%s4766_s26 + $0x90] sm:$0xff]   ;;  %v4843_v48 = vld [vmem:[%s4766_s26 + $0x98] sm:$0x1] }
  0x16   : > { %v395_v23 = vsel %vm392_vm1, %v393_v17, %v394_v18  ;;  %v397_v24 = vsel %vm392_vm1, %v394_v18, %v396_v19  ;;  %v399_v34 = vrot.slane %v7196_v20, 1  ;;  %v4825_v38 = vrot.slane %v273_v7, 2  ;;  %v4873_v62 = vld [vmem:[%s4766_s26 + $0x24] sm:$0xff]   ;;  %v4876_v63 = vld [vmem:[%s4766_s26 + $0x2c] sm:$0x1]  ;;  %v4885_v7 = vld [vmem:[%s4766_s26 + $0x9c] sm:$0xff]  }
  0x17   : > { %v505_v28 = vpack.c.bf16 %v397_v24, %v395_v23  ;;  %v445_v29 = vsel %vm392_vm1, %v443_v21, %v444_v22  ;;  %v447_v33 = vsel %vm392_vm1, %v444_v22, %v446_v25  ;;  %v401_v35 = vrot.slane %v7189_v26, 1  ;;  %v4901_v25 = vld [vmem:[%s4766_s26 + $0xa4] sm:$0x1]  ;;  %v4986_v14 = vld [vmem:[%s4766_s26 + $0xbc] sm:$0x1] }
  0x18   : > { %v4827_v39 = vrot.slane %v274_v8, 2  ;;  %v4829_v40 = vpack.c.bf16 %v447_v33, %v445_v29  ;;  %v7164_v41 = vunpack.c.l.bf16 %v4806_v27  ;;  %v400_v44 = vsel %vm392_vm1, %v398_v30, %v399_v34  ;;  %v4909_v29 = vld [vmem:[%s7153_s2 + $0x6] sm:$0x3]  ;;  %v5013_v11 = vld [vmem:[%s4766_s26 + $0x50] sm:$0x1] }
  0x19   : > { %4254 = vmatprep.mubr.msk.bf16.mxu0 %vm523_vm2, %v505_v28  ;;  %v402_v45 = vsel %vm392_vm1, %v399_v34, %v401_v35  ;;  %v7163_v46 = vunpack.c.h.bf16 %v4806_v27  ;;  %v7162_v47 = vunpack.c.l.bf16 %v4812_v31  ;;  %v7188_v51 = vunpack.c.l.bf16 %v4821_v36  ;;  %v4904_v28 = vld [vmem:[%s4766_s26 + $0x30] sm:$0xff]   ;;  %v4919_v35 = vld [vmem:[%s4766_s26 + $0x38] sm:$0x1] }
  0x1a   : > { %4274 = vmatprep.mubr.msk.bf16.mxu1 %vm523_vm2, %v4829_v40  ;;  %v4847_v49 = vpack.c.bf16 %v402_v45, %v400_v44  ;;  %v448_v50 = vrot.slane %v7164_v41, 1  ;;  %v7187_v52 = vunpack.c.h.bf16 %v4821_v36  ;;  %v7183_v55 = vunpack.c.l.bf16 %v4833_v42 }
  0x1b   : > { %v449_v53 = vrot.slane %v7163_v46, 1  ;;  %v451_v54 = vrot.slane %v7162_v47, 1  ;;  %v7161_v56 = vunpack.c.l.bf16 %v4836_v43  ;;  %v403_v58 = vrot.slane %v7188_v51, 1 }
  0x1c   : > { %4255 = vmatmul.mubr.msk.bf16.vlgmr.msra.gmra.mxu0 %vm523_vm2, %v4847_v49  ;;  %v404_v59 = vrot.slane %v7187_v52, 1  ;;  %v7160_v60 = vunpack.c.h.bf16 %v4836_v43  ;;  %v7159_v61 = vunpack.c.l.bf16 %v4843_v48  ;;  %v406_v2 = vrot.slane %v7183_v55, 1  ;;  %v5076_v52 = vld [vmem:[%s4766_s26 + $0x74] sm:$0x1] }
  0x1d   : > { %v450_v0 = vsel %vm392_vm1, %v448_v50, %v449_v53  ;;  %v452_v1 = vsel %vm392_vm1, %v449_v53, %v451_v54  ;;  %4321 = vmatpush3.bf16.msra.mxu0 %v1129_v32  ;;  %v453_v3 = vrot.slane %v7161_v56, 1  ;;  %v7182_v22 = vunpack.c.l.bf16 %v4873_v62  ;;  %v4977_v56 = vld [vmem:[%s4766_s26 + $0xb4] sm:$0xff]  }
  0x1e   : > { %v4887_v8 = vpack.c.bf16 %v452_v1, %v450_v0  ;;  %v405_v17 = vsel %vm392_vm1, %v403_v58, %v404_v59  ;;  %v454_v18 = vrot.slane %v7160_v60, 1  ;;  %v456_v19 = vrot.slane %v7159_v61, 1  ;;  %4579 = vmatprep.subr.msk.bf16.mxu0 %vm572_vm0, %v4862_v57  ;;  %v4937_v1 = vld [vmem:[%s4766_s26 + $0xa8] sm:$0xff]   ;;  %v4973_v61 = vld [vmem:[%s4766_s26 + $0x44] sm:$0x1] }
  0x1f   : > { %v407_v21 = vsel %vm392_vm1, %v404_v59, %v406_v2  ;;  %v7181_v23 = vunpack.c.h.bf16 %v4873_v62  ;;  %v7180_v24 = vunpack.c.l.bf16 %v4876_v63  ;;  %v7156_v34 = vunpack.c.l.bf16 %v4885_v7 }
  0x20   : > { %4275 = vmatmul.mubr.msk.bf16.vlgmr.msra.gmra.mxu1 %vm523_vm2, %v4887_v8  ;;  %v4913_v30 = vpack.c.bf16 %v407_v21, %v405_v17  ;;  %v455_v32 = vsel %vm392_vm1, %v453_v3, %v454_v18  ;;  %v457_v33 = vsel %vm392_vm1, %v454_v18, %v456_v19  ;;  %v408_v45 = vrot.slane %v7182_v22, 1  ;;  %v4948_v18 = vld [vmem:[%s4766_s26 + $0xb0] sm:$0x1]  ;;  %v4951_v19 = vld [vmem:[%s4766_s26 + $0x3c] sm:$0xff]  }
  0x21   : > { %v4921_v44 = vpack.c.bf16 %v457_v33, %v455_v32  ;;  %v409_v50 = vrot.slane %v7181_v23, 1  ;;  %v411_v53 = vrot.slane %v7180_v24, 1  ;;  %4287 = vmatpush3.bf16.msra.mxu1 %v786_v37  ;;  %v7158_v54 = vunpack.c.h.bf16 %v4885_v7 }
  0x22   : > { %4258 = vmatprep.mubr.msk.bf16.mxu0 %vm523_vm2, %v4913_v30  ;;  %v7157_v58 = vunpack.c.l.bf16 %v4901_v25  ;;  %v458_v59 = vrot.slane %v7156_v34, 1  ;;  %v7178_v0 = vunpack.c.l.bf16 %v4904_v28  ;;  %4578 = vmatprep.subr.msk.bf16.mxu1 %vm572_vm0, %v4909_v29  ;;  %v7173_v3 = vunpack.c.h.bf16 %v4904_v28 }
  0x23   : > { %7248 = vst [vmem:[#allocation2_spill] sm:$0xff] %v4921_v44  ;;  %4278 = vmatprep.mubr.msk.bf16.mxu1 %vm523_vm2, %v4921_v44  ;;  %v410_v37 = vsel %vm392_vm1, %v408_v45, %v409_v50  ;;  %v412_v2 = vsel %vm392_vm1, %v409_v50, %v411_v53  ;;  %v7172_v17 = vunpack.c.l.bf16 %v4919_v35  ;;  %v459_v32 = vrot.slane %v7158_v54, 1 }
  0x24   : > { %v4953_v21 = vpack.c.bf16 %v412_v2, %v410_v37  ;;  %v461_v33 = vrot.slane %v7157_v58, 1  ;;  %v413_v45 = vrot.slane %v7178_v0, 1  ;;  %v414_v50 = vrot.slane %v7173_v3, 1  ;;  %v5037_v0 = vld [vmem:[%s4766_s26 + $0x5c] sm:$0x1] }
  0x25   : > { %v416_v53 = vrot.slane %v7172_v17, 1  ;;  %v7169_v34 = vunpack.c.l.bf16 %v4937_v1  ;;  %v7168_v37 = vunpack.c.h.bf16 %v4937_v1  ;;  %v460_v2 = vsel %vm392_vm1, %v458_v59, %v459_v32 }
  0x26   : > { %4259 = vmatmul.mubr.msk.bf16.gmra.mxu0 %vm523_vm2, %v4953_v21  ;;  %v462_v58 = vsel %vm392_vm1, %v459_v32, %v461_v33  ;;  %v7167_v54 = vunpack.c.l.bf16 %v4948_v18  ;;  %v7171_v60 = vunpack.c.l.bf16 %v4951_v19  ;;  %v415_v46 = vsel %vm392_vm1, %v413_v45, %v414_v50 }
  0x27   : > { %v4979_v47 = vpack.c.bf16 %v462_v58, %v460_v2  ;;  %v417_v41 = vsel %vm392_vm1, %v414_v50, %v416_v53  ;;  %v463_v59 = vrot.slane %v7169_v34, 1  ;;  %v464_v33 = vrot.slane %v7168_v37, 1 }
  0x28   : > { %v4988_v32 = vpack.c.bf16 %v417_v41, %v415_v46  ;;  %v466_v13 = vrot.slane %v7167_v54, 1  ;;  %v7174_v58 = vunpack.c.h.bf16 %v4951_v19  ;;  %v7176_v45 = vunpack.c.l.bf16 %v4973_v61  ;;  %v5003_v46 = vld [vmem:[%s4766_s26 + $0x48] sm:$0xff]  }
  0x29   : > { %7249 = vst [vmem:[#allocation3_spill] sm:$0xff] %v4979_v47  ;;  %4279 = vmatmul.mubr.msk.bf16.gmra.mxu1 %vm523_vm2, %v4979_v47  ;;  %v418_v50 = vrot.slane %v7171_v60, 1  ;;  %v7175_v53 = vunpack.c.l.bf16 %v4977_v56  ;;  %v7177_v41 = vunpack.c.h.bf16 %v4977_v56  ;;  %v465_v2 = vsel %vm392_vm1, %v463_v59, %v464_v33 }
  0x2a   : > { %4262 = vmatprep.mubr.msk.bf16.mxu0 %vm523_vm2, %v4988_v32  ;;  %v467_v54 = vsel %vm392_vm1, %v464_v33, %v466_v13  ;;  %v419_v37 = vrot.slane %v7174_v58, 1  ;;  %v7179_v34 = vunpack.c.l.bf16 %v4986_v14  ;;  %v421_v17 = vrot.slane %v7176_v45, 1 }
  0x2b   : > { %v5015_v60 = vpack.c.bf16 %v467_v54, %v465_v2  ;;  %v468_v3 = vrot.slane %v7175_v53, 1  ;;  %v469_v13 = vrot.slane %v7177_v41, 1  ;;  %v7186_v58 = vunpack.c.l.bf16 %v5003_v46  ;;  %v5029_v2 = vld [vmem:[%s4766_s26 + $0x54] sm:$0xff]  }
  0x2c   : > { %v420_v59 = vsel %vm392_vm1, %v418_v50, %v419_v37  ;;  %v471_v33 = vrot.slane %v7179_v34, 1  ;;  %v7184_v54 = vunpack.c.h.bf16 %v5003_v46  ;;  %v422_v53 = vsel %vm392_vm1, %v419_v37, %v421_v17  ;;  %v5040_v50 = vld [vmem:[%s4766_s26 + $0x60] sm:$0xff]   ;;  %v5050_v17 = vld [vmem:[%s4766_s26 + $0x68] sm:$0x1] }
  0x2d   : > { %7250 = vst [vmem:[#allocation4_spill] sm:$0xff] %v5015_v60  ;;  %4282 = vmatprep.mubr.msk.bf16.mxu1 %vm523_vm2, %v5015_v60  ;;  %v470_v45 = vsel %vm392_vm1, %v468_v3, %v469_v13  ;;  %v7185_v41 = vunpack.c.l.bf16 %v5013_v11  ;;  %v5042_v34 = vpack.c.bf16 %v422_v53, %v420_v59  ;;  %v423_v23 = vrot.slane %v7186_v58, 1 }
  0x2e   : > { %v472_v24 = vsel %vm392_vm1, %v469_v13, %v471_v33  ;;  %v424_v22 = vrot.slane %v7184_v54, 1  ;;  %v7191_v55 = vunpack.c.l.bf16 %v5029_v2  ;;  %v7190_v53 = vunpack.c.h.bf16 %v5029_v2 }
  0x2f   : > { %v5052_v3 = vpack.c.bf16 %v472_v24, %v470_v45  ;;  %v426_v37 = vrot.slane %v7185_v41, 1  ;;  %4263 = vmatmul.mubr.msk.bf16.gmra.mxu0 %vm523_vm2, %v5042_v34  ;;  %v7195_v59 = vunpack.c.l.bf16 %v5037_v0  ;;  %v7192_v33 = vunpack.c.l.bf16 %v5040_v50  ;;  %v5065_v24 = vld [vmem:[%s4766_s26 + $0x6c] sm:$0xff]  }
  0x30   : > { %v425_v13 = vsel %vm392_vm1, %v423_v23, %v424_v22  ;;  %v7193_v54 = vunpack.c.h.bf16 %v5040_v50  ;;  %v428_v41 = vrot.slane %v7191_v55, 1  ;;  %v429_v58 = vrot.slane %v7190_v53, 1 }
  0x31   : > { %7251 = vst [vmem:[#allocation5_spill] sm:$0xff] %v5052_v3  ;;  %4283 = vmatmul.mubr.msk.bf16.gmra.mxu1 %vm523_vm2, %v5052_v3  ;;  %v427_v45 = vsel %vm392_vm1, %v424_v22, %v426_v37  ;;  %v7194_v23 = vunpack.c.l.bf16 %v5050_v17  ;;  %v431_v26 = vrot.slane %v7195_v59, 1  ;;  %v433_v22 = vrot.slane %v7192_v33, 1 }
  0x32   : > { %v5078_v51 = vpack.c.bf16 %v427_v45, %v425_v13  ;;  %4288 = vmatprep.mubr.msk.bf16.mxu1 %vm523_vm2, %v4769_v4  ;;  %v434_v37 = vrot.slane %v7193_v54, 1  ;;  %v953_v53 = vrot.slane %v275_v9, 2  ;;  %v430_v55 = vsel %vm392_vm1, %v428_v41, %v429_v58 }
  0x33   : > { %v436_v13 = vrot.slane %v7194_v23, 1  ;;  %v7199_v45 = vunpack.c.l.bf16 %v5065_v24  ;;  %v432_v4 = vsel %vm392_vm1, %v429_v58, %v431_v26  ;;  %v7198_v54 = vunpack.c.h.bf16 %v5065_v24 }
  0x34   : > { %4266 = vmatprep.mubr.msk.bf16.mxu0 %vm523_vm2, %v5078_v51  ;;  %v435_v33 = vsel %vm392_vm1, %v433_v22, %v434_v37  ;;  %v7197_v5 = vunpack.c.l.bf16 %v5076_v52  ;;  %v5100_v9 = vpack.c.bf16 %v432_v4, %v430_v55  ;;  %v1331_v58 = vsel %vm572_vm0, %v4909_v29, 0 }
  0x35   : > { %v437_v41 = vsel %vm392_vm1, %v434_v37, %v436_v13  ;;  %v438_v23 = vrot.slane %v7199_v45, 1  ;;  %v439_v20 = vrot.slane %v7198_v54, 1  ;;  %v955_v55 = vrot.slane %v276_v16, 2 }
  0x36   : > { %v5105_v59 = vpack.c.bf16 %v437_v41, %v435_v33  ;;  %v441_v26 = vrot.slane %v7197_v5, 1  ;;  %v5120_v33 = vld [vmem:[%s7153_s2 + $0xa] sm:$0x3]  ;;  %v7252_v22 = vunpack.c.h.bf16 %v4785_v12  ;;  %v7253_v13 = vunpack.c.l.bf16 %v4790_v15 }
  0x37   : > { %4267 = vmatmul.mubr.msk.bf16.gmra.mxu0 %vm523_vm2, %v5100_v9  ;;  %v440_v16 = vsel %vm392_vm1, %v438_v23, %v439_v20  ;;  %v952_v41 = vsel %vm949_vm3, %v4825_v38, %v4827_v39  ;;  %v954_v15 = vsel %vm949_vm3, %v4827_v39, %v953_v53  ;;  %v7255_v53 = vunpack.c.h.bf16 %v4821_v36 }
  0x38   : > { %v956_v37 = vrot.slane %v7252_v22, 2  ;;  %v958_v29 = vrot.slane %v7253_v13, 2  ;;  %4270 = vmatprep.mubr.msk.bf16.mxu0 %vm523_vm2, %v5105_v59  ;;  %v442_v4 = vsel %vm392_vm1, %v439_v20, %v441_v26  ;;  %v1062_v23 = vpack.c.bf16 %v954_v15, %v952_v41  ;;  %v5164_v41 = vld [vmem:[%s5147_s10] sm:$0xff] }
  0x39   : > { %4289 = vmatmul.mubr.msk.bf16.vlgmr.msra.gmra.mxu1 %vm523_vm2, %v4785_v12  ;;  %v5149_v20 = vpack.c.bf16 %v442_v4, %v440_v16  ;;  %v961_v22 = vrot.slane %v7255_v53, 2  ;;  %v7256_v13 = vunpack.c.l.bf16 %v4833_v42  ;;  %v7257_v54 = vunpack.c.l.bf16 %v4873_v62 }
  0x3a   : > { %4292 = vmatprep.mubr.msk.bf16.mxu1 %vm523_vm2, %v4821_v36  ;;  %4355 = vmatpush3.bf16.msra.mxu1 %v1331_v58  ;;  %v957_v26 = vsel %vm949_vm3, %v955_v55, %v956_v37  ;;  %v959_v38 = vsel %vm949_vm3, %v956_v37, %v958_v29  ;;  %v7254_v58 = vunpack.c.l.bf16 %v4821_v36  ;;  %v7258_v16 = vunpack.c.h.bf16 %v4873_v62 }
  0x3b   : > { %4580 = vmatprep.subr.msk.bf16.mxu1 %vm572_vm0, %v5120_v33  ;;  %v963_v5 = vrot.slane %v7256_v13, 2  ;;  %v965_v45 = vrot.slane %v7257_v54, 2  ;;  %v7259_v55 = vunpack.c.l.bf16 %v4876_v63  ;;  %v7260_v29 = vunpack.c.l.bf16 %v4904_v28 }
  0x3c   : > { %v960_v39 = vrot.slane %v7254_v58, 2  ;;  %v966_v4 = vrot.slane %v7258_v16, 2  ;;  %v7261_v58 = vunpack.c.h.bf16 %v4904_v28  ;;  %v7262_v42 = vunpack.c.l.bf16 %v4919_v35 }
  0x3d   : > { %v968_v37 = vrot.slane %v7259_v55, 2  ;;  %v970_v15 = vrot.slane %v7260_v29, 2  ;;  %v7263_v54 = vunpack.c.l.bf16 %v4951_v19  ;;  %v7264_v3 = vunpack.c.h.bf16 %v4951_v19 }
  0x3e   : > { %v971_v53 = vrot.slane %v7261_v58, 2  ;;  %v973_v13 = vrot.slane %v7262_v42, 2  ;;  %v7265_v63 = vunpack.c.l.bf16 %v4973_v61  ;;  %v5185_v29 = vpack.c.bf16 %v959_v38, %v957_v26 }
  0x3f   : > { %4271 = vmatmul.mubr.msk.bf16.gmra.mxu0 %vm523_vm2, %v5149_v20  ;;  %v975_v16 = vrot.slane %v7263_v54, 2  ;;  %v976_v60 = vrot.slane %v7264_v3, 2  ;;  %v1543_v35 = vsel %vm572_vm0, %v4862_v57, 0  ;;  %v5190_v58 = vadd.f32 1e-08, %v5164_v41 }
  0x40   : > { %v978_v55 = vrot.slane %v7265_v63, 2  ;;  %4322 = vmatprep.mubr.msk.bf16.mxu0 %vm523_vm2, %v1062_v23  ;;  %v962_v3 = vsel %vm949_vm3, %v960_v39, %v961_v22  ;;  %v964_v61 = vsel %vm949_vm3, %v961_v22, %v963_v5  ;;  %v967_v42 = vsel %vm949_vm3, %v965_v45, %v966_v4 }
  0x41   : > { %4293 = vmatmul.mubr.msk.bf16.gmra.mxu1 %vm523_vm2, %v4873_v62  ;;  %v969_v54 = vsel %vm949_vm3, %v966_v4, %v968_v37  ;;  %v972_v23 = vsel %vm949_vm3, %v970_v15, %v971_v53  ;;  %v974_v26 = vsel %vm949_vm3, %v971_v53, %v973_v13  ;;  %v7266_v57 = vunpack.c.l.bf16 %v5003_v46 }
  0x42   : > { %4296 = vmatprep.mubr.msk.bf16.mxu1 %vm523_vm2, %v4904_v28  ;;  %v977_v63 = vsel %vm949_vm3, %v975_v16, %v976_v60  ;;  %v979_v47 = vsel %vm949_vm3, %v976_v60, %v978_v55  ;;  %v7267_v44 = vunpack.c.h.bf16 %v5003_v46  ;;  %v7268_v5 = vunpack.c.l.bf16 %v5013_v11 }
  0x43   : > { %v980_v38 = vrot.slane %v7266_v57, 2  ;;  %v5208_v45 = vpack.c.bf16 %v964_v61, %v962_v3  ;;  %v5210_v4 = vpack.c.bf16 %v969_v54, %v967_v42  ;;  %v5212_v37 = vpack.c.bf16 %v974_v26, %v972_v23  ;;  %v5243_v57 = vld [vmem:[%s7153_s2 + $0xc] sm:$0x3] }
  0x44   : > { %v981_v39 = vrot.slane %v7267_v44, 2  ;;  %v983_v22 = vrot.slane %v7268_v5, 2  ;;  %v7271_v15 = vunpack.c.l.bf16 %v4775_v6  ;;  %v5216_v13 = vpack.c.bf16 %v979_v47, %v977_v63 }
  0x45   : > { %7269 = vst [vmem:[#allocation6_spill] sm:$0xff] %v5208_v45  ;;  %7270 = vst [vmem:[#allocation7_spill] sm:$0xff] %v5212_v37  ;;  %v7273_v16 = vunpack.c.l.bf16 %v5029_v2  ;;  %v7274_v44 = vunpack.c.h.bf16 %v5029_v2  ;;  %v7275_v11 = vunpack.c.h.bf16 %v4775_v6  ;;  %v7276_v42 = vunpack.c.l.bf16 %v4781_v10 }
  0x46   : > { %v1000_v53 = vrot.slane %v7271_v15, 2  ;;  %7272 = vst [vmem:[#allocation8_spill] sm:$0xff] %v5216_v13  ;;  %v5231_v61 = vsel %vm949_vm3, %v980_v38, %v981_v39  ;;  %v5234_v47 = vsel %vm949_vm3, %v981_v39, %v983_v22  ;;  %v7277_v23 = vunpack.c.l.bf16 %v4806_v27 }
  0x47   : > { %v5220_v60 = vrot.slane %v7273_v16, 2  ;;  %v5224_v55 = vrot.slane %v7274_v44, 2  ;;  %v1001_v3 = vrot.slane %v7275_v11, 2  ;;  %4323 = vmatmul.mubr.msk.bf16.vlgmr.msra.gmra.mxu0 %vm523_vm2, %v5185_v29  ;;  %v1003_v54 = vrot.slane %v7276_v42, 2 }
  0x48   : > { %v1005_v26 = vrot.slane %v7277_v23, 2  ;;  %4389 = vmatpush3.bf16.msra.mxu0 %v1543_v35  ;;  %v7278_v63 = vunpack.c.h.bf16 %v4806_v27  ;;  %v7279_v10 = vunpack.c.l.bf16 %v4812_v31  ;;  %v7280_v22 = vunpack.c.l.bf16 %v4836_v43  ;;  %4326 = vmatprep.mubr.msk.bf16.mxu0 %vm523_vm2, %v5208_v45 }
  0x49   : > { %4297 = vmatmul.mubr.msk.bf16.gmra.mxu1 %vm523_vm2, %v4951_v19  ;;  %v1002_v38 = vsel %vm949_vm3, %v1000_v53, %v1001_v3  ;;  %v1004_v16 = vsel %vm949_vm3, %v1001_v3, %v1003_v54  ;;  %v7281_v35 = vunpack.c.h.bf16 %v4836_v43  ;;  %v7282_v44 = vunpack.c.l.bf16 %v4843_v48  ;;  %4581 = vmatprep.subr.msk.bf16.mxu0 %vm572_vm0, %v5243_v57 }
  0x4a   : > { %v1006_v39 = vrot.slane %v7278_v63, 2  ;;  %v1008_v5 = vrot.slane %v7279_v10, 2  ;;  %v1010_v15 = vrot.slane %v7280_v22, 2  ;;  %4300 = vmatprep.mubr.msk.bf16.mxu1 %vm523_vm2, %v5003_v46  ;;  %v7283_v31 = vunpack.c.l.bf16 %v4885_v7 }
  0x4b   : > { %v1011_v53 = vrot.slane %v7281_v35, 2  ;;  %v1013_v11 = vrot.slane %v7282_v44, 2  ;;  %v5265_v23 = vpack.c.bf16 %v1004_v16, %v1002_v38  ;;  %v7284_v22 = vunpack.c.h.bf16 %v4885_v7 }
  0x4c   : > { %v1015_v42 = vrot.slane %v7283_v31, 2  ;;  %v1007_v63 = vsel %vm949_vm3, %v1005_v26, %v1006_v39  ;;  %v1009_v10 = vsel %vm949_vm3, %v1006_v39, %v1008_v5  ;;  %v7285_v38 = vunpack.c.l.bf16 %v4901_v25 }
  0x4d   : > { %v1016_v45 = vrot.slane %v7284_v22, 2  ;;  %v5273_v3 = vpack.c.bf16 %v1009_v10, %v1007_v63  ;;  %v1012_v48 = vsel %vm949_vm3, %v1010_v15, %v1011_v53  ;;  %v1014_v54 = vsel %vm949_vm3, %v1011_v53, %v1013_v11 }
  0x4e   : > { %v1018_v16 = vrot.slane %v7285_v38, 2  ;;  %v5279_v26 = vpack.c.bf16 %v1014_v54, %v1012_v48  ;;  %v7286_v5 = vunpack.c.l.bf16 %v4937_v1  ;;  %v7287_v44 = vunpack.c.h.bf16 %v4937_v1  ;;  %v2571_v48 = vld [vmem:[%s5147_s10 + $0x8] sm:$0xff] }
  0x4f   : > { %v1017_v39 = vsel %vm949_vm3, %v1015_v42, %v1016_v45  ;;  %v7288_v10 = vunpack.c.l.bf16 %v4948_v18  ;;  %v7289_v53 = vunpack.c.l.bf16 %v4977_v56  ;;  %v7290_v11 = vunpack.c.h.bf16 %v4977_v56  ;;  %4327 = vmatmul.mubr.msk.bf16.gmra.mxu0 %vm523_vm2, %v5210_v4 }
  0x50   : > { %v1020_v35 = vrot.slane %v7286_v5, 2  ;;  %v1021_v31 = vrot.slane %v7287_v44, 2  ;;  %v1019_v63 = vsel %vm949_vm3, %v1016_v45, %v1018_v16  ;;  %v7291_v38 = vunpack.c.l.bf16 %v4986_v14  ;;  %v2572_v45 = vld [vmem:[%s5147_s10 + $0x10] sm:$0xff]  ;;  %4330 = vmatprep.mubr.msk.bf16.mxu0 %vm523_vm2, %v5212_v37 }
  0x51   : > { %v1023_v15 = vrot.slane %v7288_v10, 2  ;;  %v1025_v25 = vrot.slane %v7289_v53, 2  ;;  %v1026_v22 = vrot.slane %v7290_v11, 2  ;;  %v5294_v42 = vpack.c.bf16 %v1019_v63, %v1017_v39  ;;  %v2573_v39 = vld [vmem:[%s5147_s10 + $0x18] sm:$0xff]  ;;  %4301 = vmatmul.mubr.msk.bf16.gmra.mxu1 %vm523_vm2, %v5029_v2  ;;  %v5322_v11 = vld [vmem:[%s5147_s10 + $0x28] sm:$0xff] }
  0x52   : > { %v1022_v54 = vsel %vm949_vm3, %v1020_v35, %v1021_v31  ;;  %v1028_v5 = vrot.slane %v7291_v38, 2  ;;  %v4709_v44 = vmov 0   ;;  %v2698_v10 = vmax.f32 %v5164_v41, 0.0  ;;  %4304 = vmatprep.mubr.msk.bf16.mxu1 %vm523_vm2, %v5040_v50 }
  0x53   : > { %v1024_v18 = vsel %vm949_vm3, %v1021_v31, %v1023_v15  ;;  %v1027_v16 = vsel %vm949_vm3, %v1025_v25, %v1026_v22  ;;  %4597 = vset.pattern.permute.xlu0 %v4709_v44  ;;  %4635 = vrcp.f32 %v5190_v58  ;;  %v2699_v31 = vmax.f32 %v2571_v48, 0.0  ;;  %v5315_v15 = vld [vmem:[%s5147_s10 + $0x20] sm:$0xff]  ;;  %4598 = vset.pattern.permute.xlu1 %v4709_v44 }
  0x54   : > { %v5311_v14 = vpack.c.bf16 %v1024_v18, %v1022_v54  ;;  %v1029_v35 = vsel %vm949_vm3, %v1026_v22, %v1028_v5  ;;  %v2603_v63 = vadd.f32 1e-08, %v2571_v48  ;;  %v2730_v58 = vmin.f32 %v2698_v10, 1.0  ;;  %v5327_v48 = vld [vmem:[%s5147_s10 + $0x30] sm:$0xff] }
  0x55   : > { %v5319_v41 = vpack.c.bf16 %v1029_v35, %v1027_v16  ;;  %v2604_v53 = vadd.f32 1e-08, %v2572_v45  ;;  %v2700_v25 = vmax.f32 %v2572_v45, 0.0  ;;  %v7293_v54 = vunpack.c.l.bf16 %v5037_v0 }
  0x56   : > { %v2731_v18 = vmin.f32 %v2699_v31, 1.0  ;;  %4637 = vrcp.f32 %v2603_v63  ;;  %v2605_v22 = vadd.f32 1e-08, %v2573_v39  ;;  %v5331_v5 = vpack.c.bf16 %v5234_v47, %v5231_v61  ;;  %3025 = vperm.xlu0 %4597, %v2730_v58  }
  0x57   : > { %7292 = vst [vmem:[#allocation9_spill] sm:$0xff] %v5319_v41  ;;  %v988_v38 = vrot.slane %v7293_v54, 2  ;;  %v7295_v16 = vunpack.c.l.bf16 %v5040_v50  ;;  %4639 = vrcp.f32 %v2604_v53  ;;  %v2606_v45 = vadd.f32 1e-08, %v5315_v15  ;;  %4331 = vmatmul.mubr.msk.bf16.gmra.mxu0 %vm523_vm2, %v5216_v13 }
  0x58   : > { %7294 = vst [vmem:[#allocation10_spill] sm:$0xff] %v5331_v5  ;;  %v7296_v0 = vunpack.c.h.bf16 %v5040_v50  ;;  %v7297_v35 = vunpack.c.l.bf16 %v5050_v17  ;;  %3030 = vperm.xlu1 %4598, %v2731_v18   ;;  %4641 = vrcp.f32 %v2605_v22  ;;  %v2607_v63 = vadd.f32 1e-08, %v5322_v11  ;;  %4334 = vmatprep.mubr.msk.bf16.mxu0 %vm523_vm2, %v5331_v5 }
  0x59   : > { %v990_v44 = vrot.slane %v7295_v16, 2  ;;  %v2732_v54 = vmin.f32 %v2700_v25, 1.0  ;;  %v2701_v61 = vmax.f32 %v2573_v39, 0.0  ;;  %4643 = vrcp.f32 %v2606_v45  ;;  %v5343_v16 = vld [vmem:[%s5147_s10 + $0x38] sm:$0xff]  ;;  %4305 = vmatmul.mubr.msk.bf16.gmra.mxu1 %vm523_vm2, %v5065_v24 }
  0x5a   : > { %v991_v10 = vrot.slane %v7296_v0, 2  ;;  %v993_v31 = vrot.slane %v7297_v35, 2  ;;  %v2608_v47 = vadd.f32 1e-08, %v5327_v48  ;;  %4645 = vrcp.f32 %v2607_v63  ;;  %4308 = vmatprep.mubr.msk.bf16.mxu1 %vm523_vm2, %v4775_v6 }
  0x5b   : > { %v987_v17 = vsel %vm949_vm3, %v5220_v60, %v5224_v55  ;;  %v989_v39 = vsel %vm949_vm3, %v5224_v55, %v988_v38  ;;  %v5360_v22 = vmin.f32 %v2701_v61, 1.0  ;;  %v2609_v45 = vadd.f32 1e-08, %v5343_v16 }
  0x5c   : > { %v992_v53 = vsel %vm949_vm3, %v990_v44, %v991_v10  ;;  %v994_v25 = vsel %vm949_vm3, %v991_v10, %v993_v31  ;;  %3035 = vperm.xlu1 %4598, %v2732_v54   ;;  %4647 = vrcp.f32 %v2608_v47  ;;  %v5363_v0 = vpack.c.bf16 %v989_v39, %v987_v17  ;;  %v5370_v44 = vld [vmem:[%s5147_s10 + $0x40] sm:$0xff] }
  0x5d   : > { %v7299_v60 = vunpack.c.l.bf16 %v5065_v24  ;;  %v7300_v55 = vunpack.c.h.bf16 %v5065_v24  ;;  %v5372_v5 = vpack.c.bf16 %v994_v25, %v992_v53  ;;  %v7302_v10 = vunpack.c.l.bf16 %v5076_v52  ;;  %v5383_v53 = vld [vmem:[%s5147_s10 + $0x48] sm:$0xff] }
  0x5e   : > { %7298 = vst [vmem:[#allocation11_spill] sm:$0xff] %v5363_v0  ;;  %v2702_v61 = vmax.f32 %v5315_v15, 0.0  ;;  %4649 = vrcp.f32 %v2609_v45  ;;  %v2610_v17 = vadd.f32 1e-08, %v5370_v44 }
  0x5f   : > { %v995_v35 = vrot.slane %v7299_v60, 2  ;;  %v996_v38 = vrot.slane %v7300_v55, 2  ;;  %7301 = vst [vmem:[#allocation12_spill] sm:$0xff] %v5372_v5  ;;  %v998_v31 = vrot.slane %v7302_v10, 2  ;;  %4335 = vmatmul.mubr.msk.bf16.gmra.mxu0 %vm523_vm2, %v5363_v0  ;;  %v2611_v0 = vadd.f32 1e-08, %v5383_v53 }
  0x60   : > { %v4636_v63 = vpop.eup %4635  ;;  %3040 = vperm.xlu1 %4598, %v5360_v22   ;;  %4338 = vmatprep.mubr.msk.bf16.mxu0 %vm523_vm2, %v5372_v5  ;;  %v2734_v45 = vmin.f32 %v2702_v61, 1.0  ;;  %4651 = vrcp.f32 %v2610_v17  ;;  %v5397_v61 = vld [vmem:[%s5147_s10 + $0x50] sm:$0xff] }
  0x61   : > { %v2635_v47 = vmul.f32 9.0, %v4636_v63  ;;  %v997_v60 = vsel %vm949_vm3, %v995_v35, %v996_v38  ;;  %4309 = vmatmul.mubr.msk.bf16.gmra.mxu1 %vm523_vm2, %v4806_v27  ;;  %v999_v52 = vsel %vm949_vm3, %v996_v38, %v998_v31  ;;  %v2703_v63 = vmax.f32 %v5322_v11, 0.0 }
  0x62   : > { %4312 = vmatprep.mubr.msk.bf16.mxu1 %vm523_vm2, %v4836_v43  ;;  %v5394_v38 = vpack.c.bf16 %v999_v52, %v997_v60  ;;  %4653 = vrcp.f32 %v2611_v0  ;;  %v2612_v17 = vadd.f32 1e-08, %v5397_v61  ;;  %v5404_v60 = vld [vmem:[%s5147_s10 + $0x58] sm:$0xff]  ;;  %v2705_v0 = vmax.f32 %v5343_v16, 0.0 }
  0x63   : > { %v4638_v39 = vpop.eup %4637  ;;  %v2762_v55 = vmul.f32 %v2730_v58, %v2635_v47  ;;  %v2735_v11 = vmin.f32 %v2703_v63, 1.0  ;;  %v5416_v63 = vld [vmem:[%s5147_s10 + $0x60] sm:$0xff] }
  0x64   : > { %v4640_v25 = vpop.eup %4639  ;;  %v2637_v15 = vmul.f32 9.0, %v4638_v39  ;;  %3045 = vperm.xlu1 %4598, %v2734_v45   ;;  %4655 = vrcp.f32 %v2612_v17 }
  0x65   : > { %v4642_v10 = vpop.eup %4641  ;;  %2797 = vperm.xlu0 %4597, %v2762_v55   ;;  %v2639_v47 = vmul.f32 9.0, %v4640_v25  ;;  %v2704_v55 = vmax.f32 %v5327_v48, 0.0 }
  0x66   : > { %v4644_v58 = vpop.eup %4643  ;;  %v2763_v35 = vmul.f32 %v2731_v18, %v2637_v15  ;;  %v2641_v25 = vmul.f32 9.0, %v4642_v10 }
  0x67   : > { %v4646_v5 = vpop.eup %4645  ;;  %v2643_v31 = vmul.f32 9.0, %v4644_v58  ;;  %v2764_v18 = vmul.f32 %v2732_v54, %v2639_v47  ;;  %4339 = vmatmul.mubr.msk.bf16.gmra.mxu0 %vm523_vm2, %v5394_v38  ;;  %v2736_v54 = vmin.f32 %v2704_v55, 1.0  ;;  %v2707_v47 = vmax.f32 %v5383_v53, 0.0 }
  0x68   : > { %v2645_v13 = vmul.f32 9.0, %v4646_v5  ;;  %3050 = vperm.xlu1 %4598, %v2735_v11   ;;  %4342 = vmatprep.mubr.msk.bf16.mxu0 %vm523_vm2, %v5265_v23  ;;  %v2765_v15 = vmul.f32 %v5360_v22, %v2641_v25  ;;  %v5423_v22 = vld [vmem:[%s5147_s10 + $0x68] sm:$0xff]  ;;  %v1752_v25 = vsel %vm572_vm0, %v5120_v33, 0 }
  0x69   : > { %2802 = vperm.xlu0 %4597, %v2763_v35   ;;  %v2766_v39 = vmul.f32 %v2734_v45, %v2643_v31  ;;  %v4648_v37 = vpop.eup %4647  ;;  %4313 = vmatmul.mubr.msk.bf16.gmra.mxu1 %vm523_vm2, %v4885_v7  ;;  %v2613_v45 = vadd.f32 1e-08, %v5404_v60  ;;  %v2737_v35 = vmin.f32 %v2705_v0, 1.0  ;;  %v2739_v17 = vmin.f32 %v2707_v47, 1.0  ;;  %v5443_v0 = vld [vmem:[%s5147_s10 + $0x78] sm:$0xff] }
  0x6a   : > { %4316 = vmatprep.mubr.msk.bf16.mxu1 %vm523_vm2, %v4937_v1  ;;  %v2767_v48 = vmul.f32 %v2735_v11, %v2645_v13  ;;  %v2647_v5 = vmul.f32 9.0, %v4648_v37  ;;  %v2706_v37 = vmax.f32 %v5370_v44, 0.0  ;;  %v2614_v13 = vadd.f32 1e-08, %v5416_v63  ;;  %v5452_v33 = vld [vmem:[%s7153_s2 + $0xe] sm:$0x3] }
  0x6b   : > { %v4650_v52 = vpop.eup %4649  ;;  %4657 = vrcp.f32 %v2613_v45 }
  0x6c   : > { %2807 = vperm.xlu1 %4598, %v2764_v18   ;;  %v2768_v10 = vmul.f32 %v2736_v54, %v2647_v5  ;;  %v2649_v58 = vmul.f32 9.0, %v4650_v52  ;;  %v2738_v11 = vmin.f32 %v2706_v37, 1.0  ;;  %4659 = vrcp.f32 %v2614_v13  ;;  %v5434_v18 = vld [vmem:[%s5147_s10 + $0x70] sm:$0xff] }
  0x6d   : > { %2817 = vperm.xlu0 %4597, %v2766_v39   ;;  %v4652_v16 = vpop.eup %4651  ;;  %v2615_v39 = vadd.f32 1e-08, %v5423_v22  ;;  %v2616_v53 = vadd.f32 1e-08, %v5434_v18  ;;  %v2709_v52 = vmax.f32 %v5404_v60, 0.0  ;;  %v2710_v13 = vmax.f32 %v5416_v63, 0.0 }
  0x6e   : > { %v2769_v44 = vmul.f32 %v2737_v35, %v2649_v58  ;;  %v2651_v31 = vmul.f32 9.0, %v4652_v16 }
  0x6f   : > { %4343 = vmatmul.mubr.msk.bf16.gmra.mxu0 %vm523_vm2, %v5273_v3  ;;  %v4654_v55 = vpop.eup %4653  ;;  %4661 = vrcp.f32 %v2615_v39  ;;  %v2741_v37 = vmin.f32 %v2709_v52, 1.0  ;;  %v2742_v63 = vmin.f32 %v2710_v13, 1.0  ;;  %v5490_v52 = vld [vmem:[%s7153_s2 + $0x10] sm:$0x3]  ;;  %v5506_v13 = vld [vmem:[%s5147_s10 + $0xa0] sm:$0xff] }
  0x70   : > { %2812 = vperm.xlu1 %4598, %v2765_v15   ;;  %4346 = vmatprep.mubr.msk.bf16.mxu0 %vm523_vm2, %v5279_v26  ;;  %v2653_v5 = vmul.f32 9.0, %v4654_v55  ;;  %4663 = vrcp.f32 %v2616_v53 }
  0x71   : > { %2822 = vperm.xlu0 %4597, %v2767_v48   ;;  %4317 = vmatmul.mubr.msk.bf16.gmra.mxu1 %vm523_vm2, %v4977_v56  ;;  %v2770_v48 = vmul.f32 %v2738_v11, %v2651_v31  ;;  %v5468_v31 = vld [vmem:[%s5147_s10 + $0x88] sm:$0xff] }
  0x72   : > { %4356 = vmatprep.mubr.msk.bf16.mxu1 %vm523_vm2, %v4785_v12  ;;  %v2708_v12 = vmax.f32 %v5397_v61, 0.0  ;;  %v2771_v15 = vmul.f32 %v2739_v17, %v2653_v5  ;;  %v2712_v5 = vmax.f32 %v5434_v18, 0.0 }
  0x74   : > { %3055 = vperm.xlu1 %4598, %v2736_v54   ;;  %v4656_v54 = vpop.eup %4655  ;;  %v2740_v61 = vmin.f32 %v2708_v12, 1.0  ;;  %v5479_v12 = vld [vmem:[%s5147_s10 + $0x90] sm:$0xff]  ;;  %v2744_v18 = vmin.f32 %v2712_v5, 1.0 }
  0x75   : > { %2827 = vperm.xlu0 %4597, %v2768_v10   ;;  %v2655_v45 = vmul.f32 9.0, %v4656_v54  ;;  %v2617_v10 = vadd.f32 1e-08, %v5443_v0  ;;  %v2620_v54 = vadd.f32 1e-08, %v5479_v12 }
  0x77   : > { %4347 = vmatmul.mubr.msk.bf16.gmra.mxu0 %vm523_vm2, %v5294_v42  ;;  %v2772_v16 = vmul.f32 %v2740_v61, %v2655_v45  ;;  %4665 = vrcp.f32 %v2617_v10 }
  0x78   : > { %3060 = vperm.xlu1 %4598, %v2737_v35   ;;  %4350 = vmatprep.mubr.msk.bf16.mxu0 %vm523_vm2, %v5311_v14  ;;  %v4658_v58 = vpop.eup %4657  ;;  %v5461_v35 = vld [vmem:[%s5147_s10 + $0x80] sm:$0xff] }
  0x79   : > { %2832 = vperm.xlu0 %4597, %v2769_v44   ;;  %4357 = vmatmul.mubr.msk.bf16.vlgmr.msra.gmra.mxu1 %vm523_vm2, %v4821_v36  ;;  %v2657_v60 = vmul.f32 9.0, %v4658_v58  ;;  %v2618_v44 = vadd.f32 1e-08, %v5461_v35  ;;  %v4660_v47 = vpop.eup %4659 }
  0x7a   : > { %4360 = vmatprep.mubr.msk.bf16.mxu1 %vm523_vm2, %v4873_v62  ;;  %4423 = vmatpush3.bf16.msra.mxu1 %v1752_v25  ;;  %v2659_v55 = vmul.f32 9.0, %v4660_v47  ;;  %v2619_v25 = vadd.f32 1e-08, %v5468_v31  ;;  %v2622_v47 = vadd.f32 1e-08, %v5506_v13 }
  0x7b   : > { %4582 = vmatprep.subr.msk.bf16.mxu1 %vm572_vm0, %v5452_v33  ;;  %v2773_v39 = vmul.f32 %v2741_v37, %v2657_v60  ;;  %4667 = vrcp.f32 %v2618_v44  ;;  %v2714_v60 = vmax.f32 %v5461_v35, 0.0 }
  0x7c   : > { %3065 = vperm.xlu1 %4598, %v2738_v11   ;;  %v2711_v11 = vmax.f32 %v5423_v22, 0.0  ;;  %v2774_v53 = vmul.f32 %v2742_v63, %v2659_v55  ;;  %4669 = vrcp.f32 %v2619_v25 }
  0x7d   : > { %2837 = vperm.xlu0 %4597, %v2770_v48   ;;  %4671 = vrcp.f32 %v2620_v54  ;;  %v2746_v35 = vmin.f32 %v2714_v60, 1.0 }
  0x7e   : > { %v2743_v48 = vmin.f32 %v2711_v11, 1.0 }
  0x7f   : > { %4351 = vmatmul.mubr.msk.bf16.gmra.mxu0 %vm523_vm2, %v5319_v41 }
  0x80   : > { %3070 = vperm.xlu1 %4598, %v2739_v17   ;;  %4390 = vmatprep.mubr.msk.bf16.mxu0 %vm523_vm2, %v4847_v49  ;;  %v4662_v17 = vpop.eup %4661  ;;  %v1954_v49 = vsel %vm572_vm0, %v5243_v57, 0  ;;  %v5493_v57 = vld [vmem:[%s5147_s10 + $0x98] sm:$0xff] }
  0x81   : > { %2842 = vperm.xlu0 %4597, %v2771_v15   ;;  %4361 = vmatmul.mubr.msk.bf16.gmra.mxu1 %vm523_vm2, %v4904_v28  ;;  %v2661_v22 = vmul.f32 9.0, %v4662_v17  ;;  %v2713_v15 = vmax.f32 %v5443_v0, 0.0  ;;  %v2621_v58 = vadd.f32 1e-08, %v5493_v57 }
  0x82   : > { %4364 = vmatprep.mubr.msk.bf16.mxu1 %vm523_vm2, %v4951_v19 }
  0x83   : > { %v2775_v45 = vmul.f32 %v2743_v48, %v2661_v22  ;;  %4673 = vrcp.f32 %v2621_v58 }
  0x84   : > { %3075 = vperm.xlu1 %4598, %v2740_v61   ;;  %v4664_v61 = vpop.eup %4663  ;;  %4675 = vrcp.f32 %v2622_v47 }
  0x85   : > { %2847 = vperm.xlu0 %4597, %v2772_v16   ;;  %v2663_v10 = vmul.f32 9.0, %v4664_v61  ;;  %v2745_v16 = vmin.f32 %v2713_v15, 1.0  ;;  %v5528_v15 = vld [vmem:[%s5147_s10 + $0xb8] sm:$0xff] }
  0x86   : > { %v2625_v58 = vadd.f32 1e-08, %v5528_v15 }
  0x87   : > { %4391 = vmatmul.mubr.msk.bf16.vlgmr.msra.gmra.mxu0 %vm523_vm2, %v4913_v30  ;;  %v2776_v44 = vmul.f32 %v2744_v18, %v2663_v10 }
  0x88   : > { %3080 = vperm.xlu1 %4598, %v2741_v37   ;;  %4457 = vmatpush3.bf16.msra.mxu0 %v1954_v49  ;;  %v4666_v37 = vpop.eup %4665 }
  0x89   : > { %2852 = vperm.xlu0 %4597, %v2773_v39   ;;  %4365 = vmatmul.mubr.msk.bf16.gmra.mxu1 %vm523_vm2, %v5003_v46  ;;  %v2665_v0 = vmul.f32 9.0, %v4666_v37  ;;  %v4668_v11 = vpop.eup %4667  ;;  %v2591_v39 = vld [vmem:[%s5147_s10 + $0xa8] sm:$0xff] }
  0x8a   : > { %4368 = vmatprep.mubr.msk.bf16.mxu1 %vm523_vm2, %v5029_v2  ;;  %4394 = vmatprep.mubr.msk.bf16.mxu0 %vm523_vm2, %v4953_v21  ;;  %v2667_v25 = vmul.f32 9.0, %v4668_v11  ;;  %v2623_v17 = vadd.f32 1e-08, %v2591_v39  ;;  %v4670_v49 = vpop.eup %4669 }
  0x8b   : > { %4583 = vmatprep.subr.msk.bf16.mxu0 %vm572_vm0, %v5490_v52  ;;  %v2777_v55 = vmul.f32 %v2745_v16, %v2665_v0  ;;  %v2669_v54 = vmul.f32 9.0, %v4670_v49 }
  0x8c   : > { %3085 = vperm.xlu1 %4598, %v2742_v63   ;;  %v2715_v63 = vmax.f32 %v5468_v31, 0.0  ;;  %v2778_v22 = vmul.f32 %v2746_v35, %v2667_v25  ;;  %4677 = vrcp.f32 %v2623_v17  ;;  %v4672_v31 = vpop.eup %4671 }
  0x8d   : > { %2857 = vperm.xlu0 %4597, %v2774_v53   ;;  %v2716_v53 = vmax.f32 %v5479_v12, 0.0  ;;  %v2671_v10 = vmul.f32 9.0, %v4672_v31 }
  0x8e   : > { %v2747_v5 = vmin.f32 %v2715_v63, 1.0  ;;  %v5546_v63 = vld [vmem:[%s5147_s10 + $0xc8] sm:$0xff] }
  0x8f   : > { %4395 = vmatmul.mubr.msk.bf16.gmra.mxu0 %vm523_vm2, %v4988_v32  ;;  %v2748_v12 = vmin.f32 %v2716_v53, 1.0  ;;  %v2627_v17 = vadd.f32 1e-08, %v5546_v63 }
  0x90   : > { %3090 = vperm.xlu1 %4598, %v2743_v48   ;;  %4398 = vmatprep.mubr.msk.bf16.mxu0 %vm523_vm2, %v5042_v34  ;;  %v5521_v48 = vld [vmem:[%s5147_s10 + $0xb0] sm:$0xff]  ;;  %v4674_v37 = vpop.eup %4673 }
  0x91   : > { %2862 = vperm.xlu0 %4597, %v2775_v45   ;;  %4369 = vmatmul.mubr.msk.bf16.gmra.mxu1 %vm523_vm2, %v5040_v50  ;;  %v2624_v61 = vadd.f32 1e-08, %v5521_v48  ;;  %v2779_v45 = vmul.f32 %v2747_v5, %v2669_v54  ;;  %v2780_v0 = vmul.f32 %v2748_v12, %v2671_v10  ;;  %v2673_v47 = vmul.f32 9.0, %v4674_v37  ;;  %v4676_v11 = vpop.eup %4675 }
  0x92   : > { %4372 = vmatprep.mubr.msk.bf16.mxu1 %vm523_vm2, %v5065_v24  ;;  %v2675_v25 = vmul.f32 9.0, %v4676_v11 }
  0x93   : > { %4679 = vrcp.f32 %v2624_v61 }
  0x94   : > { %3095 = vperm.xlu1 %4598, %v2744_v18   ;;  %v2717_v18 = vmax.f32 %v5493_v57, 0.0  ;;  %4681 = vrcp.f32 %v2625_v58 }
  0x95   : > { %2867 = vperm.xlu0 %4597, %v2776_v44   ;;  %v2718_v44 = vmax.f32 %v5506_v13, 0.0 }
  0x96   : > { %v2749_v60 = vmin.f32 %v2717_v18, 1.0 }
  0x97   : > { %4399 = vmatmul.mubr.msk.bf16.gmra.mxu0 %vm523_vm2, %v5078_v51  ;;  %v2750_v13 = vmin.f32 %v2718_v44, 1.0  ;;  %v5577_v44 = vld [vmem:[%s5147_s10 + $0xe0] sm:$0xff] }
  0x98   : > { %3100 = vperm.xlu1 %4598, %v2745_v16   ;;  %4402 = vmatprep.mubr.msk.bf16.mxu0 %vm523_vm2, %v5100_v9  ;;  %v5539_v16 = vld [vmem:[%s5147_s10 + $0xc0] sm:$0xff] }
  0x99   : > { %2872 = vperm.xlu0 %4597, %v2777_v55   ;;  %4373 = vmatmul.mubr.msk.bf16.gmra.mxu1 %vm523_vm2, %v4775_v6  ;;  %v2626_v57 = vadd.f32 1e-08, %v5539_v16  ;;  %v2781_v55 = vmul.f32 %v2749_v60, %v2673_v47  ;;  %v4678_v49 = vpop.eup %4677  ;;  %v2782_v54 = vmul.f32 %v2750_v13, %v2675_v25  ;;  %v7303_v25 = vld [vmem:[#allocation2_spill] sm:$0xff] }
  0x9a   : > { %4376 = vmatprep.mubr.msk.bf16.mxu1 %vm523_vm2, %v4806_v27  ;;  %v2677_v61 = vmul.f32 9.0, %v4678_v49 }
  0x9b   : > { %4683 = vrcp.f32 %v2626_v57  ;;  %v2722_v57 = vmax.f32 %v5539_v16, 0.0  ;;  %v7304_v16 = vld [vmem:[#allocation3_spill] sm:$0xff] }
  0x9c   : > { %3105 = vperm.xlu1 %4598, %v2746_v35   ;;  %v2719_v35 = vmax.f32 %v2591_v39, 0.0  ;;  %4685 = vrcp.f32 %v2627_v17  ;;  %v5587_v17 = vld [vmem:[%s5147_s10 + $0xe8] sm:$0xff] }
  0x9d   : > { %2877 = vperm.xlu0 %4597, %v2778_v22   ;;  %v2720_v22 = vmax.f32 %v5521_v48, 0.0  ;;  %v5572_v48 = vld [vmem:[%s4766_s26 + $0xc0] sm:$0xff]  }
  0x9e   : > { %v2751_v53 = vmin.f32 %v2719_v35, 1.0  ;;  %v7220_v49 = vunpack.c.h.bf16 %v5572_v48 }
  0x9f   : > { %4403 = vmatmul.mubr.msk.bf16.gmra.mxu0 %vm523_vm2, %v5105_v59  ;;  %v2752_v18 = vmin.f32 %v2720_v22, 1.0 }
  0xa0   : > { %3110 = vperm.xlu1 %4598, %v2747_v5   ;;  %4406 = vmatprep.mubr.msk.bf16.mxu0 %vm523_vm2, %v5149_v20  ;;  %v5556_v5 = vld [vmem:[%s5147_s10 + $0xd0] sm:$0xff]  ;;  %v4680_v31 = vpop.eup %4679  ;;  %v2783_v10 = vmul.f32 %v2751_v53, %v2677_v61 }
  0xa1   : > { %2882 = vperm.xlu0 %4597, %v2779_v45   ;;  %4377 = vmatmul.mubr.msk.bf16.gmra.mxu1 %vm523_vm2, %v4836_v43  ;;  %v2628_v39 = vadd.f32 1e-08, %v5556_v5  ;;  %v2721_v45 = vmax.f32 %v5528_v15, 0.0  ;;  %v2679_v58 = vmul.f32 9.0, %v4680_v31  ;;  %v2630_v15 = vadd.f32 1e-08, %v5577_v44 }
  0xa2   : > { %4380 = vmatprep.mubr.msk.bf16.mxu1 %vm523_vm2, %v4885_v7  ;;  %v2631_v31 = vadd.f32 1e-08, %v5587_v17 }
  0xa3   : > { %4687 = vrcp.f32 %v2628_v39  ;;  %v2753_v47 = vmin.f32 %v2721_v45, 1.0  ;;  %v2784_v11 = vmul.f32 %v2752_v18, %v2679_v58 }
  0xa4   : > { %3115 = vperm.xlu1 %4598, %v2748_v12   ;;  %v5563_v12 = vld [vmem:[%s5147_s10 + $0xd8] sm:$0xff] }
  0xa5   : > { %2887 = vperm.xlu0 %4597, %v2780_v0   ;;  %v2629_v37 = vadd.f32 1e-08, %v5563_v12  ;;  %v5580_v0 = vld [vmem:[%s4766_s26 + $0xc8] sm:$0x1] }
  0xa6   : > { %v7222_v22 = vunpack.c.l.bf16 %v5580_v0 }
  0xa7   : > { %4407 = vmatmul.mubr.msk.bf16.gmra.mxu0 %vm523_vm2, %v4829_v40  ;;  %4689 = vrcp.f32 %v2629_v37  ;;  %v2166_v37 = vsel %vm572_vm0, %v5452_v33, 0 }
  0xa8   : > { %3120 = vperm.xlu1 %4598, %v2749_v60   ;;  %4410 = vmatprep.mubr.msk.bf16.mxu0 %vm523_vm2, %v4887_v8  ;;  %v4682_v60 = vpop.eup %4681  ;;  %4691 = vrcp.f32 %v2630_v15 }
  0xa9   : > { %2892 = vperm.xlu0 %4597, %v2781_v55   ;;  %4381 = vmatmul.mubr.msk.bf16.gmra.mxu1 %vm523_vm2, %v4937_v1  ;;  %v2681_v35 = vmul.f32 9.0, %v4682_v60  ;;  %v4684_v55 = vpop.eup %4683  ;;  %4693 = vrcp.f32 %v2631_v31 }
  0xaa   : > { %4384 = vmatprep.mubr.msk.bf16.mxu1 %vm523_vm2, %v4977_v56  ;;  %v2683_v39 = vmul.f32 9.0, %v4684_v55  ;;  %v4686_v45 = vpop.eup %4685  ;;  %v7305_v55 = vld [vmem:[#allocation4_spill] sm:$0xff] }
  0xab   : > { %v2785_v61 = vmul.f32 %v2753_v47, %v2681_v35 }
  0xac   : > { %3125 = vperm.xlu1 %4598, %v2750_v13   ;;  %v7221_v13 = vunpack.c.l.bf16 %v5572_v48 }
  0xad   : > { %2897 = vperm.xlu0 %4597, %v2782_v54   ;;  %v2754_v54 = vmin.f32 %v2722_v57, 1.0  ;;  %v2724_v57 = vmax.f32 %v5556_v5, 0.0 }
  0xae   : > { %v1529_v58 = vrot.slane %v7221_v13, 1  ;;  %v7306_v13 = vld [vmem:[#allocation6_spill] sm:$0xff] }
  0xaf   : > { %4411 = vmatmul.mubr.msk.bf16.gmra.mxu0 %vm523_vm2, %v7303_v25 }
  0xb0   : > { %3130 = vperm.xlu1 %4598, %v2751_v53   ;;  %4414 = vmatprep.mubr.msk.bf16.mxu0 %vm523_vm2, %v7304_v16  ;;  %v2723_v53 = vmax.f32 %v5546_v63, 0.0  ;;  %v1532_v63 = vrot.slane %v7222_v22, 1  ;;  %v4688_v15 = vpop.eup %4687  ;;  %v7307_v22 = vld [vmem:[#allocation5_spill] sm:$0xff] }
  0xb1   : > { %2902 = vperm.xlu0 %4597, %v2783_v10   ;;  %4385 = vmatmul.mubr.msk.bf16.gmra.mxu1 %vm523_vm2, %v5572_v48  ;;  %v5601_v10 = vld [vmem:[%s5147_s10 + $0xf0] sm:$0xff] }
  0xb2   : > { %4424 = vmatprep.mubr.msk.bf16.mxu1 %vm523_vm2, %v5185_v29  ;;  %v1530_v29 = vrot.slane %v7220_v49, 1  ;;  %v2755_v60 = vmin.f32 %v2723_v53, 1.0  ;;  %v2632_v35 = vadd.f32 1e-08, %v5601_v10  ;;  %v2601_v49 = vld [vmem:[%s5147_s10 + $0xf8] sm:$0xff]  ;;  %v2756_v53 = vmin.f32 %v2724_v57, 1.0 }
  0xb3   : > { %v2633_v31 = vadd.f32 1e-08, %v2601_v49  ;;  %v7309_v57 = vld [vmem:[#allocation8_spill] sm:$0xff] }
  0xb4   : > { %3135 = vperm.xlu1 %4598, %v2752_v18   ;;  %v2786_v18 = vmul.f32 %v2754_v54, %v2683_v39  ;;  %v1531_v33 = vsel %vm392_vm1, %v1529_v58, %v1530_v29  ;;  %v1533_v5 = vsel %vm392_vm1, %v1530_v29, %v1532_v63  ;;  %v2687_v39 = vmul.f32 9.0, %v4688_v15 }
  0xb5   : > { %2907 = vperm.xlu0 %4597, %v2784_v11   ;;  %v2685_v11 = vmul.f32 9.0, %v4686_v45  ;;  %4695 = vrcp.f32 %v2632_v35  ;;  %v4690_v45 = vpop.eup %4689  ;;  %v2726_v63 = vmax.f32 %v5577_v44, 0.0  ;;  %v2727_v44 = vmax.f32 %v5587_v17, 0.0  ;;  %v7311_v17 = vld [vmem:[#allocation11_spill] sm:$0xff] }
  0xb6   : > { %v2788_v58 = vmul.f32 %v2756_v53, %v2687_v39  ;;  %v2689_v29 = vmul.f32 9.0, %v4690_v45  ;;  %4697 = vrcp.f32 %v2633_v31 }
  0xb7   : > { %4415 = vmatmul.mubr.msk.bf16.gmra.mxu0 %vm523_vm2, %v7305_v55  ;;  %v5625_v55 = vpack.c.bf16 %v1533_v5, %v1531_v33  ;;  %v2759_v5 = vmin.f32 %v2727_v44, 1.0 }
  0xb8   : > { %3140 = vperm.xlu1 %4598, %v2753_v47   ;;  %4418 = vmatprep.mubr.msk.bf16.mxu0 %vm523_vm2, %v7307_v22  ;;  %v2787_v47 = vmul.f32 %v2755_v60, %v2685_v11  ;;  %v2758_v11 = vmin.f32 %v2726_v63, 1.0 }
  0xb9   : > { %2912 = vperm.xlu0 %4597, %v2785_v61   ;;  %4425 = vmatmul.mubr.msk.bf16.vlgmr.msra.gmra.mxu1 %vm523_vm2, %v7306_v13  ;;  %v2725_v61 = vmax.f32 %v5563_v12, 0.0  ;;  %v7308_v12 = vld [vmem:[#allocation7_spill] sm:$0xff] }
  0xba   : > { %4428 = vmatprep.mubr.msk.bf16.mxu1 %vm523_vm2, %v5210_v4  ;;  %4491 = vmatpush3.bf16.msra.mxu1 %v2166_v37  ;;  %v4692_v37 = vpop.eup %4691 }
  0xbb   : > { %v2757_v22 = vmin.f32 %v2725_v61, 1.0  ;;  %v4694_v35 = vpop.eup %4693 }
  0xbc   : > { %3145 = vperm.xlu1 %4598, %v2754_v54   ;;  %v2693_v33 = vmul.f32 9.0, %v4694_v35  ;;  %v7315_v35 = vunpack.c.l.bf16 %v5580_v0 }
  0xbd   : > { %2917 = vperm.xlu0 %4597, %v2786_v18   ;;  %v2789_v54 = vmul.f32 %v2757_v22, %v2689_v29  ;;  %v2691_v18 = vmul.f32 9.0, %v4692_v37  ;;  %v7313_v37 = vunpack.c.l.bf16 %v5572_v48 }
  0xbf   : > { %4419 = vmatmul.mubr.msk.bf16.gmra.mxu0 %vm523_vm2, %v5625_v55  ;;  %v2790_v15 = vmul.f32 %v2758_v11, %v2691_v18 }
  0xc0   : > { %3150 = vperm.xlu1 %4598, %v2755_v60   ;;  %4458 = vmatprep.mubr.msk.bf16.mxu0 %vm523_vm2, %v4821_v36  ;;  %v2375_v60 = vsel %vm572_vm0, %v5490_v52, 0  ;;  %v2728_v36 = vmax.f32 %v5601_v10, 0.0  ;;  %v2791_v52 = vmul.f32 %v2759_v5, %v2693_v33  ;;  %v2729_v10 = vmax.f32 %v2601_v49, 0.0 }
  0xc1   : > { %2922 = vperm.xlu0 %4597, %v2787_v47   ;;  %4429 = vmatmul.mubr.msk.bf16.gmra.mxu1 %vm523_vm2, %v7308_v12  ;;  %v7310_v47 = vld [vmem:[#allocation10_spill] sm:$0xff] }
  0xc2   : > { %4432 = vmatprep.mubr.msk.bf16.mxu1 %vm523_vm2, %v7309_v57  ;;  %v4696_v61 = vpop.eup %4695  ;;  %v2760_v39 = vmin.f32 %v2728_v36, 1.0  ;;  %v2761_v45 = vmin.f32 %v2729_v10, 1.0 }
  0xc3   : > { %v4698_v31 = vpop.eup %4697 }
  0xc4   : > { %3155 = vperm.xlu1 %4598, %v2756_v53   ;;  %v2695_v53 = vmul.f32 9.0, %v4696_v61 }
  0xc5   : > { %2927 = vperm.xlu0 %4597, %v2788_v58   ;;  %v7312_v58 = vld [vmem:[#allocation12_spill] sm:$0xff] }
  0xc7   : > { %4459 = vmatmul.mubr.msk.bf16.vlgmr.msra.gmra.mxu0 %vm523_vm2, %v4873_v62  ;;  %v2792_v62 = vmul.f32 %v2760_v39, %v2695_v53 }
  0xc8   : > { %3160 = vperm.xlu1 %4598, %v2757_v22   ;;  %4525 = vmatpush3.bf16.msra.mxu0 %v2375_v60  ;;  %v2697_v22 = vmul.f32 9.0, %v4698_v31 }
  0xc9   : > { %2932 = vperm.xlu0 %4597, %v2789_v54   ;;  %4433 = vmatmul.mubr.msk.bf16.gmra.mxu1 %vm523_vm2, %v7310_v47  ;;  %v1738_v54 = vrot.slane %v7313_v37, 2 }
  0xca   : > { %4436 = vmatprep.mubr.msk.bf16.mxu1 %vm523_vm2, %v7311_v17  ;;  %4462 = vmatprep.mubr.msk.bf16.mxu0 %vm523_vm2, %v4904_v28  ;;  %v2793_v28 = vmul.f32 %v2761_v45, %v2697_v22 }
  0xcc   : > { %3165 = vperm.xlu1 %4598, %v2758_v11  }
  0xcd   : > { %2937 = vperm.xlu0 %4597, %v2790_v15  }
  0xcf   : > { %4463 = vmatmul.mubr.msk.bf16.gmra.mxu0 %vm523_vm2, %v4951_v19 }
  0xd0   : > { %3170 = vperm.xlu1 %4598, %v2759_v5   ;;  %4466 = vmatprep.mubr.msk.bf16.mxu0 %vm523_vm2, %v5003_v46 }
  0xd1   : > { %2942 = vperm.xlu0 %4597, %v2791_v52   ;;  %4437 = vmatmul.mubr.msk.bf16.gmra.mxu1 %vm523_vm2, %v7312_v58 }
  0xd2   : > { %4440 = vmatprep.mubr.msk.bf16.mxu1 %vm523_vm2, %v5394_v38 }
  0xd4   : > { %3180 = vperm.xlu1 %4598, %v2761_v45  }
  0xd5   : > { %2947 = vperm.xlu0 %4597, %v2792_v62  }
  0xd7   : > { %4467 = vmatmul.mubr.msk.bf16.gmra.mxu0 %vm523_vm2, %v5029_v2 }
  0xd8   : > { %4470 = vmatprep.mubr.msk.bf16.mxu0 %vm523_vm2, %v5040_v50 }
  0xd9   : > { %2952 = vperm.xlu0 %4597, %v2793_v28   ;;  %4441 = vmatmul.mubr.msk.bf16.gmra.mxu1 %vm523_vm2, %v5265_v23 }
  0xda   : > { %4444 = vmatprep.mubr.msk.bf16.mxu1 %vm523_vm2, %v5273_v3 }
  0xdc   : > { %v4256_v19 = vpop.f32.mrf.mxu0 }
  0xdd   : > { %3175 = vperm.xlu0 %4597, %v2760_v39  }
  0xde   : > { %v610_v46 = vpop.f32.mrf.mxu0 }
  0xdf   : > { %4471 = vmatmul.mubr.msk.bf16.gmra.mxu0 %vm523_vm2, %v5065_v24  ;;  %v7314_v24 = vunpack.c.h.bf16 %v5572_v48 }
  0xe0   : > { %v5664_v49 = vpop.f32.mrf.mxu1  ;;  %v4257_v29 = vpop.f32.mrf.mxu0  ;;  %4474 = vmatprep.mubr.msk.bf16.mxu0 %vm523_vm2, %v4775_v6  ;;  %v1741_v6 = vrot.slane %v7315_v35, 2 }
  0xe1   : > { %4445 = vmatmul.mubr.msk.bf16.gmra.mxu1 %vm523_vm2, %v5279_v26  ;;  %v1739_v18 = vrot.slane %v7314_v24, 2 }
  0xe2   : > { %v5672_v2 = vpop.f32.mrf.mxu1  ;;  %v613_v50 = vpop.f32.mrf.mxu0  ;;  %4448 = vmatprep.mubr.msk.bf16.mxu1 %vm523_vm2, %v5294_v42 }
  0xe3   : > { %v1740_v5 = vsel %vm949_vm3, %v1738_v54, %v1739_v18  ;;  %v1742_v0 = vsel %vm949_vm3, %v1739_v18, %v1741_v6 }
  0xe4   : > { %v5676_v63 = vpop.f32.mrf.mxu1  ;;  %v5702_v52 = vpack.c.bf16 %v1742_v0, %v1740_v5 }
  0xe6   : > { %v5682_v11 = vpop.f32.mrf.mxu1  ;;  %v4260_v44 = vpop.f32.mrf.mxu0  ;;  %7316 = vst [vmem:[#allocation2_spill] sm:$0xff] %v5702_v52 }
  0xe7   : > { %4475 = vmatmul.mubr.msk.bf16.gmra.mxu0 %vm523_vm2, %v4806_v27 }
  0xe8   : > { %v626_v60 = vpop.f32.mrf.mxu0  ;;  %4478 = vmatprep.mubr.msk.bf16.mxu0 %vm523_vm2, %v4836_v43 }
  0xe9   : > { %v5688_v15 = vpop.f32.mrf.mxu1  ;;  %4449 = vmatmul.mubr.msk.bf16.gmra.mxu1 %vm523_vm2, %v5311_v14 }
  0xea   : > { %v4261_v33 = vpop.f32.mrf.mxu0  ;;  %4452 = vmatprep.mubr.msk.bf16.mxu1 %vm523_vm2, %v5319_v41 }
  0xeb   : > { %v5698_v36 = vpop.f32.mrf.mxu1 }
  0xec   : > { %v629_v27 = vpop.f32.mrf.mxu0 }
  0xed   : > { %v5700_v61 = vpop.f32.mrf.mxu1 }
  0xef   : > { %v5704_v53 = vpop.f32.mrf.mxu1  ;;  %v4264_v39 = vpop.f32.mrf.mxu0  ;;  %4479 = vmatmul.mubr.msk.bf16.gmra.mxu0 %vm523_vm2, %v4885_v7 }
  0xf0   : > { %4482 = vmatprep.mubr.msk.bf16.mxu0 %vm523_vm2, %v4937_v1 }
  0xf1   : > { %v5708_v43 = vpop.f32.mrf.mxu1  ;;  %4453 = vmatmul.mubr.msk.bf16.gmra.mxu1 %vm523_vm2, %v5702_v52  ;;  %v642_v10 = vpop.f32.mrf.mxu0 }
  0xf2   : > { %4492 = vmatprep.mubr.msk.bf16.mxu1 %vm523_vm2, %v4913_v30  ;;  %v5729_v30 = vld [vmem:[%s4766_s26 + $0xcc] sm:$0xff]  }
  0xf3   : > { %v5716_v31 = vpop.f32.mrf.mxu1  ;;  %v4265_v62 = vpop.f32.mrf.mxu0 }
  0xf5   : > { %v5718_v22 = vpop.f32.mrf.mxu1  ;;  %v645_v45 = vpop.f32.mrf.mxu0 }
  0xf7   : > { %v5720_v7 = vpop.f32.mrf.mxu1  ;;  %v4268_v28 = vpop.f32.mrf.mxu0  ;;  %4483 = vmatmul.mubr.msk.bf16.gmra.mxu0 %vm523_vm2, %v4977_v56 }
  0xf8   : > { %7317 = vst [vmem:[#allocation3_spill] sm:$0xff] %v5720_v7  ;;  %4486 = vmatprep.mubr.msk.bf16.mxu0 %vm523_vm2, %v5572_v48 }
  0xf9   : > { %v4290_v37 = vpop.f32.mrf.mxu1  ;;  %4493 = vmatmul.mubr.msk.bf16.vlgmr.msra.gmra.mxu1 %vm523_vm2, %v4953_v21  ;;  %v658_v54 = vpop.f32.mrf.mxu0 }
  0xfa   : > { %v831_v1 = vadd.f32 %v4290_v37, %v4256_v19  ;;  %4496 = vmatprep.mubr.msk.bf16.mxu1 %vm523_vm2, %v4988_v32 }
  0xfb   : > { %v822_v24 = vpop.f32.mrf.mxu1  ;;  %v4269_v35 = vpop.f32.mrf.mxu0 }
  0xfc   : > { %v823_v18 = vadd.f32 %v822_v24, %v610_v46 }
  0xfd   : > { %v4291_v6 = vpop.f32.mrf.mxu1  ;;  %v661_v56 = vpop.f32.mrf.mxu0 }
  0xfe   : > { %v834_v5 = vadd.f32 %v4291_v6, %v4257_v29 }
  0xff   : > { %v825_v0 = vpop.f32.mrf.mxu1  ;;  %v4272_v41 = vpop.f32.mrf.mxu0  ;;  %4487 = vmatmul.mubr.msk.bf16.gmra.mxu0 %vm523_vm2, %v5729_v30 }
 0x100   : > { %v826_v52 = vadd.f32 %v825_v0, %v613_v50  ;;  %4526 = vmatprep.mubr.msk.bf16.mxu0 %vm523_vm2, %v7306_v13 }
 0x101   : > { %v4294_v21 = vpop.f32.mrf.mxu1  ;;  %4497 = vmatmul.mubr.msk.bf16.gmra.mxu1 %vm523_vm2, %v5042_v34  ;;  %v5739_v48 = vpop.f32.mrf.mxu0 }
 0x102   : > { %v847_v32 = vadd.f32 %v4294_v21, %v4260_v44  ;;  %4500 = vmatprep.mubr.msk.bf16.mxu1 %vm523_vm2, %v5078_v51 }
 0x103   : > { %v838_v19 = vpop.f32.mrf.mxu1  ;;  %v4273_v29 = vpop.f32.mrf.mxu0 }
 0x104   : > { %v839_v46 = vadd.f32 %v838_v19, %v626_v60 }
 0x105   : > { %v4295_v50 = vpop.f32.mrf.mxu1  ;;  %v5743_v24 = vpop.f32.mrf.mxu0 }
 0x106   : > { %v850_v37 = vadd.f32 %v4295_v50, %v4261_v33 }
 0x107   : > { %v841_v6 = vpop.f32.mrf.mxu1  ;;  %v4324_v7 = vpop.f32.mrf.mxu0  ;;  %4527 = vmatmul.mubr.msk.bf16.vlgmr.msra.gmra.mxu0 %vm523_vm2, %v5210_v4 }
 0x108   : > { %v842_v0 = vadd.f32 %v841_v6, %v629_v27  ;;  %v5747_v13 = vadd.f32 %v4324_v7, %v831_v1  ;;  %4530 = vmatprep.mubr.msk.bf16.mxu0 %vm523_vm2, %v7308_v12 }
 0x109   : > { %v4298_v34 = vpop.f32.mrf.mxu1  ;;  %4501 = vmatmul.mubr.msk.bf16.gmra.mxu1 %vm523_vm2, %v5100_v9  ;;  %v1165_v44 = vpop.f32.mrf.mxu0 }
 0x10a   : > { %v863_v51 = vadd.f32 %v4298_v34, %v4264_v39  ;;  %4504 = vmatprep.mubr.msk.bf16.mxu1 %vm523_vm2, %v5105_v59  ;;  %v5755_v33 = vadd.f32 %v1165_v44, %v823_v18 }
 0x10b   : > { %v854_v60 = vpop.f32.mrf.mxu1  ;;  %v4325_v21 = vpop.f32.mrf.mxu0 }
 0x10c   : > { %v855_v27 = vadd.f32 %v854_v60, %v642_v10  ;;  %v5757_v19 = vadd.f32 %v4325_v21, %v834_v5 }
 0x10d   : > { %v4299_v4 = vpop.f32.mrf.mxu1  ;;  %v1168_v1 = vpop.f32.mrf.mxu0 }
 0x10e   : > { %v866_v7 = vadd.f32 %v4299_v4, %v4265_v62  ;;  %v5759_v9 = vadd.f32 %v1168_v1, %v826_v52 }
 0x10f   : > { %v857_v50 = vpop.f32.mrf.mxu1  ;;  %v4328_v12 = vpop.f32.mrf.mxu0  ;;  %4531 = vmatmul.mubr.msk.bf16.gmra.mxu0 %vm523_vm2, %v7309_v57 }
 0x110   : > { %v858_v6 = vadd.f32 %v857_v50, %v645_v45  ;;  %v5763_v59 = vadd.f32 %v4328_v12, %v847_v32  ;;  %4534 = vmatprep.mubr.msk.bf16.mxu0 %vm523_vm2, %v7310_v47  ;;  %v7318_v12 = vld [vmem:[#allocation4_spill] sm:$0xff] }
 0x111   : > { %v4302_v39 = vpop.f32.mrf.mxu1  ;;  %4505 = vmatmul.mubr.msk.bf16.gmra.mxu1 %vm523_vm2, %v5149_v20  ;;  %v1181_v62 = vpop.f32.mrf.mxu0 }
 0x112   : > { %v879_v10 = vadd.f32 %v4302_v39, %v4268_v28  ;;  %4508 = vmatprep.mubr.msk.bf16.mxu1 %vm523_vm2, %v4829_v40  ;;  %v5771_v45 = vadd.f32 %v1181_v62, %v839_v46 }
 0x113   : > { %v870_v52 = vpop.f32.mrf.mxu1  ;;  %v4329_v5 = vpop.f32.mrf.mxu0 }
 0x114   : > { %v871_v18 = vadd.f32 %v870_v52, %v658_v54  ;;  %v5773_v34 = vadd.f32 %v4329_v5, %v850_v37 }
 0x115   : > { %v4303_v57 = vpop.f32.mrf.mxu1  ;;  %v1184_v44 = vpop.f32.mrf.mxu0 }
 0x116   : > { %v882_v32 = vadd.f32 %v4303_v57, %v4269_v35  ;;  %v5775_v20 = vadd.f32 %v1184_v44, %v842_v0 }
 0x117   : > { %v873_v60 = vpop.f32.mrf.mxu1  ;;  %v4332_v47 = vpop.f32.mrf.mxu0  ;;  %4535 = vmatmul.mubr.msk.bf16.gmra.mxu0 %vm523_vm2, %v7311_v17 }
 0x118   : > { %v874_v21 = vadd.f32 %v873_v60, %v661_v56  ;;  %v5779_v40 = vadd.f32 %v4332_v47, %v863_v51  ;;  %4538 = vmatprep.mubr.msk.bf16.mxu0 %vm523_vm2, %v7312_v58 }
 0x119   : > { %v4306_v28 = vpop.f32.mrf.mxu1  ;;  %4509 = vmatmul.mubr.msk.bf16.gmra.mxu1 %vm523_vm2, %v4887_v8  ;;  %v1197_v35 = vpop.f32.mrf.mxu0  ;;  %v5794_v8 = vld [vmem:[%s4766_s26 + $0xd4] sm:$0x1] }
 0x11a   : > { %v895_v54 = vadd.f32 %v4306_v28, %v4272_v41  ;;  %4512 = vmatprep.mubr.msk.bf16.mxu1 %vm523_vm2, %v7303_v25  ;;  %v5787_v46 = vadd.f32 %v1197_v35, %v855_v27  ;;  %v325_v27 = vunpack.c.h.bf16 %v5729_v30 }
 0x11b   : > { %v886_v56 = vpop.f32.mrf.mxu1  ;;  %v4333_v37 = vpop.f32.mrf.mxu0 }
 0x11c   : > { %v5789_v0 = vadd.f32 %v4333_v37, %v866_v7  ;;  %v2153_v57 = vrot.slane %v325_v27, 1  ;;  %v7319_v37 = vld [vmem:[#allocation5_spill] sm:$0xff] }
 0x11d   : > { %v4307_v17 = vpop.f32.mrf.mxu1  ;;  %v1200_v4 = vpop.f32.mrf.mxu0 }
 0x11e   : > { %v898_v51 = vadd.f32 %v4307_v17, %v4273_v29  ;;  %v5791_v50 = vadd.f32 %v1200_v4, %v858_v6  ;;  %v324_v29 = vunpack.c.l.bf16 %v5729_v30 }
 0x11f   : > { %v889_v1 = vpop.f32.mrf.mxu1  ;;  %v4336_v58 = vpop.f32.mrf.mxu0  ;;  %4539 = vmatmul.mubr.msk.bf16.gmra.mxu0 %vm523_vm2, %v5394_v38  ;;  %v326_v38 = vunpack.c.l.bf16 %v5794_v8 }
 0x120   : > { %v5798_v25 = vadd.f32 %v4336_v58, %v879_v10  ;;  %4542 = vmatprep.mubr.msk.bf16.mxu0 %vm523_vm2, %v5265_v23  ;;  %v2152_v5 = vrot.slane %v324_v29, 1  ;;  %v890_v4 = vadd.f32 %v889_v1, %v5743_v24 }
 0x121   : > { %v4310_v41 = vpop.f32.mrf.mxu1  ;;  %4513 = vmatmul.mubr.msk.bf16.gmra.mxu1 %vm523_vm2, %v7304_v16  ;;  %v1213_v6 = vpop.f32.mrf.mxu0  ;;  %v2155_v44 = vrot.slane %v326_v38, 1 }
 0x122   : > { %v911_v7 = vadd.f32 %v4310_v41, %v5664_v49  ;;  %4516 = vmatprep.mubr.msk.bf16.mxu1 %vm523_vm2, %v7318_v12  ;;  %v5810_v10 = vadd.f32 %v1213_v6, %v871_v18 }
 0x123   : > { %v902_v39 = vpop.f32.mrf.mxu1  ;;  %v4337_v62 = vpop.f32.mrf.mxu0 }
 0x124   : > { %v903_v16 = vadd.f32 %v902_v39, %v5672_v2  ;;  %v5813_v23 = vadd.f32 %v4337_v62, %v882_v32  ;;  %v887_v2 = vadd.f32 %v886_v56, %v5739_v48 }
 0x125   : > { %v4311_v52 = vpop.f32.mrf.mxu1  ;;  %v1216_v49 = vpop.f32.mrf.mxu0 }
 0x126   : > { %v914_v30 = vadd.f32 %v4311_v52, %v5676_v63  ;;  %v5816_v47 = vadd.f32 %v1216_v49, %v874_v21 }
 0x127   : > { %v905_v60 = vpop.f32.mrf.mxu1  ;;  %v4340_v35 = vpop.f32.mrf.mxu0  ;;  %4543 = vmatmul.mubr.msk.bf16.gmra.mxu0 %vm523_vm2, %v5273_v3  ;;  %v2156_v3 = vsel %vm392_vm1, %v2153_v57, %v2155_v44 }
 0x128   : > { %v906_v28 = vadd.f32 %v905_v60, %v5682_v11  ;;  %v5822_v32 = vadd.f32 %v4340_v35, %v895_v54  ;;  %4546 = vmatprep.mubr.msk.bf16.mxu0 %vm523_vm2, %v5279_v26  ;;  %v2154_v11 = vsel %vm392_vm1, %v2152_v5, %v2153_v57  ;;  %v2361_v5 = vrot.slane %v324_v29, 2 }
 0x129   : > { %v4314_v18 = vpop.f32.mrf.mxu1  ;;  %4517 = vmatmul.mubr.msk.bf16.gmra.mxu1 %vm523_vm2, %v7319_v37  ;;  %v1229_v21 = vpop.f32.mrf.mxu0  ;;  %v2362_v57 = vrot.slane %v325_v27, 2  ;;  %v7322_v27 = vld [vmem:[#allocation2_spill] sm:$0xff] }
 0x12a   : > { %v927_v63 = vadd.f32 %v4314_v18, %v5688_v15  ;;  %4520 = vmatprep.mubr.msk.bf16.mxu1 %vm523_vm2, %v5625_v55  ;;  %v5833_v56 = vadd.f32 %v1229_v21, %v887_v2  ;;  %v2159_v15 = vpack.c.bf16 %v2156_v3, %v2154_v11 }
 0x12b   : > { %v918_v48 = vpop.f32.mrf.mxu1  ;;  %v4341_v17 = vpop.f32.mrf.mxu0 }
 0x12c   : > { %v919_v54 = vadd.f32 %v918_v48, %v5698_v36  ;;  %v5837_v26 = vadd.f32 %v4341_v17, %v898_v51 }
 0x12d   : > { %v4315_v8 = vpop.f32.mrf.mxu1  ;;  %v1232_v41 = vpop.f32.mrf.mxu0 }
 0x12e   : > { %v930_v58 = vadd.f32 %v4315_v8, %v5700_v61  ;;  %v5840_v6 = vadd.f32 %v1232_v41, %v890_v4 }
 0x12f   : > { %v921_v55 = vpop.f32.mrf.mxu1  ;;  %v4344_v39 = vpop.f32.mrf.mxu0  ;;  %4547 = vmatmul.mubr.msk.bf16.gmra.mxu0 %vm523_vm2, %v5294_v42 }
 0x130   : > { %v922_v12 = vadd.f32 %v921_v55, %v5704_v53  ;;  %v5845_v62 = vadd.f32 %v4344_v39, %v911_v7  ;;  %4550 = vmatprep.mubr.msk.bf16.mxu0 %vm523_vm2, %v5311_v14  ;;  %v2364_v7 = vrot.slane %v326_v38, 2  ;;  %v2363_v38 = vsel %vm949_vm3, %v2361_v5, %v2362_v57 }
 0x131   : > { %v4318_v36 = vpop.f32.mrf.mxu1  ;;  %4521 = vmatmul.mubr.msk.bf16.gmra.mxu1 %vm523_vm2, %v2159_v15  ;;  %v1245_v24 = vpop.f32.mrf.mxu0 }
 0x132   : > { %v943_v61 = vadd.f32 %v4318_v36, %v5708_v43  ;;  %v5851_v1 = vadd.f32 %v1245_v24, %v903_v16  ;;  %v7320_v43 = vld [vmem:[#allocation3_spill] sm:$0xff]  ;;  %v7321_v16 = vld [vmem:[#allocation9_spill] sm:$0xff] }
 0x133   : > { %v934_v51 = vpop.f32.mrf.mxu1  ;;  %v4345_v52 = vpop.f32.mrf.mxu0 }
 0x134   : > { %v935_v53 = vadd.f32 %v934_v51, %v5716_v31  ;;  %v5854_v49 = vadd.f32 %v4345_v52, %v914_v30 }
 0x135   : > { %v4319_v42 = vpop.f32.mrf.mxu1  ;;  %v1248_v60 = vpop.f32.mrf.mxu0 }
 0x136   : > { %v946_v44 = vadd.f32 %v4319_v42, %v5718_v22  ;;  %v5857_v14 = vadd.f32 %v1248_v60, %v906_v28  ;;  %v2365_v22 = vsel %vm949_vm3, %v2362_v57, %v2364_v7 }
 0x137   : > { %v937_v35 = vpop.f32.mrf.mxu1  ;;  %v4348_v18 = vpop.f32.mrf.mxu0  ;;  %4551 = vmatmul.mubr.msk.bf16.gmra.mxu0 %vm523_vm2, %v7321_v16  ;;  %v2368_v48 = vpack.c.bf16 %v2365_v22, %v2363_v38 }
 0x138   : > { %v938_v2 = vadd.f32 %v937_v35, %v7320_v43  ;;  %v5862_v31 = vadd.f32 %v4348_v18, %v927_v63  ;;  %4554 = vmatprep.mubr.msk.bf16.mxu0 %vm523_vm2, %v7322_v27 }
 0x139   : > { %v4358_v29 = vpop.f32.mrf.mxu1  ;;  %v1261_v28 = vpop.f32.mrf.mxu0 }
 0x13a   : > { %v1496_v30 = vadd.f32 %v4358_v29, %v5747_v13  ;;  %v5869_v37 = vadd.f32 %v1261_v28, %v919_v54 }
 0x13b   : > { %v1367_v21 = vpop.f32.mrf.mxu1  ;;  %v4349_v3 = vpop.f32.mrf.mxu0 }
 0x13c   : > { %v1494_v11 = vadd.f32 %v1367_v21, %v5755_v33  ;;  %v5872_v63 = vadd.f32 %v4349_v3, %v930_v58 }
 0x13d   : > { %v4359_v17 = vpop.f32.mrf.mxu1  ;;  %v1264_v8 = vpop.f32.mrf.mxu0 }
 0x13e   : > { %v1497_v4 = vadd.f32 %v4359_v17, %v5757_v19  ;;  %v5875_v15 = vadd.f32 %v1264_v8, %v922_v12 }
 0x13f   : > { %v1370_v41 = vpop.f32.mrf.mxu1  ;;  %v4352_v13 = vpop.f32.mrf.mxu0  ;;  %4555 = vmatmul.mubr.msk.bf16.gmra.mxu0 %vm523_vm2, %v2368_v48 }
 0x140   : > { %v1495_v55 = vadd.f32 %v1370_v41, %v5759_v9  ;;  %v5879_v54 = vadd.f32 %v4352_v13, %v943_v61 }
 0x141   : > { %v4362_v39 = vpop.f32.mrf.mxu1  ;;  %v1277_v36 = vpop.f32.mrf.mxu0 }
 0x142   : > { %v1500_v33 = vadd.f32 %v4362_v39, %v5763_v59  ;;  %v5882_v58 = vadd.f32 %v1277_v36, %v935_v53 }
 0x143   : > { %v1383_v24 = vpop.f32.mrf.mxu1  ;;  %v4353_v51 = vpop.f32.mrf.mxu0 }
 0x144   : > { %v1498_v19 = vadd.f32 %v1383_v24, %v5771_v45  ;;  %v5885_v12 = vadd.f32 %v4353_v51, %v946_v44 }
 0x145   : > { %v4363_v52 = vpop.f32.mrf.mxu1  ;;  %v1280_v5 = vpop.f32.mrf.mxu0 }
 0x146   : > { %v1501_v9 = vadd.f32 %v4363_v52, %v5773_v34  ;;  %v5888_v57 = vadd.f32 %v1280_v5, %v938_v2  ;;  %v5923_v52 = vpop.permute.xlu1 %3030 }
 0x147   : > { %v1386_v61 = vpop.f32.mrf.mxu1  ;;  %v4392_v7 = vpop.f32.mrf.mxu0  ;;  %7324 = vst [vmem:[#allocation7_spill] sm:$0xff] %v5923_v52 }
 0x148   : > { %v1499_v42 = vadd.f32 %v1386_v61, %v5775_v20  ;;  %v5891_v60 = vadd.f32 %v4392_v7, %v1496_v30 }
 0x149   : > { %v4366_v59 = vpop.f32.mrf.mxu1  ;;  %v1579_v35 = vpop.f32.mrf.mxu0 }
 0x14a   : > { %v1504_v53 = vadd.f32 %v4366_v59, %v5779_v40  ;;  %v5894_v43 = vadd.f32 %v1579_v35, %v1494_v11 }
 0x14b   : > { %v1399_v45 = vpop.f32.mrf.mxu1  ;;  %v4393_v18 = vpop.f32.mrf.mxu0 }
 0x14c   : > { %v1502_v44 = vadd.f32 %v1399_v45, %v5787_v46  ;;  %v5897_v16 = vadd.f32 %v4393_v18, %v1497_v4  ;;  %v5936_v18 = vpop.permute.xlu1 %3035 }
 0x14d   : > { %v4367_v34 = vpop.f32.mrf.mxu1  ;;  %v1582_v29 = vpop.f32.mrf.mxu0  ;;  %7325 = vst [vmem:[#allocation8_spill] sm:$0xff] %v5936_v18 }
 0x14e   : > { %v1505_v2 = vadd.f32 %v4367_v34, %v5789_v0  ;;  %v5900_v27 = vadd.f32 %v1582_v29, %v1495_v55 }
 0x14f   : > { %v1402_v20 = vpop.f32.mrf.mxu1  ;;  %v4396_v22 = vpop.f32.mrf.mxu0 }
 0x150   : > { %v1503_v38 = vadd.f32 %v1402_v20, %v5791_v50  ;;  %v5903_v30 = vadd.f32 %v4396_v22, %v1500_v33 }
 0x151   : > { %v4370_v40 = vpop.f32.mrf.mxu1  ;;  %v1595_v21 = vpop.f32.mrf.mxu0 }
 0x152   : > { %v1508_v28 = vadd.f32 %v4370_v40, %v5798_v25  ;;  %v5906_v11 = vadd.f32 %v1595_v21, %v1498_v19 }
 0x153   : > { %v1415_v46 = vpop.f32.mrf.mxu1  ;;  %v4397_v48 = vpop.f32.mrf.mxu0 }
 0x154   : > { %v1506_v3 = vadd.f32 %v1415_v46, %v5810_v10  ;;  %v5909_v17 = vadd.f32 %v4397_v48, %v1501_v9  ;;  %v5918_v10 = vpop.permute.xlu0 %3025  ;;  %v5949_v48 = vpop.permute.xlu1 %3040 }
 0x155   : > { %v4371_v0 = vpop.f32.mrf.mxu1  ;;  %v1598_v8 = vpop.f32.mrf.mxu0  ;;  %7323 = vst [vmem:[#allocation6_spill] sm:$0xff] %v5918_v10  ;;  %7327 = vst [vmem:[#allocation11_spill] sm:$0xff] %v5949_v48 }
 0x156   : > { %v1509_v4 = vadd.f32 %v4371_v0, %v5813_v23  ;;  %v5912_v41 = vadd.f32 %v1598_v8, %v1499_v42 }
 0x157   : > { %v1418_v50 = vpop.f32.mrf.mxu1  ;;  %v4400_v13 = vpop.f32.mrf.mxu0 }
 0x158   : > { %v1507_v55 = vadd.f32 %v1418_v50, %v5816_v47  ;;  %v5915_v39 = vadd.f32 %v4400_v13, %v1504_v53  ;;  %v5931_v53 = vpop.permute.xlu0 %2797 }
 0x159   : > { %v4374_v25 = vpop.f32.mrf.mxu1  ;;  %v1611_v36 = vpop.f32.mrf.mxu0 }
 0x15a   : > { %v1512_v33 = vadd.f32 %v4374_v25, %v5822_v32  ;;  %v5920_v19 = vadd.f32 %v1611_v36, %v1502_v44 }
 0x15b   : > { %v1431_v24 = vpop.f32.mrf.mxu1  ;;  %v4401_v51 = vpop.f32.mrf.mxu0 }
 0x15c   : > { %v1510_v23 = vadd.f32 %v1431_v24, %v5833_v56  ;;  %v5925_v5 = vadd.f32 %v4401_v51, %v1505_v2  ;;  %v5944_v40 = vpop.permute.xlu0 %2802  ;;  %v5962_v51 = vpop.permute.xlu1 %3045 }
 0x15d   : > { %v4375_v9 = vpop.f32.mrf.mxu1  ;;  %v1614_v61 = vpop.f32.mrf.mxu0  ;;  %7326 = vst [vmem:[#allocation10_spill] sm:$0xff] %v5944_v40  ;;  %7329 = vst [vmem:[#allocation4_spill] sm:$0xff] %v5962_v51 }
 0x15e   : > { %v1513_v47 = vadd.f32 %v4375_v9, %v5837_v26  ;;  %v5928_v7 = vadd.f32 %v1614_v61, %v1503_v38  ;;  %v2987_v61 = vlaneseq }
 0x15f   : > { %v1434_v42 = vpop.f32.mrf.mxu1  ;;  %v4404_v59 = vpop.f32.mrf.mxu0 }
 0x160   : > { %v1511_v32 = vadd.f32 %v1434_v42, %v5840_v6  ;;  %v5933_v45 = vadd.f32 %v4404_v59, %v1508_v28  ;;  %v5957_v25 = vpop.permute.xlu0 %2817  ;;  %v7228_v42 = vmov 0.0  }
 0x161   : > { %v4378_v35 = vpop.f32.mrf.mxu1  ;;  %v1627_v44 = vpop.f32.mrf.mxu0  ;;  %7328 = vst [vmem:[#allocation12_spill] sm:$0xff] %v5957_v25  ;;  %4558 = vmatprep.subr.mxu1 %v7228_v42 }
 0x162   : > { %v1516_v56 = vadd.f32 %v4378_v35, %v5845_v62  ;;  %v5938_v2 = vadd.f32 %v1627_v44, %v1506_v3 }
 0x163   : > { %v1447_v34 = vpop.f32.mrf.mxu1  ;;  %v4405_v29 = vpop.f32.mrf.mxu0 }
 0x164   : > { %v1514_v26 = vadd.f32 %v1447_v34, %v5851_v1  ;;  %v5941_v38 = vadd.f32 %v4405_v29, %v1509_v4 }
 0x165   : > { %v4379_v20 = vpop.f32.mrf.mxu1  ;;  %v1630_v22 = vpop.f32.mrf.mxu0 }
 0x166   : > { %v1517_v6 = vadd.f32 %v4379_v20, %v5854_v49  ;;  %v5946_v21 = vadd.f32 %v1630_v22, %v1507_v55  ;;  %v5978_v20 = vpop.permute.xlu1 %3050 }
 0x167   : > { %v1450_v28 = vpop.f32.mrf.mxu1  ;;  %v4408_v46 = vpop.f32.mrf.mxu0  ;;  %7332 = vst [vmem:[#allocation9_spill] sm:$0xff] %v5978_v20 }
 0x168   : > { %v1515_v62 = vadd.f32 %v1450_v28, %v5857_v14  ;;  %v5951_v0 = vadd.f32 %v4408_v46, %v1512_v33 }
 0x169   : > { %v4382_v3 = vpop.f32.mrf.mxu1  ;;  %v1643_v4 = vpop.f32.mrf.mxu0 }
 0x16a   : > { %v1520_v1 = vadd.f32 %v4382_v3, %v5862_v31  ;;  %v5954_v50 = vadd.f32 %v1643_v4, %v1510_v23  ;;  %v3392_v3 = vand.u32 127, %v2987_v61 }
 0x16b   : > { %v1463_v8 = vpop.f32.mrf.mxu1  ;;  %v4409_v13 = vpop.f32.mrf.mxu0 }
 0x16c   : > { %v1518_v49 = vadd.f32 %v1463_v8, %v5869_v37  ;;  %v5959_v36 = vadd.f32 %v4409_v13, %v1513_v47 }
 0x16d   : > { %v4383_v55 = vpop.f32.mrf.mxu1  ;;  %v1646_v24 = vpop.f32.mrf.mxu0 }
 0x16e   : > { %v1521_v14 = vadd.f32 %v4383_v55, %v5872_v63  ;;  %v5964_v9 = vadd.f32 %v1646_v24, %v1511_v32  ;;  %v5971_v63 = vpop.permute.xlu0 %2822  ;;  %v3393_v55 = vcvt.s32.f32 %v3392_v3 }
 0x16f   : > { %v1466_v33 = vpop.f32.mrf.mxu1  ;;  %v4412_v23 = vpop.f32.mrf.mxu0  ;;  %7330 = vst [vmem:[#allocation5_spill] sm:$0xff] %v5971_v63 }
 0x170   : > { %v1519_v31 = vadd.f32 %v1466_v33, %v5875_v15  ;;  %v5968_v59 = vadd.f32 %v4412_v23, %v1516_v56  ;;  %v5976_v15 = vshrl.u32 %v2987_v61, 7 }
 0x171   : > { %v4386_v37 = vpop.f32.mrf.mxu1  ;;  %v1659_v35 = vpop.f32.mrf.mxu0 }
 0x172   : > { %v1524_v47 = vadd.f32 %v4386_v37, %v5879_v54  ;;  %v5973_v34 = vadd.f32 %v1659_v35, %v1514_v26  ;;  %7331 = vst [vmem:[#allocation3_spill] sm:$0xff] %v5976_v15  ;;  %v3388_v54 = vadd.s32 8, %v5976_v15  ;;  %v5987_v24 = vpop.permute.xlu0 %2827  ;;  %v3400_v35 = vadd.f32 0.5, %v3393_v55 }
 0x173   : > { %v1479_v44 = vpop.f32.mrf.mxu1  ;;  %v4413_v29 = vpop.f32.mrf.mxu0  ;;  %7333 = vst [vmem:[#allocation2_spill] sm:$0xff] %v5987_v24 }
 0x174   : > { %v1522_v32 = vadd.f32 %v1479_v44, %v5882_v58  ;;  %v5980_v28 = vadd.f32 %v4413_v29, %v1517_v6  ;;  %v3390_v13 = vcvt.s32.f32 %v3388_v54  ;;  %v5992_v44 = vpop.permute.xlu1 %2807 }
 0x175   : > { %v4387_v22 = vpop.f32.mrf.mxu1  ;;  %v1662_v46 = vpop.f32.mrf.mxu0 }
 0x176   : > { %v1525_v56 = vadd.f32 %v4387_v22, %v5885_v12  ;;  %v5984_v8 = vadd.f32 %v1662_v46, %v1515_v62  ;;  %v3395_v37 = vadd.f32 0.5, %v3390_v13  ;;  %v5997_v46 = vmul.f32 0.5, %v3400_v35  ;;  %v6003_v13 = vpop.permute.xlu0 %2832 }
 0x177   : > { %v1482_v4 = vpop.f32.mrf.mxu1  ;;  %v4416_v58 = vpop.f32.mrf.mxu0  ;;  %7334 = vst [vmem:[#allocation13_spill] sm:$0xff] %v6003_v13 }
 0x178   : > { %v1523_v26 = vadd.f32 %v1482_v4, %v5888_v57  ;;  %v5989_v33 = vadd.f32 %v4416_v58, %v1520_v1  ;;  %v3397_v22 = vmul.f32 0.5, %v3395_v37  ;;  %v7225_v58 = vfloor.f32 %v5997_v46 }
 0x179   : > { %v4426_v6 = vpop.f32.mrf.mxu1  ;;  %v1675_v12 = vpop.f32.mrf.mxu0  ;;  %v7226_v37 = vmov 1.0  }
 0x17a   : > { %v1917_v23 = vadd.f32 %v4426_v6, %v5891_v60  ;;  %v5994_v61 = vadd.f32 %v1675_v12, %v1518_v49  ;;  %v3399_v4 = vfloor.f32 %v3397_v22  ;;  %v7335_v6 = vmov 0 }
 0x17b   : > { %v1788_v62 = vpop.f32.mrf.mxu1  ;;  %v4417_v29 = vpop.f32.mrf.mxu0 }
 0x17c   : > { %v1915_v57 = vadd.f32 %v1788_v62, %v5894_v43  ;;  %v5999_v54 = vadd.f32 %v4417_v29, %v1521_v14  ;;  %vm6011_vm4 = vcmp.eq.f32.partialorder %v3399_v4, %v7225_v58  ;;  %v6015_v14 = vpop.permute.xlu1 %2812 }
 0x17d   : > { %v4427_v1 = vpop.f32.mrf.mxu1  ;;  %v1678_v60 = vpop.f32.mrf.mxu0  ;;  %v7336_v6 = vsel %vm6011_vm4, 4294967295, %v7335_v6  ;;  %7338 = vst [vmem:[#allocation15_spill] sm:$0xff] %v6015_v14  ;;  %4559 = vmatpush3.msk.msra.mxu1 %vm6011_vm4, %v7226_v37 }
 0x17e   : > { %v1918_v3 = vadd.f32 %v4427_v1, %v5897_v16  ;;  %v6005_v49 = vadd.f32 %v1678_v60, %v1519_v31  ;;  %7337 = vst [vmem:[#allocation14_spill] sm:$0xff] %v7336_v6  ;;  %4560 = vmatprep.subr.mxu1 %v7228_v42  ;;  %v6028_v1 = vpop.permute.xlu0 %2837 }
 0x17f   : > { %v6007_v55 = vpop.f32.mrf.mxu1  ;;  %v4420_v43 = vpop.f32.mrf.mxu0  ;;  %7339 = vst [vmem:[#allocation16_spill] sm:$0xff] %v6028_v1 }
 0x180   : > { %v6017_v16 = vadd.f32 %v4420_v43, %v1524_v47  ;;  %v6033_v58 = vpop.permute.xlu1 %3055 }
 0x181   : > { %v4430_v12 = vpop.f32.mrf.mxu1  ;;  %v1691_v35 = vpop.f32.mrf.mxu0  ;;  %7340 = vst [vmem:[#allocation17_spill] sm:$0xff] %v6033_v58 }
 0x182   : > { %v1921_v31 = vadd.f32 %v4430_v12, %v5903_v30  ;;  %v6024_v62 = vadd.f32 %v1691_v35, %v1522_v32  ;;  %v6042_v1 = vpop.permute.xlu0 %2842 }
 0x183   : > { %v6026_v29 = vpop.f32.mrf.mxu1  ;;  %v4421_v22 = vpop.f32.mrf.mxu0  ;;  %7341 = vst [vmem:[#allocation18_spill] sm:$0xff] %v6042_v1 }
 0x184   : > { %v6030_v47 = vadd.f32 %v4421_v22, %v1525_v56 }
 0x185   : > { %v4431_v60 = vpop.f32.mrf.mxu1  ;;  %v1694_v43 = vpop.f32.mrf.mxu0 }
 0x186   : > { %v1922_v4 = vadd.f32 %v4431_v60, %v5909_v17  ;;  %v6035_v37 = vadd.f32 %v1694_v43, %v1523_v26  ;;  %v6048_v60 = vpop.permute.xlu1 %3060 }
 0x187   : > { %v6037_v30 = vpop.f32.mrf.mxu1  ;;  %v4460_v12 = vpop.f32.mrf.mxu0  ;;  %7342 = vst [vmem:[#allocation19_spill] sm:$0xff] %v6048_v60 }
 0x188   : > { %v6039_v35 = vadd.f32 %v4460_v12, %v1917_v23  ;;  %v6057_v12 = vpop.permute.xlu0 %2847 }
 0x189   : > { %v4434_v32 = vpop.f32.mrf.mxu1  ;;  %v1990_v6 = vpop.f32.mrf.mxu0  ;;  %7343 = vst [vmem:[#allocation20_spill] sm:$0xff] %v6057_v12 }
 0x18a   : > { %v1925_v42 = vadd.f32 %v4434_v32, %v5915_v39  ;;  %v6046_v22 = vadd.f32 %v1990_v6, %v1915_v57  ;;  %v6064_v60 = vpop.permute.xlu1 %3065 }
 0x18b   : > { %v6044_v56 = vpop.f32.mrf.mxu1  ;;  %v4461_v17 = vpop.f32.mrf.mxu0  ;;  %7345 = vst [vmem:[#allocation22_spill] sm:$0xff] %v6064_v60 }
 0x18c   : > { %v6050_v43 = vadd.f32 %v4461_v17, %v1918_v3  ;;  %v6073_v12 = vpop.permute.xlu0 %2852 }
 0x18d   : > { %v4435_v26 = vpop.f32.mrf.mxu1  ;;  %v6053_v51 = vpop.f32.mrf.mxu0  ;;  %7347 = vst [vmem:[#allocation24_spill] sm:$0xff] %v6073_v12 }
 0x18e   : > { %v1926_v20 = vadd.f32 %v4435_v26, %v5925_v5 }
 0x18f   : > { %v6055_v23 = vpop.f32.mrf.mxu1  ;;  %v4464_v39 = vpop.f32.mrf.mxu0 }
 0x190   : > { %v6059_v1 = vadd.f32 %v4464_v39, %v1921_v31 }
 0x191   : > { %v4438_v32 = vpop.f32.mrf.mxu1  ;;  %v6062_v6 = vpop.f32.mrf.mxu0 }
 0x192   : > { %7344 = vst [vmem:[#allocation21_spill] sm:$0xff] %v6059_v1  ;;  %v1929_v57 = vadd.f32 %v4438_v32, %v5933_v45  ;;  %v6077_v45 = vpop.permute.xlu1 %3070 }
 0x193   : > { %v6066_v3 = vpop.f32.mrf.mxu1  ;;  %v4465_v17 = vpop.f32.mrf.mxu0  ;;  %7348 = vst [vmem:[#allocation25_spill] sm:$0xff] %v6077_v45 }
 0x194   : > { %v6068_v26 = vadd.f32 %v4465_v17, %v1922_v4 }
 0x195   : > { %v4439_v5 = vpop.f32.mrf.mxu1  ;;  %v6071_v58 = vpop.f32.mrf.mxu0 }
 0x196   : > { %7346 = vst [vmem:[#allocation23_spill] sm:$0xff] %v6068_v26  ;;  %v1930_v63 = vadd.f32 %v4439_v5, %v5941_v38  ;;  %v3389_v38 = vcvt.s32.f32 %v5976_v15  ;;  %v6087_v5 = vpop.permute.xlu0 %2857 }
 0x197   : > { %v6075_v31 = vpop.f32.mrf.mxu1  ;;  %v4468_v39 = vpop.f32.mrf.mxu0  ;;  %7350 = vst [vmem:[#allocation27_spill] sm:$0xff] %v6087_v5 }
 0x198   : > { %v6079_v13 = vadd.f32 %v4468_v39, %v1925_v42  ;;  %v3394_v24 = vadd.f32 0.5, %v3389_v38  ;;  %v6094_v42 = vpop.permute.xlu1 %3075 }
 0x199   : > { %v4442_v32 = vpop.f32.mrf.mxu1  ;;  %v6082_v25 = vpop.f32.mrf.mxu0  ;;  %7352 = vst [vmem:[#allocation29_spill] sm:$0xff] %v6094_v42 }
 0x19a   : > { %7349 = vst [vmem:[#allocation26_spill] sm:$0xff] %v6079_v13  ;;  %v1933_v60 = vadd.f32 %v4442_v32, %v5951_v0  ;;  %v3396_v39 = vmul.f32 0.5, %v3394_v24 }
 0x19b   : > { %v6084_v4 = vpop.f32.mrf.mxu1  ;;  %v4469_v17 = vpop.f32.mrf.mxu0 }
 0x19c   : > { %v6089_v52 = vadd.f32 %v4469_v17, %v1926_v20  ;;  %v3398_v10 = vfloor.f32 %v3396_v39  ;;  %v6103_v20 = vpop.permute.xlu0 %2862  ;;  %v7359_v17 = vmov 1.0   ;;  %v7362_v39 = vmov 0.0  }
 0x19d   : > { %v4443_v12 = vpop.f32.mrf.mxu1  ;;  %v6092_v48 = vpop.f32.mrf.mxu0  ;;  %7354 = vst [vmem:[#allocation31_spill] sm:$0xff] %v6103_v20  ;;  %4562 = vmatprep.mubr.msk.f32.mxu1 %vm4712_vm6, %v7362_v39 }
 0x19e   : > { %7351 = vst [vmem:[#allocation28_spill] sm:$0xff] %v6089_v52  ;;  %v1934_v45 = vadd.f32 %v4443_v12, %v5959_v36  ;;  %v7355_v36 = vfloor.f32 %v5997_v46  ;;  %v7356_v12 = vmov 0 }
 0x19f   : > { %v6096_v0 = vpop.f32.mrf.mxu1  ;;  %v4472_v32 = vpop.f32.mrf.mxu0 }
 0x1a0   : > { %v6098_v40 = vadd.f32 %v4472_v32, %v1929_v57  ;;  %vm6109_vm5 = vcmp.eq.f32.partialorder %v3398_v10, %v7355_v36  ;;  %v6116_v57 = vpop.permute.xlu1 %3080  ;;  %v6126_v36 = vpop.permute.xlu0 %2867 }
 0x1a1   : > { %v4446_v13 = vpop.f32.mrf.mxu1  ;;  %v6101_v18 = vpop.f32.mrf.mxu0  ;;  %v7357_v12 = vsel %vm6109_vm5, 4294967295, %v7356_v12  ;;  %4561 = vmatpush3.msk.msra.mxu1 %vm6109_vm5, %v7359_v17  ;;  %7360 = vst [vmem:[#allocation33_spill] sm:$0xff] %v6116_v57  ;;  %7363 = vst [vmem:[#allocation35_spill] sm:$0xff] %v6126_v36 }
 0x1a2   : > { %7353 = vst [vmem:[#allocation30_spill] sm:$0xff] %v6098_v40  ;;  %v1937_v5 = vadd.f32 %v4446_v13, %v5968_v59  ;;  %7358 = vst [vmem:[#allocation32_spill] sm:$0xff] %v7357_v12  ;;  %4565 = vmatprep.subr.mxu1 %v7362_v39 }
 0x1a3   : > { %v6105_v38 = vpop.f32.mrf.mxu1  ;;  %v4473_v24 = vpop.f32.mrf.mxu0 }
 0x1a4   : > { %v6118_v13 = vadd.f32 %v4473_v24, %v1930_v63  ;;  %v6133_v63 = vpop.permute.xlu1 %3085 }
 0x1a5   : > { %v4447_v59 = vpop.f32.mrf.mxu1  ;;  %v6122_v20 = vpop.f32.mrf.mxu0  ;;  %7365 = vst [vmem:[#allocation37_spill] sm:$0xff] %v6133_v63 }
 0x1a6   : > { %7361 = vst [vmem:[#allocation34_spill] sm:$0xff] %v6118_v13  ;;  %v1938_v32 = vadd.f32 %v4447_v59, %v5980_v28 }
 0x1a7   : > { %v6124_v10 = vpop.f32.mrf.mxu1  ;;  %v4476_v46 = vpop.f32.mrf.mxu0 }
 0x1a8   : > { %v6128_v40 = vadd.f32 %v4476_v46, %v1933_v60  ;;  %v6144_v46 = vpop.permute.xlu0 %2872  ;;  %v6148_v63 = vpop.permute.xlu1 %3090 }
 0x1a9   : > { %v4450_v42 = vpop.f32.mrf.mxu1  ;;  %v6131_v17 = vpop.f32.mrf.mxu0  ;;  %7367 = vst [vmem:[#allocation39_spill] sm:$0xff] %v6144_v46  ;;  %7368 = vst [vmem:[#allocation40_spill] sm:$0xff] %v6148_v63 }
 0x1aa   : > { %7364 = vst [vmem:[#allocation36_spill] sm:$0xff] %v6128_v40  ;;  %v1941_v12 = vadd.f32 %v4450_v42, %v5989_v33 }
 0x1ab   : > { %v6135_v24 = vpop.f32.mrf.mxu1  ;;  %v4477_v57 = vpop.f32.mrf.mxu0 }
 0x1ac   : > { %v6139_v59 = vadd.f32 %v4477_v57, %v1934_v45  ;;  %v6164_v63 = vpop.permute.xlu1 %3095 }
 0x1ad   : > { %v4451_v28 = vpop.f32.mrf.mxu1  ;;  %v6142_v60 = vpop.f32.mrf.mxu0  ;;  %7373 = vst [vmem:[#allocation45_spill] sm:$0xff] %v6164_v63 }
 0x1ae   : > { %7366 = vst [vmem:[#allocation38_spill] sm:$0xff] %v6139_v59  ;;  %v1942_v36 = vadd.f32 %v4451_v28, %v5999_v54  ;;  %v6157_v54 = vpop.permute.xlu0 %2877 }
 0x1af   : > { %v6146_v33 = vpop.f32.mrf.mxu1  ;;  %v4480_v42 = vpop.f32.mrf.mxu0  ;;  %7370 = vst [vmem:[#allocation42_spill] sm:$0xff] %v6157_v54 }
 0x1b0   : > { %v6150_v13 = vadd.f32 %v4480_v42, %v1937_v5 }
 0x1b1   : > { %v4454_v40 = vpop.f32.mrf.mxu1  ;;  %v6153_v39 = vpop.f32.mrf.mxu0 }
 0x1b2   : > { %7369 = vst [vmem:[#allocation41_spill] sm:$0xff] %v6150_v13  ;;  %v1945_v52 = vadd.f32 %v4454_v40, %v6017_v16  ;;  %v6172_v1 = vpop.permute.xlu0 %2882 }
 0x1b3   : > { %v6155_v45 = vpop.f32.mrf.mxu1  ;;  %v4481_v57 = vpop.f32.mrf.mxu0  ;;  %7376 = vst [vmem:[#allocation48_spill] sm:$0xff] %v6172_v1  ;;  %v6189_v1 = vsub.s32 0, %v5976_v15 }
 0x1b4   : > { %v6159_v59 = vadd.f32 %v4481_v57, %v1938_v32  ;;  %v6174_v32 = vpop.permute.xlu1 %3100 }
 0x1b5   : > { %v4455_v28 = vpop.f32.mrf.mxu1  ;;  %v6162_v26 = vpop.f32.mrf.mxu0  ;;  %7377 = vst [vmem:[#allocation49_spill] sm:$0xff] %v6174_v32  ;;  %v1923_v32 = vadd.f32 %v6044_v56, %v5920_v19  ;;  %v1927_v19 = vadd.f32 %v6066_v3, %v5938_v2  ;;  %v1932_v2 = vadd.f32 %v6096_v0, %v5964_v9 }
 0x1b6   : > { %7371 = vst [vmem:[#allocation43_spill] sm:$0xff] %v6159_v59  ;;  %v1946_v46 = vadd.f32 %v4455_v28, %v6030_v47  ;;  %7372 = vst [vmem:[#allocation44_spill] sm:$0xff] %v6162_v26  ;;  %v6180_v26 = vpop.permute.xlu0 %2887 }
 0x1b7   : > { %v6166_v5 = vpop.f32.mrf.mxu1  ;;  %v4484_v42 = vpop.f32.mrf.mxu0  ;;  %7379 = vst [vmem:[#allocation51_spill] sm:$0xff] %v6180_v26  ;;  %v6255_v0 = vadd.f32 %v6142_v60, %v1932_v2 }
 0x1b8   : > { %v6168_v40 = vadd.f32 %v4484_v42, %v1941_v12 }
 0x1b9   : > { %v4494_v16 = vpop.f32.mrf.mxu1  ;;  %v6170_v13 = vpop.f32.mrf.mxu0 }
 0x1ba   : > { %7374 = vst [vmem:[#allocation46_spill] sm:$0xff] %v6168_v40  ;;  %7375 = vst [vmem:[#allocation47_spill] sm:$0xff] %v6170_v13  ;;  %v6191_v13 = vpop.permute.xlu1 %3105 }
 0x1bb   : > { %v2202_v54 = vpop.f32.mrf.mxu1  ;;  %v4485_v14 = vpop.f32.mrf.mxu0  ;;  %7382 = vst [vmem:[#allocation54_spill] sm:$0xff] %v6191_v13  ;;  %v1920_v13 = vadd.f32 %v6037_v30, %v5912_v41  ;;  %v1928_v30 = vadd.f32 %v6075_v31, %v5946_v21  ;;  %v1935_v21 = vadd.f32 %v6105_v38, %v5973_v34  ;;  %v1939_v34 = vadd.f32 %v6135_v24, %v5994_v61 }
 0x1bc   : > { %v6176_v57 = vadd.f32 %v4485_v14, %v1942_v36  ;;  %v6198_v36 = vld [vmem:[%s7154_s3] sm:$0x7]  ;;  %v1943_v61 = vadd.f32 %v6155_v45, %v6024_v62 }
 0x1bd   : > { %v4495_v47 = vpop.f32.mrf.mxu1  ;;  %v6178_v28 = vpop.f32.mrf.mxu0  ;;  %7384 = vst [vmem:[#allocation56_spill] sm:$0xff] %v6198_v36  ;;  %v2122_v56 = vadd.f32 %v6071_v58, %v1920_v13  ;;  %v6241_v58 = vadd.f32 %v6122_v20, %v1928_v30  ;;  %v7385_v24 = vld [vmem:[#allocation44_spill] sm:$0xff] }
 0x1be   : > { %7378 = vst [vmem:[#allocation50_spill] sm:$0xff] %v6176_v57 }
 0x1bf   : > { %v2205_v59 = vpop.f32.mrf.mxu1  ;;  %v4488_v63 = vpop.f32.mrf.mxu0 }
 0x1c0   : > { %v6182_v12 = vadd.f32 %v4488_v63, %v1945_v52  ;;  %v1916_v52 = vadd.f32 %v6007_v55, %v5900_v27  ;;  %v1919_v63 = vadd.f32 %v6026_v29, %v5906_v11  ;;  %v1924_v27 = vadd.f32 %v6055_v23, %v5928_v7 }
 0x1c1   : > { %v6184_v42 = vpop.f32.mrf.mxu1  ;;  %v6186_v40 = vpop.f32.mrf.mxu0  ;;  %v2331_v29 = vadd.f32 %v4494_v16, %v6039_v35  ;;  %v1931_v7 = vadd.f32 %v6084_v4, %v5954_v50  ;;  %v2329_v35 = vadd.f32 %v2202_v54, %v6046_v22  ;;  %v2332_v22 = vadd.f32 %v4495_v47, %v6050_v43  ;;  %v7386_v54 = vld [vmem:[#allocation47_spill] sm:$0xff] }
 0x1c2   : > { %7380 = vst [vmem:[#allocation52_spill] sm:$0xff] %v6182_v12  ;;  %7381 = vst [vmem:[#allocation53_spill] sm:$0xff] %v6186_v40  ;;  %v6214_v40 = vpop.permute.xlu0 %2892  ;;  %v2118_v11 = vadd.f32 %v6053_v51, %v1916_v52  ;;  %v2121_v55 = vadd.f32 %v6062_v6, %v1919_v63  ;;  %v2126_v51 = vadd.f32 %v6092_v48, %v1924_v27  ;;  %v7388_v52 = vld [vmem:[#allocation21_spill] sm:$0xff] }
 0x1c3   : > { %v6193_v14 = vpop.f32.mrf.mxu1  ;;  %v4489_v57 = vpop.f32.mrf.mxu0  ;;  %v1936_v48 = vadd.f32 %v6124_v10, %v5984_v8  ;;  %v1940_v4 = vadd.f32 %v6146_v33, %v6005_v49  ;;  %v1944_v49 = vadd.f32 %v6166_v5, %v6035_v37  ;;  %v6274_v16 = vadd.f32 %v7386_v54, %v1939_v34 }
 0x1c4   : > { %7383 = vst [vmem:[#allocation55_spill] sm:$0xff] %v6193_v14  ;;  %v6204_v12 = vadd.f32 %v4489_v57, %v1946_v46  ;;  %v6212_v14 = vrot.slane %v6198_v36, %v6189_v1  ;;  %v2125_v46 = vadd.f32 %v6082_v25, %v1923_v32  ;;  %v6227_v36 = vpop.permute.xlu1 %3110  ;;  %v6238_v25 = vadd.f32 %v6101_v18, %v1927_v19  ;;  %v7387_v32 = vld [vmem:[#allocation15_spill] sm:$0xff] }
 0x1c5   : > { %v4499_v15 = vpop.f32.mrf.mxu1  ;;  %v2105_v26 = vpop.f32.mrf.mxu0  ;;  %v6250_v18 = vadd.f32 %v6131_v17, %v1931_v7  ;;  %v2330_v43 = vadd.f32 %v2205_v59, %v2118_v11  ;;  %v6264_v17 = vadd.f32 %v6153_v39, %v1935_v21  ;;  %v6269_v60 = vadd.f32 %v7385_v24, %v1936_v48  ;;  %v7391_v19 = vld [vmem:[#allocation23_spill] sm:$0xff] }
 0x1c6   : > { %v6257_v8 = vpop.permute.xlu0 %2897  ;;  %v6279_v39 = vadd.f32 %v6178_v28, %v1940_v4  ;;  %v2335_v37 = vadd.f32 %v6184_v42, %v7388_v52  ;;  %v2336_v30 = vadd.f32 %v4499_v15, %v7391_v19  ;;  %v6295_v21 = vadd.f32 %v2105_v26, %v1944_v49  ;;  %v7396_v4 = vld [vmem:[#allocation28_spill] sm:$0xff] }
 0x1c7   : > { %v2221_v41 = vpop.f32.mrf.mxu1  ;;  %v4528_v57 = vpop.f32.mrf.mxu0 }
 0x1c8   : > { %v2540_v6 = vadd.f32 %v4528_v57, %v2331_v29  ;;  %v6271_v59 = vpop.permute.xlu1 %3115  ;;  %v7392_v57 = vld [vmem:[#allocation8_spill] sm:$0xff]  ;;  %v2334_v42 = vadd.f32 %v2221_v41, %v2122_v56  ;;  %v7399_v56 = vld [vmem:[#allocation2_spill] sm:$0xff] }
 0x1c9   : > { %v4502_v23 = vpop.f32.mrf.mxu1  ;;  %v2411_v50 = vpop.f32.mrf.mxu0  ;;  %v7389_v5 = vld [vmem:[#allocation53_spill] sm:$0xff] }
 0x1ca   : > { %v2957_v3 = vmul.f32 %v5992_v44, %v2540_v6  ;;  %v2538_v9 = vadd.f32 %v2411_v50, %v2329_v35  ;;  %v6284_v63 = vadd.f32 %v7389_v5, %v1943_v61  ;;  %v7393_v35 = vld [vmem:[#allocation6_spill] sm:$0xff] }
 0x1cb   : > { %v2234_v31 = vpop.f32.mrf.mxu1  ;;  %v4529_v20 = vpop.f32.mrf.mxu0  ;;  %v7390_v27 = vld [vmem:[#allocation55_spill] sm:$0xff]  ;;  %v7394_v50 = vld [vmem:[#allocation10_spill] sm:$0xff] }
 0x1cc   : > { %v2993_v44 = vadd.f32 %v6212_v14, %v2957_v3  ;;  %v2955_v38 = vmul.f32 %v5931_v53, %v2538_v9  ;;  %v2541_v10 = vadd.f32 %v4529_v20, %v2332_v22  ;;  %v2333_v11 = vadd.f32 %v7390_v27, %v2121_v55  ;;  %v6298_v55 = vpop.permute.xlu0 %2902  ;;  %v7395_v9 = vld [vmem:[#allocation26_spill] sm:$0xff]  ;;  %v6313_v24 = vpop.permute.xlu1 %3120  ;;  %v7403_v27 = vld [vmem:[#allocation13_spill] sm:$0xff] }
 0x1cd   : > { %v4503_v13 = vpop.f32.mrf.mxu1  ;;  %v2414_v33 = vpop.f32.mrf.mxu0  ;;  %v2339_v15 = vadd.f32 %v4502_v23, %v7395_v9  ;;  %v6301_v34 = vadd.f32 %v2234_v31, %v2125_v46  ;;  %v7400_v31 = vld [vmem:[#allocation30_spill] sm:$0xff] }
 0x1ce   : > { %v2991_v53 = vadd.f32 %v6212_v14, %v2955_v38  ;;  %v2958_v47 = vmul.f32 %v7387_v32, %v2541_v10  ;;  %v2539_v45 = vadd.f32 %v2414_v33, %v2330_v43  ;;  %v6289_v7 = vmul.f32 %v7392_v57, %v2993_v44  ;;  %v7397_v43 = vld [vmem:[#allocation11_spill] sm:$0xff] }
 0x1cf   : > { %v2237_v62 = vpop.f32.mrf.mxu1  ;;  %v4532_v29 = vpop.f32.mrf.mxu0  ;;  %v6304_v20 = vadd.f32 %v4503_v13, %v7396_v4 }
 0x1d0   : > { %v6292_v6 = vmul.f32 %v7393_v35, %v2991_v53  ;;  %v2994_v28 = vadd.f32 %v6212_v14, %v2958_v47  ;;  %v2956_v48 = vmul.f32 %v7394_v50, %v2539_v45  ;;  %v2544_v22 = vadd.f32 %v4532_v29, %v2335_v37  ;;  %v7401_v53 = vld [vmem:[#allocation7_spill] sm:$0xff]  ;;  %v7404_v35 = vld [vmem:[#allocation17_spill] sm:$0xff] }
 0x1d1   : > { %v4506_v2 = vpop.f32.mrf.mxu1  ;;  %v2427_v3 = vpop.f32.mrf.mxu0  ;;  %v6309_v26 = vadd.f32 %v2237_v62, %v2126_v51  ;;  %v3219_v46 = vsel %vm3215_vm7, %v6289_v7, 0.0  ;;  %v3287_v23 = vmul.f32 %v6289_v7, %v6289_v7  ;;  %v7402_v62 = vld [vmem:[#allocation12_spill] sm:$0xff] }
 0x1d2   : > { %v6307_v44 = vmul.f32 %v7397_v43, %v2994_v28  ;;  %v2992_v41 = vadd.f32 %v6212_v14, %v2956_v48  ;;  %v2961_v10 = vmul.f32 %v7399_v56, %v2544_v22  ;;  %v2542_v61 = vadd.f32 %v2427_v3, %v2333_v11  ;;  %v6342_v48 = vpop.permute.xlu0 %2907 }
 0x1d3   : > { %v2250_v38 = vpop.f32.mrf.mxu1  ;;  %v4533_v49 = vpop.f32.mrf.mxu0  ;;  %v6320_v13 = vadd.f32 %v4506_v2, %v7400_v31  ;;  %v3285_v54 = vmul.f32 %v6292_v6, %v6292_v6  ;;  %v3216_v37 = vsel %vm3215_vm7, %v6292_v6, 0.0  ;;  %v3320_v22 = vsel %vm3215_vm7, %v3287_v23, 0.0 }
 0x1d4   : > { %7398 = vst [vmem:[#allocation44_spill] sm:$0xff] %v6307_v44  ;;  %v2545_v51 = vadd.f32 %v4533_v49, %v2336_v30  ;;  %v6325_v32 = vmul.f32 %v7401_v53, %v2992_v41  ;;  %v2997_v47 = vadd.f32 %v6212_v14, %v2961_v10  ;;  %v2959_v45 = vmul.f32 %v7402_v62, %v2542_v61  ;;  %v7407_v10 = vld [vmem:[#allocation4_spill] sm:$0xff] }
 0x1d5   : > { %v4507_v33 = vpop.f32.mrf.mxu1  ;;  %v2430_v52 = vpop.f32.mrf.mxu0  ;;  %v3288_v5 = vmul.f32 %v6307_v44, %v6307_v44  ;;  %v6346_v9 = vadd.f32 %v2250_v38, %v6238_v25  ;;  %v3317_v41 = vsel %vm3215_vm7, %v3285_v54, 0.0  ;;  %v3221_v54 = vsel %vm3215_vm7, %v6307_v44, 0.0 }
 0x1d6   : > { %v2962_v11 = vmul.f32 %v7403_v27, %v2545_v51  ;;  %v2543_v19 = vadd.f32 %v2430_v52, %v2334_v42  ;;  %v3217_v30 = vsel %vm3215_vm7, %v6325_v32, 0.0  ;;  %v3286_v57 = vmul.f32 %v6325_v32, %v6325_v32  ;;  %v7406_v42 = vld [vmem:[#allocation5_spill] sm:$0xff]  ;;  %v6357_v51 = vpop.permute.xlu1 %3125  ;;  %v7409_v52 = vld [vmem:[#allocation34_spill] sm:$0xff] }
 0x1d7   : > { %v2253_v29 = vpop.f32.mrf.mxu1  ;;  %v6339_v28 = vmul.f32 %v7404_v35, %v2997_v47  ;;  %v2995_v2 = vadd.f32 %v6212_v14, %v2959_v45  ;;  %v4536_v50 = vpop.f32.mrf.mxu0  ;;  %v3218_v3 = vadd.f32 %v3217_v30, %v3216_v37  ;;  %v3322_v62 = vsel %vm3215_vm7, %v3288_v5, 0.0  ;;  %v7410_v5 = vld [vmem:[#allocation19_spill] sm:$0xff] }
 0x1d8   : > { %v2960_v4 = vmul.f32 %v7406_v42, %v2543_v19  ;;  %v3318_v56 = vsel %vm3215_vm7, %v3286_v57, 0.0  ;;  %v2998_v49 = vadd.f32 %v6212_v14, %v2962_v11  ;;  %v6370_v37 = vadd.f32 %v4507_v33, %v7409_v52 }
 0x1d9   : > { %7405 = vst [vmem:[#allocation47_spill] sm:$0xff] %v6339_v28  ;;  %v6349_v43 = vpop.f32.mrf.mxu1  ;;  %v6354_v61 = vmul.f32 %v7407_v10, %v2995_v2  ;;  %v2443_v31 = vpop.f32.mrf.mxu0  ;;  %v3220_v23 = vadd.f32 %v3219_v46, %v3218_v3  ;;  %v3319_v53 = vadd.f32 %v3318_v56, %v3317_v41  ;;  %v3291_v25 = vmul.f32 %v6339_v28, %v6339_v28  ;;  %v7412_v3 = vld [vmem:[#allocation9_spill] sm:$0xff] }
 0x1da   : > { %v2996_v38 = vadd.f32 %v6212_v14, %v2960_v4  ;;  %v3227_v11 = vsel %vm3215_vm7, %v6339_v28, 0.0  ;;  %v6375_v30 = vadd.f32 %v2253_v29, %v6241_v58  ;;  %v6380_v2 = vmul.f32 %v7410_v5, %v2998_v49 }
 0x1db   : > { %7408 = vst [vmem:[#allocation15_spill] sm:$0xff] %v6354_v61  ;;  %v6362_v47 = vpop.f32.mrf.mxu1  ;;  %v3289_v45 = vmul.f32 %v6354_v61, %v6354_v61  ;;  %v4537_v46 = vpop.f32.mrf.mxu0  ;;  %v3321_v27 = vadd.f32 %v3320_v22, %v3319_v53  ;;  %v3222_v19 = vadd.f32 %v3221_v54, %v3220_v23  ;;  %v3223_v35 = vsel %vm3215_vm7, %v6354_v61, 0.0 }
 0x1dc   : > { %7411 = vst [vmem:[#allocation21_spill] sm:$0xff] %v6380_v2  ;;  %v6383_v42 = vmul.f32 %v7412_v3, %v2996_v38  ;;  %v2548_v33 = vadd.f32 %v4536_v50, %v2339_v15  ;;  %v6385_v22 = vpop.permute.xlu0 %2912  ;;  %v3328_v41 = vsel %vm3215_vm7, %v3291_v25, 0.0  ;;  %v2546_v58 = vadd.f32 %v2443_v31, %v6301_v34  ;;  %v7414_v38 = vld [vmem:[#allocation20_spill] sm:$0xff]  ;;  %v6395_v54 = vpop.permute.xlu1 %3130 }
 0x1dd   : > { %v4511_v57 = vpop.f32.mrf.mxu1  ;;  %v2446_v4 = vpop.f32.mrf.mxu0  ;;  %v3224_v56 = vadd.f32 %v3223_v35, %v3222_v19  ;;  %v3323_v10 = vadd.f32 %v3322_v62, %v3321_v27  ;;  %v3324_v23 = vsel %vm3215_vm7, %v3289_v45, 0.0  ;;  %v7415_v19 = vld [vmem:[#allocation16_spill] sm:$0xff]  ;;  %v2549_v34 = vadd.f32 %v4537_v46, %v6304_v20  ;;  %v7417_v46 = vld [vmem:[#allocation29_spill] sm:$0xff] }
 0x1de   : > { %7413 = vst [vmem:[#allocation53_spill] sm:$0xff] %v6383_v42  ;;  %v3225_v49 = vsel %vm3215_vm7, %v6383_v42, 0.0  ;;  %v3290_v53 = vmul.f32 %v6383_v42, %v6383_v42  ;;  %v2965_v15 = vmul.f32 %v7414_v38, %v2548_v33  ;;  %v2963_v62 = vmul.f32 %v7415_v19, %v2546_v58  ;;  %v7419_v19 = vld [vmem:[#allocation18_spill] sm:$0xff] }
 0x1df   : > { %v2269_v29 = vpop.f32.mrf.mxu1  ;;  %v4540_v50 = vpop.f32.mrf.mxu0  ;;  %v3325_v52 = vadd.f32 %v3324_v23, %v3323_v10  ;;  %v3226_v25 = vadd.f32 %v3225_v49, %v3224_v56  ;;  %v3292_v45 = vmul.f32 %v6380_v2, %v6380_v2  ;;  %v2547_v5 = vadd.f32 %v2446_v4, %v6309_v26  ;;  %v7416_v56 = vld [vmem:[#allocation24_spill] sm:$0xff]  ;;  %v7420_v4 = vld [vmem:[#allocation22_spill] sm:$0xff] }
 0x1e0   : > { %v3326_v27 = vsel %vm3215_vm7, %v3290_v53, 0.0  ;;  %v3001_v35 = vadd.f32 %v6212_v14, %v2965_v15  ;;  %v2999_v10 = vadd.f32 %v6212_v14, %v2963_v62  ;;  %v2966_v23 = vmul.f32 %v7416_v56, %v2549_v34  ;;  %v6413_v26 = vpop.permute.xlu0 %2917  ;;  %v7422_v56 = vld [vmem:[#allocation36_spill] sm:$0xff] }
 0x1e1   : > { %v4514_v31 = vpop.f32.mrf.mxu1  ;;  %v2459_v3 = vpop.f32.mrf.mxu0  ;;  %v3228_v33 = vadd.f32 %v3227_v11, %v3226_v25  ;;  %v3327_v38 = vadd.f32 %v3326_v27, %v3325_v52  ;;  %v3229_v20 = vsel %vm3215_vm7, %v6380_v2, 0.0  ;;  %v2964_v53 = vmul.f32 %v7419_v19, %v2547_v5 }
 0x1e2   : > { %v6409_v49 = vmul.f32 %v7417_v46, %v3001_v35  ;;  %v2552_v15 = vadd.f32 %v4540_v50, %v6320_v13  ;;  %v6416_v52 = vmul.f32 %v7420_v4, %v2999_v10  ;;  %v3002_v62 = vadd.f32 %v6212_v14, %v2966_v23  ;;  %v7423_v46 = vld [vmem:[#allocation35_spill] sm:$0xff]  ;;  %v6424_v19 = vpop.permute.xlu1 %3135  ;;  %v7424_v10 = vld [vmem:[#allocation33_spill] sm:$0xff] }
 0x1e3   : > { %v2282_v58 = vpop.f32.mrf.mxu1  ;;  %v4541_v28 = vpop.f32.mrf.mxu0  ;;  %v3329_v11 = vadd.f32 %v3328_v41, %v3327_v38  ;;  %v3230_v25 = vadd.f32 %v3229_v20, %v3228_v33  ;;  %v3330_v27 = vsel %vm3215_vm7, %v3292_v45, 0.0  ;;  %v2347_v35 = vadd.f32 %v6349_v43, %v7422_v56 }
 0x1e4   : > { %7418 = vst [vmem:[#allocation55_spill] sm:$0xff] %v6409_v49  ;;  %7421 = vst [vmem:[#allocation23_spill] sm:$0xff] %v6416_v52  ;;  %v3000_v5 = vadd.f32 %v6212_v14, %v2964_v53  ;;  %v2969_v13 = vmul.f32 %v7423_v46, %v2552_v15  ;;  %v3231_v41 = vsel %vm3215_vm7, %v6416_v52, 0.0  ;;  %v3293_v33 = vmul.f32 %v6416_v52, %v6416_v52  ;;  %v7426_v53 = vld [vmem:[#allocation25_spill] sm:$0xff] }
 0x1e5   : > { %v4515_v34 = vpop.f32.mrf.mxu1  ;;  %v2462_v50 = vpop.f32.mrf.mxu0  ;;  %v3331_v38 = vadd.f32 %v3330_v27, %v3329_v11  ;;  %v6431_v23 = vmul.f32 %v7424_v10, %v3002_v62  ;;  %v3295_v43 = vmul.f32 %v6409_v49, %v6409_v49  ;;  %v3232_v20 = vadd.f32 %v3231_v41, %v3230_v25  ;;  %v7428_v27 = vld [vmem:[#allocation38_spill] sm:$0xff] }
 0x1e6   : > { %v6438_v15 = vmul.f32 %v7426_v53, %v3000_v5  ;;  %v3005_v4 = vadd.f32 %v6212_v14, %v2969_v13  ;;  %v2345_v46 = vadd.f32 %v6362_v47, %v6250_v18  ;;  %v3332_v11 = vsel %vm3215_vm7, %v3293_v33, 0.0  ;;  %v6454_v18 = vpop.permute.xlu0 %2922  ;;  %v7429_v33 = vld [vmem:[#allocation41_spill] sm:$0xff]  ;;  %v6468_v61 = vpop.permute.xlu1 %3140 }
 0x1e7   : > { %7425 = vst [vmem:[#allocation8_spill] sm:$0xff] %v6431_v23  ;;  %v6433_v45 = vpop.f32.mrf.mxu1  ;;  %v4544_v56 = vpop.f32.mrf.mxu0  ;;  %v2348_v62 = vadd.f32 %v4511_v57, %v7428_v27  ;;  %v6446_v10 = vadd.f32 %v2269_v29, %v6255_v0  ;;  %v3333_v52 = vadd.f32 %v3332_v11, %v3331_v38  ;;  %v3296_v25 = vmul.f32 %v6431_v23, %v6431_v23  ;;  %v7430_v0 = vld [vmem:[#allocation45_spill] sm:$0xff] }
 0x1e8   : > { %7427 = vst [vmem:[#allocation6_spill] sm:$0xff] %v6438_v15  ;;  %v3233_v5 = vsel %vm3215_vm7, %v6438_v15, 0.0  ;;  %v3294_v13 = vmul.f32 %v6438_v15, %v6438_v15  ;;  %v6457_v57 = vadd.f32 %v4514_v31, %v7429_v33  ;;  %v6460_v29 = vmul.f32 %v7430_v0, %v3005_v4 }
 0x1e9   : > { %v4518_v41 = vpop.f32.mrf.mxu1  ;;  %v2475_v53 = vpop.f32.mrf.mxu0  ;;  %v3234_v47 = vadd.f32 %v3233_v5, %v3232_v20  ;;  %v2550_v38 = vadd.f32 %v2459_v3, %v6346_v9  ;;  %v3235_v11 = vsel %vm3215_vm7, %v6409_v49, 0.0  ;;  %v3336_v27 = vsel %vm3215_vm7, %v3295_v43, 0.0  ;;  %v7432_v5 = vld [vmem:[#allocation27_spill] sm:$0xff] }
 0x1ea   : > { %7431 = vst [vmem:[#allocation10_spill] sm:$0xff] %v6460_v29  ;;  %v3334_v15 = vsel %vm3215_vm7, %v3294_v13, 0.0  ;;  %v2553_v2 = vadd.f32 %v4541_v28, %v6370_v37  ;;  %v3237_v31 = vsel %vm3215_vm7, %v6431_v23, 0.0  ;;  %v3338_v9 = vsel %vm3215_vm7, %v3296_v25, 0.0  ;;  %v7433_v43 = vld [vmem:[#allocation39_spill] sm:$0xff] }
 0x1eb   : > { %v4545_v42 = vpop.f32.mrf.mxu0  ;;  %v3236_v20 = vadd.f32 %v3235_v11, %v3234_v47  ;;  %v3335_v4 = vadd.f32 %v3334_v15, %v3333_v52  ;;  %v2967_v33 = vmul.f32 %v7432_v5, %v2550_v38  ;;  %v6475_v3 = vadd.f32 %v2282_v58, %v6264_v17  ;;  %v2298_v28 = vpop.f32.mrf.mxu1  ;;  %v7434_v25 = vld [vmem:[#allocation31_spill] sm:$0xff] }
 0x1ec   : > { %v2970_v0 = vmul.f32 %v7433_v43, %v2553_v2  ;;  %v2551_v13 = vadd.f32 %v2462_v50, %v6375_v30  ;;  %v3299_v44 = vmul.f32 %v6460_v29, %v6460_v29  ;;  %v2556_v52 = vadd.f32 %v4544_v56, %v2347_v35  ;;  %v6484_v5 = vpop.permute.xlu0 %2927  ;;  %v7435_v2 = vld [vmem:[#allocation37_spill] sm:$0xff]  ;;  %v7437_v43 = vld [vmem:[#allocation51_spill] sm:$0xff] }
 0x1ed   : > { %v2478_v37 = vpop.f32.mrf.mxu0  ;;  %v3337_v49 = vadd.f32 %v3336_v27, %v3335_v4  ;;  %v3003_v47 = vadd.f32 %v6212_v14, %v2967_v33  ;;  %v3238_v15 = vadd.f32 %v3237_v31, %v3236_v20  ;;  %v2554_v17 = vadd.f32 %v2475_v53, %v2345_v46  ;;  %v7436_v27 = vld [vmem:[#allocation43_spill] sm:$0xff]  ;;  %v7438_v33 = vld [vmem:[#allocation49_spill] sm:$0xff]  ;;  %v7439_v31 = vld [vmem:[#allocation42_spill] sm:$0xff]  ;;  %v4519_v46 = vpop.f32.mrf.mxu1 }
 0x1ee   : > { %v3006_v38 = vadd.f32 %v6212_v14, %v2970_v0  ;;  %v2968_v11 = vmul.f32 %v7434_v25, %v2551_v13  ;;  %v6490_v4 = vadd.f32 %v4515_v34, %v7436_v27  ;;  %v2973_v23 = vmul.f32 %v7437_v43, %v2556_v52  ;;  %v6498_v13 = vpop.permute.xlu1 %3145 }
 0x1ef   : > { %v4548_v58 = vpop.f32.mrf.mxu0  ;;  %v6487_v30 = vmul.f32 %v7435_v2, %v3003_v47  ;;  %v3339_v50 = vadd.f32 %v3338_v9, %v3337_v49  ;;  %v2971_v20 = vmul.f32 %v7439_v31, %v2554_v17  ;;  %v2557_v53 = vadd.f32 %v4545_v42, %v2348_v62  ;;  %v7440_v62 = vld [vmem:[#allocation40_spill] sm:$0xff]  ;;  %v7442_v2 = vld [vmem:[#allocation46_spill] sm:$0xff] }
 0x1f0   : > { %v6494_v35 = vmul.f32 %v7438_v33, %v3006_v38  ;;  %v3004_v56 = vadd.f32 %v6212_v14, %v2968_v11  ;;  %v3243_v49 = vsel %vm3215_vm7, %v6460_v29, 0.0  ;;  %v3009_v47 = vadd.f32 %v6212_v14, %v2973_v23 }
 0x1f1   : > { %v2491_v0 = vpop.f32.mrf.mxu0  ;;  %v3239_v34 = vsel %vm3215_vm7, %v6487_v30, 0.0  ;;  %v3297_v9 = vmul.f32 %v6487_v30, %v6487_v30  ;;  %v3344_v52 = vsel %vm3215_vm7, %v3299_v44, 0.0  ;;  %v2350_v42 = vadd.f32 %v6433_v45, %v6269_v60  ;;  %v2301_v45 = vpop.f32.mrf.mxu1 }
 0x1f2   : > { %v3240_v38 = vadd.f32 %v3239_v34, %v3238_v15  ;;  %v6511_v25 = vmul.f32 %v7440_v62, %v3004_v56  ;;  %v2355_v27 = vadd.f32 %v4518_v41, %v7442_v2  ;;  %v3007_v43 = vadd.f32 %v6212_v14, %v2971_v20  ;;  %v6523_v56 = vpop.permute.xlu0 %2932 }
 0x1f3   : > { %v4549_v11 = vpop.f32.mrf.mxu0  ;;  %v3340_v17 = vsel %vm3215_vm7, %v3297_v9, 0.0  ;;  %v2974_v33 = vmul.f32 %v6214_v40, %v2557_v53  ;;  %v3300_v44 = vmul.f32 %v6494_v35, %v6494_v35  ;;  %v6526_v41 = vmul.f32 %v6271_v59, %v3009_v47  ;;  %v7444_v9 = vld [vmem:[#allocation50_spill] sm:$0xff] }
 0x1f4   : > { %7441 = vst [vmem:[#allocation26_spill] sm:$0xff] %v6511_v25  ;;  %v3341_v31 = vadd.f32 %v3340_v17, %v3339_v50  ;;  %v3241_v23 = vsel %vm3215_vm7, %v6511_v25, 0.0  ;;  %v3298_v60 = vmul.f32 %v6511_v25, %v6511_v25  ;;  %v2353_v40 = vadd.f32 %v2298_v28, %v6274_v16  ;;  %v7443_v50 = vld [vmem:[#allocation54_spill] sm:$0xff]  ;;  %v6538_v25 = vpop.permute.xlu1 %3150 }
 0x1f5   : > { %v2494_v15 = vpop.f32.mrf.mxu0  ;;  %v3242_v34 = vadd.f32 %v3241_v23, %v3240_v38  ;;  %v6530_v20 = vmul.f32 %v7443_v50, %v3007_v43  ;;  %v6534_v62 = vadd.f32 %v4519_v46, %v7444_v9  ;;  %v3010_v17 = vadd.f32 %v6212_v14, %v2974_v33  ;;  %v7445_v43 = vld [vmem:[#allocation48_spill] sm:$0xff] }
 0x1f6   : > { %v3342_v53 = vsel %vm3215_vm7, %v3298_v60, 0.0  ;;  %v2555_v2 = vadd.f32 %v2478_v37, %v6446_v10  ;;  %v3245_v59 = vsel %vm3215_vm7, %v6494_v35, 0.0  ;;  %v6543_v28 = vadd.f32 %v2301_v45, %v6279_v39 }
 0x1f7   : > { %v4552_v29 = vpop.f32.mrf.mxu0  ;;  %v3244_v47 = vadd.f32 %v3243_v49, %v3242_v34  ;;  %v3343_v16 = vadd.f32 %v3342_v53, %v3341_v31  ;;  %v3346_v38 = vsel %vm3215_vm7, %v3300_v44, 0.0  ;;  %v3301_v46 = vmul.f32 %v6530_v20, %v6530_v20  ;;  %v4522_v49 = vpop.f32.mrf.mxu1 }
 0x1f8   : > { %v2972_v33 = vmul.f32 %v7445_v43, %v2555_v2  ;;  %v2560_v10 = vadd.f32 %v4548_v58, %v6457_v57  ;;  %v3303_v60 = vmul.f32 %v6526_v41, %v6526_v41  ;;  %v2558_v31 = vadd.f32 %v2491_v0, %v6475_v3 }
 0x1f9   : > { %v2507_v37 = vpop.f32.mrf.mxu0  ;;  %v3345_v23 = vadd.f32 %v3344_v52, %v3343_v16  ;;  %v3246_v50 = vadd.f32 %v3245_v59, %v3244_v47  ;;  %v3251_v39 = vsel %vm3215_vm7, %v6526_v41, 0.0  ;;  %v3247_v44 = vsel %vm3215_vm7, %v6530_v20, 0.0  ;;  %v6561_v52 = vpop.permute.xlu0 %2937  ;;  %v7446_v59 = vld [vmem:[#allocation52_spill] sm:$0xff] }
 0x1fa   : > { %v6558_v45 = vmul.f32 %v6313_v24, %v3010_v17  ;;  %v3008_v57 = vadd.f32 %v6212_v14, %v2972_v33  ;;  %v2977_v9 = vmul.f32 %v6342_v48, %v2560_v10  ;;  %v2975_v3 = vmul.f32 %v6257_v8, %v2558_v31  ;;  %v6571_v17 = vpop.permute.xlu1 %3155 }
 0x1fb   : > { %v4553_v58 = vpop.f32.mrf.mxu0  ;;  %v3248_v34 = vadd.f32 %v3247_v44, %v3246_v50  ;;  %v3347_v53 = vadd.f32 %v3346_v38, %v3345_v23  ;;  %v3348_v0 = vsel %vm3215_vm7, %v3301_v46, 0.0  ;;  %v2359_v47 = vadd.f32 %v4522_v49, %v7446_v59  ;;  %v2314_v46 = vpop.f32.mrf.mxu1 }
 0x1fc   : > { %v6567_v2 = vmul.f32 %v6227_v36, %v3008_v57  ;;  %v2561_v24 = vadd.f32 %v4549_v11, %v6490_v4  ;;  %v3352_v16 = vsel %vm3215_vm7, %v3303_v60, 0.0  ;;  %v3013_v38 = vadd.f32 %v6212_v14, %v2977_v9 }
 0x1fd   : > { %v3349_v43 = vadd.f32 %v3348_v0, %v3347_v53  ;;  %v3011_v48 = vadd.f32 %v6212_v14, %v2975_v3  ;;  %v2510_v33 = vpop.f32.mrf.mxu0  ;;  %v2559_v4 = vadd.f32 %v2494_v15, %v2350_v42  ;;  %v3304_v11 = vmul.f32 %v6558_v45, %v6558_v45  ;;  %v6592_v53 = vpop.permute.xlu0 %2942 }
 0x1fe   : > { %v3249_v8 = vsel %vm3215_vm7, %v6567_v2, 0.0  ;;  %v3302_v36 = vmul.f32 %v6567_v2, %v6567_v2  ;;  %v2978_v10 = vmul.f32 %v6385_v22, %v2561_v24  ;;  %v2564_v50 = vadd.f32 %v4552_v29, %v2355_v27 }
 0x1ff   : > { %v3250_v23 = vadd.f32 %v3249_v8, %v3248_v34  ;;  %v6584_v60 = vmul.f32 %v6357_v51, %v3011_v48  ;;  %v6588_v31 = vmul.f32 %v6424_v19, %v3013_v38  ;;  %v2976_v57 = vmul.f32 %v6298_v55, %v2559_v4  ;;  %v4556_v9 = vpop.f32.mrf.mxu0  ;;  %v3161_v55 = vpop.permute.xlu1 %3160 }
 0x200   : > { %v3350_v49 = vsel %vm3215_vm7, %v3302_v36, 0.0  ;;  %v3014_v44 = vadd.f32 %v6212_v14, %v2978_v10  ;;  %v2357_v15 = vadd.f32 %v2314_v46, %v6284_v63  ;;  %v2562_v34 = vadd.f32 %v2507_v37, %v2353_v40  ;;  %v4523_v4 = vpop.f32.mrf.mxu1 }
 0x201   : > { %v3252_v22 = vadd.f32 %v3251_v39, %v3250_v23  ;;  %v3351_v42 = vadd.f32 %v3350_v49, %v3349_v43  ;;  %v3253_v51 = vsel %vm3215_vm7, %v6558_v45, 0.0  ;;  %v3305_v29 = vmul.f32 %v6584_v60, %v6584_v60  ;;  %v2523_v48 = vpop.f32.mrf.mxu0 }
 0x202   : > { %v6600_v19 = vmul.f32 %v6468_v61, %v3014_v44  ;;  %v3012_v27 = vadd.f32 %v6212_v14, %v2976_v57  ;;  %v3354_v3 = vsel %vm3215_vm7, %v3304_v11, 0.0  ;;  %v2981_v63 = vmul.f32 %v6484_v5, %v2564_v50 }
 0x203   : > { %v3353_v39 = vadd.f32 %v3352_v16, %v3351_v42  ;;  %v3254_v0 = vadd.f32 %v3253_v51, %v3252_v22  ;;  %v3259_v40 = vsel %vm3215_vm7, %v6588_v31, 0.0  ;;  %v3307_v37 = vmul.f32 %v6588_v31, %v6588_v31  ;;  %v3166_v22 = vpop.permute.xlu1 %3165  ;;  %v4557_v51 = vpop.f32.mrf.mxu0 }
 0x204   : > { %v3255_v59 = vsel %vm3215_vm7, %v6584_v60, 0.0  ;;  %v6612_v61 = vmul.f32 %v6395_v54, %v3012_v27  ;;  %v3356_v38 = vsel %vm3215_vm7, %v3305_v29, 0.0  ;;  %v2979_v16 = vmul.f32 %v6413_v26, %v2562_v34  ;;  %v2948_v54 = vpop.permute.xlu0 %2947 }
 0x205   : > { %v3256_v24 = vadd.f32 %v3255_v59, %v3254_v0  ;;  %v3355_v43 = vadd.f32 %v3354_v3, %v3353_v39  ;;  %v3308_v5 = vmul.f32 %v6600_v19, %v6600_v19  ;;  %v2565_v46 = vadd.f32 %v4553_v58, %v6534_v62 }
 0x206   : > { %v3257_v8 = vsel %vm3215_vm7, %v6612_v61, 0.0  ;;  %v3306_v36 = vmul.f32 %v6612_v61, %v6612_v61  ;;  %v3017_v23 = vadd.f32 %v6212_v14, %v2981_v63  ;;  %v3015_v26 = vadd.f32 %v6212_v14, %v2979_v16 }
 0x207   : > { %v3357_v10 = vadd.f32 %v3356_v38, %v3355_v43  ;;  %v3258_v11 = vadd.f32 %v3257_v8, %v3256_v24  ;;  %v2982_v49 = vmul.f32 %v6523_v56, %v2565_v46  ;;  %v2563_v44 = vadd.f32 %v2510_v33, %v6543_v28  ;;  %v2317_v28 = vpop.f32.mrf.mxu1 }
 0x208   : > { %v3358_v50 = vsel %vm3215_vm7, %v3306_v36, 0.0  ;;  %v2568_v57 = vadd.f32 %v4556_v9, %v2359_v47  ;;  %v3360_v42 = vsel %vm3215_vm7, %v3307_v37, 0.0  ;;  %v3261_v62 = vsel %vm3215_vm7, %v6600_v19, 0.0  ;;  %v2953_v37 = vpop.permute.xlu0 %2952 }
 0x209   : > { %v3260_v58 = vadd.f32 %v3259_v40, %v3258_v11  ;;  %v3359_v34 = vadd.f32 %v3358_v50, %v3357_v10  ;;  %v3362_v29 = vsel %vm3215_vm7, %v3308_v5, 0.0  ;;  %v6633_v27 = vmul.f32 %v6498_v13, %v3015_v26  ;;  %v3171_v5 = vpop.permute.xlu1 %3170 }
 0x20a   : > { %v3018_v3 = vadd.f32 %v6212_v14, %v2982_v49  ;;  %v2980_v56 = vmul.f32 %v6454_v18, %v2563_v44  ;;  %v6638_v33 = vmul.f32 %v6571_v17, %v3017_v23  ;;  %v2566_v39 = vadd.f32 %v2523_v48, %v2357_v15  ;;  %v2526_v17 = vpop.f32.mrf.mxu0 }
 0x20b   : > { %v3361_v47 = vadd.f32 %v3360_v42, %v3359_v34  ;;  %v3262_v9 = vadd.f32 %v3261_v62, %v3260_v58  ;;  %v3263_v0 = vsel %vm3215_vm7, %v6633_v27, 0.0  ;;  %v3309_v63 = vmul.f32 %v6633_v27, %v6633_v27 }
 0x20c   : > { %v3016_v13 = vadd.f32 %v6212_v14, %v2980_v56  ;;  %v2985_v40 = vmul.f32 %v2948_v54, %v2568_v57  ;;  %v2360_v59 = vadd.f32 %v4523_v4, %v6204_v12  ;;  %v2983_v43 = vmul.f32 %v6561_v52, %v2566_v39  ;;  %v3176_v49 = vpop.permute.xlu0 %3175 }
 0x20d   : > { %v3264_v18 = vadd.f32 %v3263_v0, %v3262_v9  ;;  %v3363_v24 = vadd.f32 %v3362_v29, %v3361_v47  ;;  %v2358_v38 = vadd.f32 %v2317_v28, %v6295_v21  ;;  %v3364_v15 = vsel %vm3215_vm7, %v3309_v63, 0.0  ;;  %v3181_v29 = vpop.permute.xlu1 %3180 }
 0x20e   : > { %v6649_v16 = vmul.f32 %v3161_v55, %v3018_v3  ;;  %v6652_v48 = vmul.f32 %v6538_v25, %v3016_v13  ;;  %v3311_v8 = vmul.f32 %v6638_v33, %v6638_v33  ;;  %v3019_v12 = vadd.f32 %v6212_v14, %v2983_v43 }
 0x20f   : > { %v3365_v36 = vadd.f32 %v3364_v15, %v3363_v24  ;;  %v2569_v46 = vadd.f32 %v4557_v51, %v2360_v59  ;;  %v3021_v55 = vadd.f32 %v6212_v14, %v2985_v40  ;;  %v2567_v54 = vadd.f32 %v2526_v17, %v2358_v38 }
 0x210   : > { %v3265_v52 = vsel %vm3215_vm7, %v6652_v48, 0.0  ;;  %v3310_v21 = vmul.f32 %v6652_v48, %v6652_v48  ;;  %v3267_v25 = vsel %vm3215_vm7, %v6638_v33, 0.0  ;;  %v6664_v4 = vmul.f32 %v3166_v22, %v3019_v12 }
 0x211   : > { %v3266_v10 = vadd.f32 %v3265_v52, %v3264_v18  ;;  %v3312_v11 = vmul.f32 %v6649_v16, %v6649_v16  ;;  %v2986_v26 = vmul.f32 %v2953_v37, %v2569_v46  ;;  %v2984_v50 = vmul.f32 %v6592_v53, %v2567_v54 }
 0x212   : > { %v3366_v23 = vsel %vm3215_vm7, %v3310_v21, 0.0  ;;  %v3368_v44 = vsel %vm3215_vm7, %v3311_v8, 0.0  ;;  %v3269_v57 = vsel %vm3215_vm7, %v6649_v16, 0.0  ;;  %v6673_v58 = vmul.f32 %v3176_v49, %v3021_v55 }
 0x213   : > { %v3268_v42 = vadd.f32 %v3267_v25, %v3266_v10  ;;  %v3367_v62 = vadd.f32 %v3366_v23, %v3365_v36  ;;  %v3313_v22 = vmul.f32 %v6664_v4, %v6664_v4  ;;  %v3022_v34 = vadd.f32 %v6212_v14, %v2986_v26 }
 0x214   : > { %v3020_v51 = vadd.f32 %v6212_v14, %v2984_v50  ;;  %v3370_v56 = vsel %vm3215_vm7, %v3312_v11, 0.0  ;;  %v3271_v28 = vsel %vm3215_vm7, %v6664_v4, 0.0  ;;  %v3315_v63 = vmul.f32 %v6673_v58, %v6673_v58 }
 0x215   : > { %v3369_v3 = vadd.f32 %v3368_v44, %v3367_v62  ;;  %v3270_v53 = vadd.f32 %v3269_v57, %v3268_v42  ;;  %v6682_v47 = vmul.f32 %v3181_v29, %v3022_v34  ;;  %v3372_v13 = vsel %vm3215_vm7, %v3313_v22, 0.0  ;;  %v7463_v57 = vld [vmem:[#allocation10_spill] sm:$0xff] }
 0x216   : > { %v6684_v9 = vmul.f32 %v3171_v5, %v3020_v51  ;;  %v3275_v18 = vsel %vm3215_vm7, %v6673_v58, 0.0  ;;  %v3376_v15 = vsel %vm3215_vm7, %v3315_v63, 0.0  ;;  %v7447_v44 = vmov 1.0   ;;  %v7451_v63 = vld [vmem:[#allocation3_spill] sm:$0xff] }
 0x217   : > { %v3272_v39 = vadd.f32 %v3271_v28, %v3270_v53  ;;  %v3371_v0 = vadd.f32 %v3370_v56, %v3369_v3  ;;  %v3316_v24 = vmul.f32 %v6682_v47, %v6682_v47  ;;  %v3277_v5 = vsel %vm3215_vm7, %v6682_v47, 0.0 }
 0x218   : > { %v3273_v14 = vsel %vm3215_vm7, %v6684_v9, 0.0  ;;  %v3314_v40 = vmul.f32 %v6684_v9, %v6684_v9  ;;  %v7449_v42 = vmov 0.0  }
 0x219   : > { %v3373_v37 = vadd.f32 %v3372_v13, %v3371_v0  ;;  %v3274_v59 = vadd.f32 %v3273_v14, %v3272_v39  ;;  %v3378_v12 = vsel %vm3215_vm7, %v3316_v24, 0.0  ;;  %v3636_v13 = vsub.s32 1, %v7451_v63 }
 0x21a   : > { %v3374_v43 = vsel %vm3215_vm7, %v3314_v40, 0.0  ;;  %v3672_v14 = vsub.s32 2, %v7451_v63 }
 0x21b   : > { %v3276_v17 = vadd.f32 %v3275_v18, %v3274_v59  ;;  %v3375_v38 = vadd.f32 %v3374_v43, %v3373_v37  ;;  %v7452_v37 = vld [vmem:[#allocation56_spill] sm:$0xff] }
 0x21c   : > { %v6719_v59 = vrot.slane %v7452_v37, %v3636_v13  ;;  %v6722_v18 = vrot.slane %v7452_v37, %v3672_v14 }
 0x21d   : > { %v3278_v8 = vadd.f32 %v3277_v5, %v3276_v17  ;;  %v3377_v36 = vadd.f32 %v3376_v15, %v3375_v38  ;;  %v7453_v38 = vld [vmem:[#allocation44_spill] sm:$0xff]  ;;  %v7454_v5 = vld [vmem:[#allocation15_spill] sm:$0xff] }
 0x21f   : > { %v3279_v46 = vrot.slane %v3278_v8, 4  ;;  %v3379_v52 = vadd.f32 %v3378_v12, %v3377_v36  ;;  %v7455_v12 = vld [vmem:[#allocation53_spill] sm:$0xff] }
 0x221   : > { %v3280_v21 = vadd.f32 %v3279_v46, %v3278_v8  ;;  %v3380_v55 = vrot.slane %v3379_v52, 4 }
 0x223   : > { %v3281_v54 = vrot.slane %v3280_v21, 2  ;;  %v3381_v25 = vadd.f32 %v3380_v55, %v3379_v52  ;;  %v7456_v52 = vld [vmem:[#allocation47_spill] sm:$0xff] }
 0x225   : > { %v3282_v10 = vadd.f32 %v3281_v54, %v3280_v21  ;;  %v3382_v11 = vrot.slane %v3381_v25, 2 }
 0x227   : > { %v3283_v23 = vrot.slane %v3282_v10, 1  ;;  %v3383_v26 = vadd.f32 %v3382_v11, %v3381_v25 }
 0x229   : > { %v3284_v50 = vadd.f32 %v3283_v23, %v3282_v10  ;;  %v3384_v49 = vrot.slane %v3383_v26, 1  ;;  %v7460_v10 = vld [vmem:[#allocation55_spill] sm:$0xff]  ;;  %v7461_v23 = vld [vmem:[#allocation8_spill] sm:$0xff] }
 0x22b   : > { %4563 = vmatmul.mubr.msk.f32.vlgmr.msra.gmra.mxu1 %vm3215_vm7, %v3284_v50  ;;  %v3385_v62 = vadd.f32 %v3384_v49, %v3383_v26  ;;  %v7462_v49 = vld [vmem:[#allocation26_spill] sm:$0xff] }
 0x22c   : > { %4566 = vmatpush3.msk.msra.mxu1 %vm6011_vm4, %v7447_v44  ;;  %4569 = vmatprep.mubr.msk.f32.mxu1 %vm4712_vm6, %v7449_v42 }
 0x22d   : > { %4567 = vmatprep.subr.mxu1 %v7449_v42 }
 0x22e   : > { %4568 = vmatpush3.msk.msra.mxu1 %vm6109_vm5, %v7447_v44 }
 0x22f   : > { %4570 = vmatmul.mubr.msk.f32.vlgmr.msra.gmra.mxu1 %vm3215_vm7, %v3385_v62 }
 0x2eb   : > { %v3478_v34 = vpop.f32.mrf.mxu1 }
 0x2ec   : > { %v3483_v53 = vmul.f32 0.001953125, %v3478_v34 }
 0x2ed   : > { %v4564_v51 = vpop.f32.mrf.mxu1 }
 0x2ee   : > { %v3558_v56 = vmul.f32 %v3483_v53, %v3483_v53  ;;  %v6716_v40 = vrot.slane %v3483_v53, %v6189_v1 }
 0x2ef   : > { %v3553_v29 = vpop.f32.mrf.mxu1 }
 0x2f0   : > { %v3557_v28 = vmul.f32 0.001953125, %v3553_v29  ;;  %v3564_v24 = vsub.f32 %v6292_v6, %v6716_v40  ;;  %v3565_v43 = vsub.f32 %v6325_v32, %v6716_v40  ;;  %v3566_v17 = vsub.f32 %v6289_v7, %v6716_v40  ;;  %v7457_v6 = vld [vmem:[#allocation21_spill] sm:$0xff]  ;;  %v7458_v32 = vld [vmem:[#allocation23_spill] sm:$0xff]  ;;  %v7459_v7 = vld [vmem:[#allocation6_spill] sm:$0xff] }
 0x2f1   : > { %v4571_v3 = vpop.f32.mrf.mxu1  ;;  %v3567_v15 = vsub.f32 %v7453_v38, %v6716_v40  ;;  %v3568_v8 = vsub.f32 %v7454_v5, %v6716_v40  ;;  %v3569_v46 = vsub.f32 %v7455_v12, %v6716_v40  ;;  %v3570_v21 = vsub.f32 %v7456_v52, %v6716_v40 }
 0x2f2   : > { %v3559_v39 = vsub.f32 %v3557_v28, %v3558_v56  ;;  %v3571_v55 = vsub.f32 %v7457_v6, %v6716_v40  ;;  %v3572_v54 = vsub.f32 %v7458_v32, %v6716_v40  ;;  %v3573_v25 = vsub.f32 %v7459_v7, %v6716_v40 }
 0x2f3   : > { %v3574_v11 = vsub.f32 %v7460_v10, %v6716_v40  ;;  %v3575_v26 = vsub.f32 %v7461_v23, %v6716_v40  ;;  %v3576_v50 = vsub.f32 %v6487_v30, %v6716_v40  ;;  %v3577_v44 = vsub.f32 %v7462_v49, %v6716_v40 }
 0x2f4   : > { %v3596_v0 = vadd.f32 1e-05, %v3559_v39  ;;  %v3578_v42 = vsub.f32 %v7463_v57, %v6716_v40  ;;  %v3579_v62 = vsub.f32 %v6494_v35, %v6716_v40  ;;  %v3580_v22 = vsub.f32 %v6530_v20, %v6716_v40 }
 0x2f5   : > { %v3581_v34 = vsub.f32 %v6567_v2, %v6716_v40  ;;  %v3582_v51 = vsub.f32 %v6526_v41, %v6716_v40  ;;  %v3583_v30 = vsub.f32 %v6558_v45, %v6716_v40  ;;  %v3584_v3 = vsub.f32 %v6584_v60, %v6716_v40 }
 0x2f6   : > { %4699 = vrsqrt.f32 %v3596_v0  ;;  %v3585_v35 = vsub.f32 %v6612_v61, %v6716_v40  ;;  %v3586_v20 = vsub.f32 %v6588_v31, %v6716_v40  ;;  %v3587_v2 = vsub.f32 %v6600_v19, %v6716_v40 }
 0x2f7   : > { %v3588_v41 = vsub.f32 %v6633_v27, %v6716_v40  ;;  %v3589_v45 = vsub.f32 %v6652_v48, %v6716_v40  ;;  %v3591_v60 = vsub.f32 %v6649_v16, %v6716_v40  ;;  %v3592_v61 = vsub.f32 %v6664_v4, %v6716_v40 }
 0x2f8   : > { %v3593_v31 = vsub.f32 %v6684_v9, %v6716_v40  ;;  %v3594_v19 = vsub.f32 %v6673_v58, %v6716_v40  ;;  %v3595_v27 = vsub.f32 %v6682_v47, %v6716_v40 }
 0x303   : > { %v4700_v36 = vpop.eup %4699 }
 0x304   : > { %v3601_v29 = vrot.slane %v4700_v36, %v6189_v1  ;;  %v3590_v1 = vsub.f32 %v6638_v33, %v6716_v40 }
 0x306   : > { %v3602_v53 = vmul.f32 %v3601_v29, %v3564_v24  ;;  %v3603_v48 = vmul.f32 %v3601_v29, %v3565_v43  ;;  %v3604_v56 = vmul.f32 %v3601_v29, %v3566_v17  ;;  %v3605_v28 = vmul.f32 %v3601_v29, %v3567_v15 }
 0x307   : > { %v3606_v33 = vmul.f32 %v3601_v29, %v3568_v8  ;;  %v3607_v39 = vmul.f32 %v3601_v29, %v3569_v46  ;;  %v3608_v0 = vmul.f32 %v3601_v29, %v3570_v21  ;;  %v3609_v16 = vmul.f32 %v3601_v29, %v3571_v55 }
 0x308   : > { %v3610_v63 = vmul.f32 %v3601_v29, %v3572_v54  ;;  %v3611_v13 = vmul.f32 %v3601_v29, %v3573_v25  ;;  %v3612_v4 = vmul.f32 %v3601_v29, %v3574_v11  ;;  %v3613_v14 = vmul.f32 %v3601_v29, %v3575_v26 }
 0x309   : > { %v3614_v37 = vmul.f32 %v3601_v29, %v3576_v50  ;;  %v3615_v9 = vmul.f32 %v3601_v29, %v3577_v44  ;;  %v3616_v38 = vmul.f32 %v3601_v29, %v3578_v42  ;;  %v3617_v5 = vmul.f32 %v3601_v29, %v3579_v62 }
 0x30a   : > { %v3618_v58 = vmul.f32 %v3601_v29, %v3580_v22  ;;  %v3619_v36 = vmul.f32 %v3601_v29, %v3581_v34  ;;  %v3620_v12 = vmul.f32 %v3601_v29, %v3582_v51  ;;  %v3621_v47 = vmul.f32 %v3601_v29, %v3583_v30 }
 0x30b   : > { %v3622_v40 = vmul.f32 %v3601_v29, %v3584_v3  ;;  %v3623_v24 = vmul.f32 %v3601_v29, %v3585_v35  ;;  %v3624_v43 = vmul.f32 %v3601_v29, %v3586_v20  ;;  %v3625_v17 = vmul.f32 %v3601_v29, %v3587_v2 }
 0x30c   : > { %v3626_v15 = vmul.f32 %v3601_v29, %v3588_v41  ;;  %v3627_v8 = vmul.f32 %v3601_v29, %v3589_v45  ;;  %v3628_v46 = vmul.f32 %v3601_v29, %v3590_v1  ;;  %v3629_v52 = vmul.f32 %v3601_v29, %v3591_v60 }
 0x30d   : > { %v3630_v21 = vmul.f32 %v3601_v29, %v3592_v61  ;;  %v3631_v6 = vmul.f32 %v3601_v29, %v3593_v31  ;;  %v3632_v55 = vmul.f32 %v3601_v29, %v3594_v19  ;;  %v3633_v32 = vmul.f32 %v3601_v29, %v3595_v27 }
 0x30e   : > { %v3638_v54 = vmul.f32 %v6719_v59, %v3602_v53  ;;  %v3639_v7 = vmul.f32 %v6719_v59, %v3603_v48  ;;  %v3640_v25 = vmul.f32 %v6719_v59, %v3604_v56  ;;  %v3641_v10 = vmul.f32 %v6719_v59, %v3605_v28 }
 0x30f   : > { %v3642_v11 = vmul.f32 %v6719_v59, %v3606_v33  ;;  %v3643_v23 = vmul.f32 %v6719_v59, %v3607_v39  ;;  %v3644_v26 = vmul.f32 %v6719_v59, %v3608_v0  ;;  %v3645_v50 = vmul.f32 %v6719_v59, %v3609_v16 }
 0x310   : > { %v3646_v49 = vmul.f32 %v6719_v59, %v3610_v63  ;;  %v3647_v44 = vmul.f32 %v6719_v59, %v3611_v13  ;;  %v3648_v57 = vmul.f32 %v6719_v59, %v3612_v4  ;;  %v3649_v42 = vmul.f32 %v6719_v59, %v3613_v14 }
 0x311   : > { %v3650_v62 = vmul.f32 %v6719_v59, %v3614_v37  ;;  %v3651_v22 = vmul.f32 %v6719_v59, %v3615_v9  ;;  %v3652_v34 = vmul.f32 %v6719_v59, %v3616_v38  ;;  %v3653_v51 = vmul.f32 %v6719_v59, %v3617_v5 }
 0x312   : > { %v3654_v30 = vmul.f32 %v6719_v59, %v3618_v58  ;;  %v3655_v29 = vmul.f32 %v6719_v59, %v3619_v36  ;;  %v3656_v3 = vmul.f32 %v6719_v59, %v3620_v12  ;;  %v3657_v35 = vmul.f32 %v6719_v59, %v3621_v47 }
 0x313   : > { %v3658_v20 = vmul.f32 %v6719_v59, %v3622_v40  ;;  %v3659_v2 = vmul.f32 %v6719_v59, %v3623_v24  ;;  %v3660_v41 = vmul.f32 %v6719_v59, %v3624_v43  ;;  %v3661_v45 = vmul.f32 %v6719_v59, %v3625_v17 }
 0x314   : > { %v3662_v1 = vmul.f32 %v6719_v59, %v3626_v15  ;;  %v3663_v60 = vmul.f32 %v6719_v59, %v3627_v8  ;;  %v3664_v61 = vmul.f32 %v6719_v59, %v3628_v46  ;;  %v3665_v31 = vmul.f32 %v6719_v59, %v3629_v52 }
 0x315   : > { %v3666_v19 = vmul.f32 %v6719_v59, %v3630_v21  ;;  %v3667_v27 = vmul.f32 %v6719_v59, %v3631_v6  ;;  %v3668_v53 = vmul.f32 %v6719_v59, %v3632_v55  ;;  %v3669_v48 = vmul.f32 %v6719_v59, %v3633_v32 }
 0x316   : > { %v6822_v56 = vadd.f32 %v6722_v18, %v3638_v54  ;;  %v6825_v28 = vadd.f32 %v6722_v18, %v3639_v7  ;;  %v6828_v33 = vadd.f32 %v6722_v18, %v3640_v25  ;;  %v6831_v39 = vadd.f32 %v6722_v18, %v3641_v10 }
 0x317   : > { %v6834_v0 = vadd.f32 %v6722_v18, %v3642_v11  ;;  %v6837_v16 = vadd.f32 %v6722_v18, %v3643_v23  ;;  %v6840_v59 = vadd.f32 %v6722_v18, %v3644_v26  ;;  %v6843_v63 = vadd.f32 %v6722_v18, %v3645_v50 }
 0x318   : > { %v6846_v13 = vadd.f32 %v6722_v18, %v3646_v49  ;;  %v6849_v4 = vadd.f32 %v6722_v18, %v3647_v44  ;;  %v6852_v14 = vadd.f32 %v6722_v18, %v3648_v57  ;;  %v6855_v37 = vadd.f32 %v6722_v18, %v3649_v42 }
 0x319   : > { %v6858_v9 = vadd.f32 %v6722_v18, %v3650_v62  ;;  %v6861_v38 = vadd.f32 %v6722_v18, %v3651_v22  ;;  %v6864_v5 = vadd.f32 %v6722_v18, %v3652_v34  ;;  %v6867_v58 = vadd.f32 %v6722_v18, %v3653_v51 }
 0x31a   : > { %v6870_v36 = vadd.f32 %v6722_v18, %v3654_v30  ;;  %v6873_v12 = vadd.f32 %v6722_v18, %v3655_v29  ;;  %v6876_v47 = vadd.f32 %v6722_v18, %v3656_v3  ;;  %v6879_v40 = vadd.f32 %v6722_v18, %v3657_v35 }
 0x31b   : > { %v6882_v24 = vadd.f32 %v6722_v18, %v3658_v20  ;;  %v6885_v43 = vadd.f32 %v6722_v18, %v3659_v2  ;;  %v6888_v17 = vadd.f32 %v6722_v18, %v3660_v41  ;;  %v6891_v15 = vadd.f32 %v6722_v18, %v3661_v45 }
 0x31c   : > { %v6894_v8 = vadd.f32 %v6722_v18, %v3662_v1  ;;  %v6897_v46 = vadd.f32 %v6722_v18, %v3663_v60  ;;  %v6900_v52 = vadd.f32 %v6722_v18, %v3664_v61  ;;  %v6903_v21 = vadd.f32 %v6722_v18, %v3665_v31 }
 0x31d   : > { %v6906_v6 = vadd.f32 %v6722_v18, %v3666_v19  ;;  %v6909_v55 = vadd.f32 %v6722_v18, %v3667_v27  ;;  %vm3706_vm8 = vcmp.ge.f32.partialorder %v6822_v56, 0.0  ;;  %vm3707_vm9 = vcmp.ge.f32.partialorder %v6825_v28, 0.0 }
 0x31e   : > { %vm3708_vm10 = vcmp.ge.f32.partialorder %v6828_v33, 0.0  ;;  %vm3709_vm11 = vcmp.ge.f32.partialorder %v6831_v39, 0.0  ;;  %vm3710_vm12 = vcmp.ge.f32.partialorder %v6834_v0, 0.0  ;;  %vm3711_vm13 = vcmp.ge.f32.partialorder %v6837_v16, 0.0 }
 0x31f   : > { %vm3712_vm14 = vcmp.ge.f32.partialorder %v6840_v59, 0.0  ;;  %vm3713_vm15 = vcmp.ge.f32.partialorder %v6843_v63, 0.0  ;;  %v6929_v32 = vadd.f32 %v6722_v18, %v3668_v53  ;;  %v3738_v54 = vmul.f32 0.01, %v6822_v56 }
 0x320   : > { %v3739_v7 = vmul.f32 0.01, %v6825_v28  ;;  %v3740_v25 = vmul.f32 0.01, %v6828_v33  ;;  %v6939_v10 = vadd.f32 %v6722_v18, %v3669_v48  ;;  %vm3721_vm1 = vcmp.ge.f32.partialorder %v6867_v58, 0.0 }
 0x321   : > { %vm3722_vm2 = vcmp.ge.f32.partialorder %v6870_v36, 0.0  ;;  %v3741_v11 = vmul.f32 0.01, %v6831_v39  ;;  %v3742_v23 = vmul.f32 0.01, %v6834_v0  ;;  %vm3727_vm6 = vcmp.ge.f32.partialorder %v6885_v43, 0.0 }
 0x322   : > { %v3743_v26 = vmul.f32 0.01, %v6837_v16  ;;  %v3744_v18 = vmul.f32 0.01, %v6840_v59  ;;  %v3745_v50 = vmul.f32 0.01, %v6843_v63  ;;  %v3770_v44 = vsel %vm3706_vm8, %v6822_v56, %v3738_v54 }
 0x323   : > { %v3746_v49 = vmul.f32 0.01, %v6846_v13  ;;  %vm3728_vm3 = vcmp.ge.f32.partialorder %v6888_v17, 0.0  ;;  %v3747_v57 = vmul.f32 0.01, %v6849_v4  ;;  %v3771_v22 = vsel %vm3707_vm9, %v6825_v28, %v3739_v7  ;;  %3802 = vst.msk [vmem:[%s6926_s23] sm:$0xff] %vm3215_vm7, %v3770_v44 }
 0x324   : > { %v3748_v42 = vmul.f32 0.01, %v6852_v14  ;;  %v3749_v62 = vmul.f32 0.01, %v6855_v37  ;;  %vm3732_vm8 = vcmp.ge.f32.partialorder %v6900_v52, 0.0  ;;  %vm3733_vm5 = vcmp.ge.f32.partialorder %v6903_v21, 0.0 }
 0x325   : > { %vm3735_vm0 = vcmp.ge.f32.partialorder %v6909_v55, 0.0  ;;  %v3750_v34 = vmul.f32 0.01, %v6858_v9  ;;  %v3751_v51 = vmul.f32 0.01, %v6861_v38  ;;  %v3772_v29 = vsel %vm3708_vm10, %v6828_v33, %v3740_v25  ;;  %3803 = vst.msk [vmem:[%s6926_s23 + $0x8] sm:$0xff] %vm3215_vm7, %v3771_v22 }
 0x326   : > { %v3752_v30 = vmul.f32 0.01, %v6864_v5  ;;  %vm3736_vm9 = vcmp.ge.f32.partialorder %v6929_v32, 0.0  ;;  %vm3737_vm4 = vcmp.ge.f32.partialorder %v6939_v10, 0.0  ;;  %v3753_v3 = vmul.f32 0.01, %v6867_v58 }
 0x327   : > { %v3754_v35 = vmul.f32 0.01, %v6870_v36  ;;  %v3755_v20 = vmul.f32 0.01, %v6873_v12  ;;  %v3773_v2 = vsel %vm3709_vm11, %v6831_v39, %v3741_v11  ;;  %3804 = vst.msk [vmem:[%s6926_s23 + $0x10] sm:$0xff] %vm3215_vm7, %v3772_v29  ;;  %v3774_v60 = vsel %vm3710_vm12, %v6834_v0, %v3742_v23 }
 0x328   : > { %v3756_v41 = vmul.f32 0.01, %v6876_v47  ;;  %v3757_v45 = vmul.f32 0.01, %v6879_v40  ;;  %v3758_v1 = vmul.f32 0.01, %v6882_v24  ;;  %v3775_v27 = vsel %vm3711_vm13, %v6837_v16, %v3743_v26 }
 0x329   : > { %3805 = vst.msk [vmem:[%s6926_s23 + $0x18] sm:$0xff] %vm3215_vm7, %v3773_v2  ;;  %v3759_v61 = vmul.f32 0.01, %v6885_v43  ;;  %v3760_v31 = vmul.f32 0.01, %v6888_v17  ;;  %3806 = vst.msk [vmem:[%s6926_s23 + $0x20] sm:$0xff] %vm3215_vm7, %v3774_v60  ;;  %v3776_v28 = vsel %vm3712_vm14, %v6840_v59, %v3744_v18  ;;  %v3777_v16 = vsel %vm3713_vm15, %v6843_v63, %v3745_v50 }
 0x32a   : > { %v3761_v19 = vmul.f32 0.01, %v6891_v15  ;;  %v3762_v53 = vmul.f32 0.01, %v6894_v8  ;;  %v3763_v48 = vmul.f32 0.01, %v6897_v46 }
 0x32b   : > { %v3764_v56 = vmul.f32 0.01, %v6900_v52  ;;  %3807 = vst.msk [vmem:[%s6926_s23 + $0x28] sm:$0xff] %vm3215_vm7, %v3775_v27  ;;  %v3765_v33 = vmul.f32 0.01, %v6903_v21  ;;  %3808 = vst.msk [vmem:[%s6926_s23 + $0x30] sm:$0xff] %vm3215_vm7, %v3776_v28 }
 0x32c   : > { %v3766_v39 = vmul.f32 0.01, %v6906_v6  ;;  %v3767_v0 = vmul.f32 0.01, %v6909_v55  ;;  %v3768_v54 = vmul.f32 0.01, %v6929_v32 }
 0x32d   : > { %v3769_v59 = vmul.f32 0.01, %v6939_v10  ;;  %vm7464_vm10 = vcmp.ge.f32.partialorder %v6846_v13, 0.0  ;;  %vm7465_vm11 = vcmp.ge.f32.partialorder %v6849_v4, 0.0  ;;  %3809 = vst.msk [vmem:[%s6926_s23 + $0x38] sm:$0xff] %vm3215_vm7, %v3777_v16  ;;  %vm7466_vm12 = vcmp.ge.f32.partialorder %v6852_v14, 0.0 }
 0x32e   : > { %v3778_v7 = vsel %vm7464_vm10, %v6846_v13, %v3746_v49  ;;  %v3779_v25 = vsel %vm7465_vm11, %v6849_v4, %v3747_v57  ;;  %v3780_v63 = vsel %vm7466_vm12, %v6852_v14, %v3748_v42  ;;  %vm7467_vm13 = vcmp.ge.f32.partialorder %v6855_v37, 0.0 }
 0x32f   : > { %v3781_v11 = vsel %vm7467_vm13, %v6855_v37, %v3749_v62  ;;  %vm7468_vm14 = vcmp.ge.f32.partialorder %v6858_v9, 0.0  ;;  %vm7469_vm15 = vcmp.ge.f32.partialorder %v6861_v38, 0.0  ;;  %3810 = vst.msk [vmem:[%s6926_s23 + $0x40] sm:$0xff] %vm3215_vm7, %v3778_v7  ;;  %3811 = vst.msk [vmem:[%s6926_s23 + $0x48] sm:$0xff] %vm3215_vm7, %v3779_v25  ;;  %vm7470_vm10 = vcmp.ge.f32.partialorder %v6864_v5, 0.0 }
 0x330   : > { %v3782_v23 = vsel %vm7468_vm14, %v6858_v9, %v3750_v34  ;;  %v3783_v13 = vsel %vm7469_vm15, %v6861_v38, %v3751_v51  ;;  %v3784_v4 = vsel %vm7470_vm10, %v6864_v5, %v3752_v30  ;;  %v3785_v14 = vsel %vm3721_vm1, %v6867_v58, %v3753_v3  ;;  %3812 = vst.msk [vmem:[%s6926_s23 + $0x50] sm:$0xff] %vm3215_vm7, %v3780_v63 }
 0x331   : > { %v3786_v37 = vsel %vm3722_vm2, %v6870_v36, %v3754_v35  ;;  %vm7471_vm11 = vcmp.ge.f32.partialorder %v6873_v12, 0.0  ;;  %3813 = vst.msk [vmem:[%s6926_s23 + $0x58] sm:$0xff] %vm3215_vm7, %v3781_v11  ;;  %3814 = vst.msk [vmem:[%s6926_s23 + $0x60] sm:$0xff] %vm3215_vm7, %v3782_v23  ;;  %vm7472_vm1 = vcmp.ge.f32.partialorder %v6876_v47, 0.0  ;;  %vm7473_vm2 = vcmp.ge.f32.partialorder %v6879_v40, 0.0 }
 0x332   : > { %v3787_v9 = vsel %vm7471_vm11, %v6873_v12, %v3755_v20  ;;  %3815 = vst.msk [vmem:[%s6926_s23 + $0x68] sm:$0xff] %vm3215_vm7, %v3783_v13  ;;  %v3788_v38 = vsel %vm7472_vm1, %v6876_v47, %v3756_v41  ;;  %v3789_v5 = vsel %vm7473_vm2, %v6879_v40, %v3757_v45  ;;  %vm7474_vm12 = vcmp.ge.f32.partialorder %v6882_v24, 0.0  ;;  %3816 = vst.msk [vmem:[%s6926_s23 + $0x70] sm:$0xff] %vm3215_vm7, %v3784_v4 }
 0x333   : > { %v3790_v58 = vsel %vm7474_vm12, %v6882_v24, %v3758_v1  ;;  %v3791_v36 = vsel %vm3727_vm6, %v6885_v43, %v3759_v61  ;;  %3817 = vst.msk [vmem:[%s6926_s23 + $0x78] sm:$0xff] %vm3215_vm7, %v3785_v14  ;;  %3818 = vst.msk [vmem:[%s6926_s23 + $0x80] sm:$0xff] %vm3215_vm7, %v3786_v37  ;;  %v3792_v12 = vsel %vm3728_vm3, %v6888_v17, %v3760_v31  ;;  %vm7475_vm13 = vcmp.ge.f32.partialorder %v6891_v15, 0.0 }
 0x334   : > { %3819 = vst.msk [vmem:[%s6926_s23 + $0x88] sm:$0xff] %vm3215_vm7, %v3787_v9  ;;  %v3793_v47 = vsel %vm7475_vm13, %v6891_v15, %v3761_v19  ;;  %vm7476_vm6 = vcmp.ge.f32.partialorder %v6894_v8, 0.0  ;;  %vm7477_vm14 = vcmp.ge.f32.partialorder %v6897_v46, 0.0  ;;  %3820 = vst.msk [vmem:[%s6926_s23 + $0x90] sm:$0xff] %vm3215_vm7, %v3788_v38  ;;  %v3796_v43 = vsel %vm3732_vm8, %v6900_v52, %v3764_v56 }
 0x335   : > { %v3794_v40 = vsel %vm7476_vm6, %v6894_v8, %v3762_v53  ;;  %v3795_v24 = vsel %vm7477_vm14, %v6897_v46, %v3763_v48  ;;  %3821 = vst.msk [vmem:[%s6926_s23 + $0x98] sm:$0xff] %vm3215_vm7, %v3789_v5  ;;  %3822 = vst.msk [vmem:[%s6926_s23 + $0xa0] sm:$0xff] %vm3215_vm7, %v3790_v58  ;;  %v3797_v17 = vsel %vm3733_vm5, %v6903_v21, %v3765_v33  ;;  %vm7478_vm3 = vcmp.ge.f32.partialorder %v6906_v6, 0.0 }
 0x336   : > { %3823 = vst.msk [vmem:[%s6926_s23 + $0xa8] sm:$0xff] %vm3215_vm7, %v3791_v36  ;;  %v3798_v15 = vsel %vm7478_vm3, %v6906_v6, %v3766_v39  ;;  %v3799_v8 = vsel %vm3735_vm0, %v6909_v55, %v3767_v0  ;;  %3824 = vst.msk [vmem:[%s6926_s23 + $0xb0] sm:$0xff] %vm3215_vm7, %v3792_v12  ;;  %v3800_v46 = vsel %vm3736_vm9, %v6929_v32, %v3768_v54 }
 0x337   : > { %3825 = vst.msk [vmem:[%s6926_s23 + $0xb8] sm:$0xff] %vm3215_vm7, %v3793_v47  ;;  %3826 = vst.msk [vmem:[%s6926_s23 + $0xc0] sm:$0xff] %vm3215_vm7, %v3794_v40  ;;  %v3801_v52 = vsel %vm3737_vm4, %v6939_v10, %v3769_v59 }
 0x338   : > { %3827 = vst.msk [vmem:[%s6926_s23 + $0xc8] sm:$0xff] %vm3215_vm7, %v3795_v24  ;;  %3828 = vst.msk [vmem:[%s6926_s23 + $0xd0] sm:$0xff] %vm3215_vm7, %v3796_v43 }
 0x339   : > { %3829 = vst.msk [vmem:[%s6926_s23 + $0xd8] sm:$0xff] %vm3215_vm7, %v3797_v17  ;;  %3830 = vst.msk [vmem:[%s6926_s23 + $0xe0] sm:$0xff] %vm3215_vm7, %v3798_v15 }
 0x33a   : > { %3831 = vst.msk [vmem:[%s6926_s23 + $0xe8] sm:$0xff] %vm3215_vm7, %v3799_v8  ;;  %3832 = vst.msk [vmem:[%s6926_s23 + $0xf0] sm:$0xff] %vm3215_vm7, %v3800_v46 }
 0x33b   : > { %3833 = vst.msk [vmem:[%s6926_s23 + $0xf8] sm:$0xff] %vm3215_vm7, %v3801_v52 }
 0x33c PF: > { %s14_s15 = sadd.s32 1, %s4707_s15  }
 0x33d   : > { %p11_p4 = scmp.ge.s32.totalorder %s14_s15, 4  }
 0x33f   :  { %13 = sbr.rel (!%p11_p4) target bundleno = 1 (0x1), region = 77 }

</bundles_post_ra>
